<compile_context>
chip_gen: v5e
topology: v5e:2x2
jax: 0.10.0
libtpu: 0.0.40
codegen_flags: <defaults>
</compile_context>

<pallas_src>
import functools

import jax
import jax.numpy as jnp
import numpy as np
from jax.experimental import pallas as pl
from jax.experimental.pallas import tpu as pltpu


def _ceil_to(x, m):
  return ((x + m - 1) // m) * m


# ----------------------------------------------------------------------------
# Pallas kernel: T decode steps of UpDownCore (both LSTM cells + attention).
# Grid axis 0 = timestep ("arbitrary", sequential).  Weights/features resident,
# xt streamed, h/c state carried in VMEM scratch.
# ----------------------------------------------------------------------------
def _updown_kernel(
    # streamed / resident activations & initial state
    xt_ref, fc_ref, attf_ref, pattf_ref, mask_ref, h0_ref, c0_ref,
    # att_lstm weights (pre-split per input stream, gate-block padded, (in, 4R))
    w_att_ph_ref, w_att_fc_ref, w_att_xt_ref, w_att_hh_ref, b_att_ref,
    # lang_lstm weights
    w_lang_ar_ref, w_lang_ha_ref, w_lang_hh_ref, b_lang_ref,
    # attention weights
    w_h2att_ref, b_h2att_ref, w_alpha_ref,
    # outputs
    out_ref, h_state_ref, c_state_ref,
    # scratch (persists across grid steps)
    h_sc, c_sc,
    *, r_pad: int,
):
  R = r_pad
  f32 = jnp.float32
  cdt = w_att_hh_ref.dtype      # MXU operand dtype (f32 or bf16)
  t = pl.program_id(0)

  @pl.when(t == 0)
  def _():
    h_sc[...] = h0_ref[...]
    c_sc[...] = c0_ref[...]

  def mm(act, w_ref):
    # bf16 (or f32) MXU operands, f32 accumulation.
    return jnp.dot(act.astype(cdt), w_ref[...], preferred_element_type=f32)

  def lstm_from_gates(gates, c_prev):
    # Gate blocks are 128-lane aligned (R = R_pad) -> full-vreg slices.
    i = jax.nn.sigmoid(gates[:, 0 * R:1 * R])
    f = jax.nn.sigmoid(gates[:, 1 * R:2 * R])
    g = jnp.tanh(gates[:, 2 * R:3 * R])
    o = jax.nn.sigmoid(gates[:, 3 * R:4 * R])
    c_new = f * c_prev + i * g
    h_new = o * jnp.tanh(c_new)
    return h_new, c_new

  h_att_prev = h_sc[0]
  h_lang_prev = h_sc[1]
  xt = xt_ref[0]

  # --- att_lstm: concat([h_lang, fc, xt]) @ W_ih == sum of split matmuls ----
  # (largest-K matmul first so the MXU accumulation chain starts wide.)
  gates_att = (mm(xt, w_att_xt_ref)
               + mm(h_lang_prev, w_att_ph_ref)
               + mm(fc_ref[...], w_att_fc_ref)
               + mm(h_att_prev, w_att_hh_ref)
               + b_att_ref[...])
  h_att, c_att = lstm_from_gates(gates_att, c_sc[0])

  # --- attention ------------------------------------------------------------
  att_h = mm(h_att, w_h2att_ref) + b_h2att_ref[...]                   # (B, A)
  # Elementwise block kept in f32 (v5e VPU/EUP have no bf16 path).
  dot = jnp.tanh(pattf_ref[...].astype(f32) + att_h[:, None, :])      # (B, L, A)
  # alpha_net bias dropped in the wrapper (softmax is shift-invariant).
  logits = jnp.sum(dot * w_alpha_ref[...].astype(f32), axis=-1)       # (B, L)
  # Max is taken over logits that include padded-L positions; the shift cancels
  # in softmax, so this is exact (do not "fix" by masking before the max).
  m = jnp.max(logits, axis=1, keepdims=True)
  # Mask fused into a single softmax normalization (identical to
  # softmax -> mask -> renormalize; the first denominator cancels).
  e = jnp.exp(logits - m) * mask_ref[...]
  # NOTE: an all-zero mask row yields 0/0 (NaN) — same behavior as the reference.
  weight = e * pl.reciprocal(jnp.sum(e, axis=1, keepdims=True))       # (B, L)
  # Weighted sum over L (sublane reduce; fine at small L — see TODO for prod L).
  att_res = jnp.sum(weight[:, :, None] * attf_ref[...].astype(f32), axis=1)

  # --- lang_lstm: concat([att_res, h_att]) @ W_ih == sum of split matmuls ---
  gates_lang = (mm(att_res, w_lang_ar_ref)
                + mm(h_att, w_lang_ha_ref)
                + mm(h_lang_prev, w_lang_hh_ref)
                + b_lang_ref[...])
  h_lang, c_lang = lstm_from_gates(gates_lang, c_sc[1])

  # Carry state in VMEM scratch across grid steps.
  h_sc[0] = h_att
  h_sc[1] = h_lang
  c_sc[0] = c_att
  c_sc[1] = c_lang

  # F.dropout in eval mode is identity; per-step output == h_lang.
  out_ref[0] = h_lang

  # Final state written once (output block is resident across the T axis).
  @pl.when(t == pl.num_programs(0) - 1)
  def _():
    h_state_ref[...] = h_sc[...]
    c_state_ref[...] = c_sc[...]


# ----------------------------------------------------------------------------
# One-time weight preparation (hoisted out of the per-step path).
# ----------------------------------------------------------------------------
def prepare_updown_params(params, E, R, A, dtype=jnp.float32):
  """Transpose / split / pad / cast the UpDownCore weights once."""
  R_pad = _ceil_to(R, 128)
  E_pad = _ceil_to(E, 128)
  A_pad = _ceil_to(A, 128)
  f32 = jnp.float32

  def prep_gate_w(w_t, in_dim, in_pad):
    # w_t: (in_dim, 4R), PyTorch LSTMCell gate order [i, f, g, o].
    w4 = w_t.astype(f32).reshape(in_dim, 4, R)
    w4 = jnp.pad(w4, ((0, in_pad - in_dim), (0, 0), (0, R_pad - R)))
    return w4.reshape(in_pad, 4 * R_pad).astype(dtype)

  def prep_gate_b(b_ih, b_hh):
    b = (b_ih.astype(f32) + b_hh.astype(f32)).reshape(4, R)
    b = jnp.pad(b, ((0, 0), (0, R_pad - R)))
    return b.reshape(1, 4 * R_pad)                     # biases stay f32

  def pad2(x, shape):
    return jnp.pad(x.astype(f32), [(0, t - s) for s, t in zip(x.shape, shape)])

  # att_lstm input columns: [prev_h_lang (R), fc_feats (R), xt (E)].
  w_ih_att_t = params["att_lstm.w_ih"].T               # (2R + E, 4R)
  # lang_lstm input columns: [att_res (R), h_att (R)].
  w_ih_lang_t = params["lang_lstm.w_ih"].T             # (2R, 4R)

  return {
      "dtype": jnp.dtype(dtype), "R": R, "E": E, "A": A,
      "R_pad": R_pad, "E_pad": E_pad, "A_pad": A_pad,
      "w_att_ph": prep_gate_w(w_ih_att_t[0:R], R, R_pad),
      "w_att_fc": prep_gate_w(w_ih_att_t[R:2 * R], R, R_pad),
      "w_att_xt": prep_gate_w(w_ih_att_t[2 * R:], E, E_pad),
      "w_att_hh": prep_gate_w(params["att_lstm.w_hh"].T, R, R_pad),
      "b_att": prep_gate_b(params["att_lstm.b_ih"], params["att_lstm.b_hh"]),
      "w_lang_ar": prep_gate_w(w_ih_lang_t[0:R], R, R_pad),
      "w_lang_ha": prep_gate_w(w_ih_lang_t[R:2 * R], R, R_pad),
      "w_lang_hh": prep_gate_w(params["lang_lstm.w_hh"].T, R, R_pad),
      "b_lang": prep_gate_b(params["lang_lstm.b_ih"], params["lang_lstm.b_hh"]),
      "w_h2att": pad2(params["h2att.w"].T, (R_pad, A_pad)).astype(dtype),
      "b_h2att": pad2(params["h2att.b"].reshape(1, A), (1, A_pad)),
      # alpha_net.b dropped: softmax is invariant to a constant logit shift.
      "w_alpha": pad2(params["alpha_net.w"].reshape(1, A), (1, A_pad)),
  }


def _pick_vmem_limit(bytes_needed):
  cap = 128 * 1024 * 1024
  try:
    cap = int(pltpu.get_tpu_info().vmem_capacity_bytes)
  except Exception:
    pass  # fall back to a conservative default if the query is unavailable
  want = int(bytes_needed) + (8 << 20)                  # headroom for compiler scratch
  return int(max(16 << 20, min(want, int(cap * 0.85))))


# ----------------------------------------------------------------------------
# Multi-timestep decode: one pallas_call, grid over T, weights resident.
# ----------------------------------------------------------------------------
def updown_core_decode(xt_seq, fc_feats, att_feats, p_att_feats,
                       state_h, state_c, prepared, att_masks=None):
  T, B, E = xt_seq.shape
  _, L, D = att_feats.shape
  R, A = prepared["R"], prepared["A"]
  assert D == R and E == prepared["E"] and p_att_feats.shape[-1] == A
  R_pad, E_pad, A_pad = prepared["R_pad"], prepared["E_pad"], prepared["A_pad"]
  B_pad = _ceil_to(B, 8)
  L_pad = _ceil_to(L, 8)
  dtype = prepared["dtype"]
  f32 = jnp.float32
  G4 = 4 * R_pad

  def pad_to(x, shape, dt=f32):
    x = x.astype(dt)
    return jnp.pad(x, [(0, t - s) for s, t in zip(x.shape, shape)])

  # Activations: large feature tensors cast to the weight dtype (MXU operands /
  # HBM traffic); mask and state kept f32.
  xt_p = pad_to(xt_seq, (T, B_pad, E_pad), dtype)
  fc_p = pad_to(fc_feats, (B_pad, R_pad), dtype)
  attf_p = pad_to(att_feats, (B_pad, L_pad, R_pad), dtype)
  pattf_p = pad_to(p_att_feats, (B_pad, L_pad, A_pad), dtype)
  if att_masks is None:
    att_masks = jnp.ones((B, L), f32)
  mask_p = pad_to(att_masks, (B_pad, L_pad), f32)
  if B_pad > B:
    # Give padded batch rows one valid location so their (discarded) softmax
    # denominator is non-zero (keeps NaNs out of the carried state).
    mask_p = mask_p.at[B:, 0].set(1.0)
  h_p = pad_to(state_h, (2, B_pad, R_pad), f32)
  c_p = pad_to(state_c, (2, B_pad, R_pad), f32)

  inputs = (xt_p, fc_p, attf_p, pattf_p, mask_p, h_p, c_p,
            prepared["w_att_ph"], prepared["w_att_fc"], prepared["w_att_xt"],
            prepared["w_att_hh"], prepared["b_att"],
            prepared["w_lang_ar"], prepared["w_lang_ha"], prepared["w_lang_hh"],
            prepared["b_lang"],
            prepared["w_h2att"], prepared["b_h2att"], prepared["w_alpha"])

  const2 = lambda t: (0, 0)
  const3 = lambda t: (0, 0, 0)
  in_specs = [
      # xt: streamed per timestep, explicitly double-buffered.
      pl.BlockSpec((1, B_pad, E_pad), lambda t: (t, 0, 0),
                   pipeline_mode=pl.Buffered(2)),
      # Everything below has a constant block index -> loaded once, resident.
      pl.BlockSpec((B_pad, R_pad), const2),
      pl.BlockSpec((B_pad, L_pad, R_pad), const3),
      pl.BlockSpec((B_pad, L_pad, A_pad), const3),
      pl.BlockSpec((B_pad, L_pad), const2),
      pl.BlockSpec((2, B_pad, R_pad), const3),
      pl.BlockSpec((2, B_pad, R_pad), const3),
      pl.BlockSpec((R_pad, G4), const2),      # w_att_ph
      pl.BlockSpec((R_pad, G4), const2),      # w_att_fc
      pl.BlockSpec((E_pad, G4), const2),      # w_att_xt
      pl.BlockSpec((R_pad, G4), const2),      # w_att_hh
      pl.BlockSpec((1, G4), const2),          # b_att
      pl.BlockSpec((R_pad, G4), const2),      # w_lang_ar
      pl.BlockSpec((R_pad, G4), const2),      # w_lang_ha
      pl.BlockSpec((R_pad, G4), const2),      # w_lang_hh
      pl.BlockSpec((1, G4), const2),          # b_lang
      pl.BlockSpec((R_pad, A_pad), const2),   # w_h2att
      pl.BlockSpec((1, A_pad), const2),       # b_h2att
      pl.BlockSpec((1, A_pad), const2),       # w_alpha
  ]
  out_specs = (
      pl.BlockSpec((1, B_pad, R_pad), lambda t: (t, 0, 0)),   # per-step h_lang
      pl.BlockSpec((2, B_pad, R_pad), const3),                # final h state
      pl.BlockSpec((2, B_pad, R_pad), const3),                # final c state
  )
  out_shape = (
      jax.ShapeDtypeStruct((T, B_pad, R_pad), f32),
      jax.ShapeDtypeStruct((2, B_pad, R_pad), f32),
      jax.ShapeDtypeStruct((2, B_pad, R_pad), f32),
  )
  scratch_shapes = [pltpu.VMEM((2, B_pad, R_pad), f32),
                    pltpu.VMEM((2, B_pad, R_pad), f32)]

  # VMEM budget: resident operands + double-buffered streamed blocks +
  # state/scratch + the two (B, L, A) attention temporaries.
  nbytes = lambda x: int(x.size) * x.dtype.itemsize
  resident = sum(nbytes(x) for x in inputs[1:])
  streamed = 2 * (B_pad * E_pad * dtype.itemsize + B_pad * R_pad * 4)
  state_bytes = 4 * 2 * B_pad * R_pad * 4
  attn_tmp = 2 * B_pad * L_pad * A_pad * 4
  vmem_limit = _pick_vmem_limit(resident + streamed + state_bytes + attn_tmp)

  kernel = functools.partial(_updown_kernel, r_pad=R_pad)
  out_p, h_state_p, c_state_p = pl.pallas_call(
      kernel,
      grid=(T,),
      in_specs=in_specs,
      out_specs=out_specs,
      out_shape=out_shape,
      scratch_shapes=scratch_shapes,
      compiler_params=pltpu.CompilerParams(
          dimension_semantics=("arbitrary",),     # sequential state carry over T
          vmem_limit_bytes=vmem_limit),
  )(*inputs)

  out_seq = out_p[:, :B, :R]
  h_new = h_state_p[:, :B, :R]
  c_new = c_state_p[:, :B, :R]
  return out_seq, (h_new, c_new)


# ----------------------------------------------------------------------------
# Single-step wrapper matching the PyTorch module's forward signature.
# ----------------------------------------------------------------------------
def updown_core(xt, fc_feats, att_feats, p_att_feats, state_h, state_c,
                params=None, att_masks=None, prepared=None, dtype=jnp.float32):
  if prepared is None:
    prepared = prepare_updown_params(params, xt.shape[1], fc_feats.shape[1],
                                     p_att_feats.shape[-1], dtype)
  out_seq, (h_new, c_new) = updown_core_decode(
      xt[None], fc_feats, att_feats, p_att_feats, state_h, state_c,
      prepared, att_masks)
  return out_seq[0], (h_new, c_new)


# ----------------------------------------------------------------------------
# Pure-JAX reference (mirrors the PyTorch module exactly) for verification.
# ----------------------------------------------------------------------------
def updown_core_ref(xt, fc_feats, att_feats, p_att_feats, state_h, state_c,
                    params, att_masks=None):
  def lstm_cell(x, h, c, w_ih, w_hh, b_ih, b_hh):
    gates = x @ w_ih.T + b_ih + h @ w_hh.T + b_hh
    i, f, g, o = jnp.split(gates, 4, axis=1)
    c_new = jax.nn.sigmoid(f) * c + jax.nn.sigmoid(i) * jnp.tanh(g)
    h_new = jax.nn.sigmoid(o) * jnp.tanh(c_new)
    return h_new, c_new

  prev_h = state_h[-1]
  att_lstm_input = jnp.concatenate([prev_h, fc_feats, xt], axis=1)
  h_att, c_att = lstm_cell(att_lstm_input, state_h[0], state_c[0],
                           params["att_lstm.w_ih"], params["att_lstm.w_hh"],
                           params["att_lstm.b_ih"], params["att_lstm.b_hh"])
  att_h = h_att @ params["h2att.w"].T + params["h2att.b"]
  dot = jnp.tanh(p_att_feats + att_h[:, None, :])
  logits = jnp.squeeze(dot @ params["alpha_net.w"].T, -1) + params["alpha_net.b"]
  weight = jax.nn.softmax(logits, axis=1)
  if att_masks is not None:
    weight = weight * att_masks
    weight = weight / jnp.sum(weight, axis=1, keepdims=True)
  att_res = jnp.einsum("bl,bld->bd", weight, att_feats)
  lang_lstm_input = jnp.concatenate([att_res, h_att], axis=1)
  h_lang, c_lang = lstm_cell(lang_lstm_input, state_h[1], state_c[1],
                             params["lang_lstm.w_ih"], params["lang_lstm.w_hh"],
                             params["lang_lstm.b_ih"], params["lang_lstm.b_hh"])
  return h_lang, (jnp.stack([h_att, h_lang]), jnp.stack([c_att, c_lang]))


def updown_decode_ref(xt_seq, fc_feats, att_feats, p_att_feats,
                      state_h, state_c, params, att_masks=None):
  h, c = state_h, state_c
  outs = []
  for t in range(xt_seq.shape[0]):
    o, (h, c) = updown_core_ref(xt_seq[t], fc_feats, att_feats, p_att_feats,
                                h, c, params, att_masks)
    outs.append(o)
  return jnp.stack(outs), (h, c)


# ----------------------------------------------------------------------------
if __name__ == "__main__":
  B, E, R, A, L, T = 2, 32, 32, 32, 8, 4

  key = jax.random.PRNGKey(0)
  ks = iter(jax.random.split(key, 32))
  rnd = lambda shape, s=0.1: (s * jax.random.normal(next(ks), shape)).astype(jnp.float32)

  params = {
      "att_lstm.w_ih": rnd((4 * R, E + 2 * R)),
      "att_lstm.w_hh": rnd((4 * R, R)),
      "att_lstm.b_ih": rnd((4 * R,)),
      "att_lstm.b_hh": rnd((4 * R,)),
      "lang_lstm.w_ih": rnd((4 * R, 2 * R)),
      "lang_lstm.w_hh": rnd((4 * R, R)),
      "lang_lstm.b_ih": rnd((4 * R,)),
      "lang_lstm.b_hh": rnd((4 * R,)),
      "h2att.w": rnd((A, R)),
      "h2att.b": rnd((A,)),
      "alpha_net.w": rnd((1, A)),
      "alpha_net.b": rnd((1,)),
  }

  xt = rnd((B, E), 1.0)
  xt_seq = rnd((T, B, E), 1.0)
  fc_feats = rnd((B, R), 1.0)
  att_feats = rnd((B, L, R), 1.0)
  p_att_feats = rnd((B, L, A), 1.0)
  state_h = rnd((2, B, R), 1.0)
  state_c = rnd((2, B, R), 1.0)

  att_masks = (jax.random.uniform(next(ks), (B, L)) > 0.3).astype(jnp.float32)
  att_masks = att_masks.at[:, 0].set(1.0)

  # One-time weight prep (f32 and bf16 variants).
  prep_f32 = prepare_updown_params(params, E, R, A, jnp.float32)
  prep_bf16 = prepare_updown_params(params, E, R, A, jnp.bfloat16)

  # --- case 1: single step, no mask, f32 ------------------------------------
  out, (h_new, c_new) = updown_core(
      xt, fc_feats, att_feats, p_att_feats, state_h, state_c,
      prepared=prep_f32)
  jax.block_until_ready((out, h_new, c_new))
  out_ref, (h_ref, c_ref) = updown_core_ref(
      xt, fc_feats, att_feats, p_att_feats, state_h, state_c, params)
  np.testing.assert_allclose(np.asarray(out), np.asarray(out_ref), atol=1e-5, rtol=1e-5)
  np.testing.assert_allclose(np.asarray(h_new), np.asarray(h_ref), atol=1e-5, rtol=1e-5)
  np.testing.assert_allclose(np.asarray(c_new), np.asarray(c_ref), atol=1e-5, rtol=1e-5)

  # --- case 2: single step, with att_masks, f32 ------------------------------
  out_m, (h_m, c_m) = updown_core(
      xt, fc_feats, att_feats, p_att_feats, state_h, state_c,
      prepared=prep_f32, att_masks=att_masks)
  jax.block_until_ready((out_m, h_m, c_m))
  out_mr, (h_mr, c_mr) = updown_core_ref(
      xt, fc_feats, att_feats, p_att_feats, state_h, state_c, params, att_masks)
  np.testing.assert_allclose(np.asarray(out_m), np.asarray(out_mr), atol=1e-5, rtol=1e-5)
  np.testing.assert_allclose(np.asarray(h_m), np.asarray(h_mr), atol=1e-5, rtol=1e-5)
  np.testing.assert_allclose(np.asarray(c_m), np.asarray(c_mr), atol=1e-5, rtol=1e-5)

  # --- case 3: T=4 decode (timestep loop inside the kernel), f32 -------------
  out_seq, (h_T, c_T) = updown_core_decode(
      xt_seq, fc_feats, att_feats, p_att_feats, state_h, state_c,
      prep_f32, att_masks)
  jax.block_until_ready((out_seq, h_T, c_T))
  out_seq_r, (h_Tr, c_Tr) = updown_decode_ref(
      xt_seq, fc_feats, att_feats, p_att_feats, state_h, state_c, params, att_masks)
  np.testing.assert_allclose(np.asarray(out_seq), np.asarray(out_seq_r), atol=1e-4, rtol=1e-4)
  np.testing.assert_allclose(np.asarray(h_T), np.asarray(h_Tr), atol=1e-4, rtol=1e-4)
  np.testing.assert_allclose(np.asarray(c_T), np.asarray(c_Tr), atol=1e-4, rtol=1e-4)

  # --- case 4: T=4 decode with bf16 weights/features (loose tolerance) -------
  out_b, (h_b, c_b) = updown_core_decode(
      xt_seq, fc_feats, att_feats, p_att_feats, state_h, state_c,
      prep_bf16, att_masks)
  jax.block_until_ready((out_b, h_b, c_b))
  np.testing.assert_allclose(np.asarray(out_b), np.asarray(out_seq_r), atol=5e-2, rtol=5e-2)
  np.testing.assert_allclose(np.asarray(h_b), np.asarray(h_Tr), atol=5e-2, rtol=5e-2)
  np.testing.assert_allclose(np.asarray(c_b), np.asarray(c_Tr), atol=5e-2, rtol=5e-2)

  print("KERNEL_OK")
</pallas_src>

<mosaic_0001>
module attributes {stable_mosaic.version = 11 : i64} {
  func.func @_updown_kernel(%arg0: i32, %arg1: memref<1x8x128xf32, #tpu.memory_space<vmem>>, %arg2: memref<8x128xf32, #tpu.memory_space<vmem>>, %arg3: memref<8x8x128xf32, #tpu.memory_space<vmem>>, %arg4: memref<8x8x128xf32, #tpu.memory_space<vmem>>, %arg5: memref<8x8xf32, #tpu.memory_space<vmem>>, %arg6: memref<2x8x128xf32, #tpu.memory_space<vmem>>, %arg7: memref<2x8x128xf32, #tpu.memory_space<vmem>>, %arg8: memref<128x512xf32, #tpu.memory_space<vmem>>, %arg9: memref<128x512xf32, #tpu.memory_space<vmem>>, %arg10: memref<128x512xf32, #tpu.memory_space<vmem>>, %arg11: memref<128x512xf32, #tpu.memory_space<vmem>>, %arg12: memref<1x512xf32, #tpu.memory_space<vmem>>, %arg13: memref<128x512xf32, #tpu.memory_space<vmem>>, %arg14: memref<128x512xf32, #tpu.memory_space<vmem>>, %arg15: memref<128x512xf32, #tpu.memory_space<vmem>>, %arg16: memref<1x512xf32, #tpu.memory_space<vmem>>, %arg17: memref<128x128xf32, #tpu.memory_space<vmem>>, %arg18: memref<1x128xf32, #tpu.memory_space<vmem>>, %arg19: memref<1x128xf32, #tpu.memory_space<vmem>>, %arg20: memref<1x8x128xf32, #tpu.memory_space<vmem>>, %arg21: memref<2x8x128xf32, #tpu.memory_space<vmem>>, %arg22: memref<2x8x128xf32, #tpu.memory_space<vmem>>, %arg23: memref<2x8x128xf32, #tpu.memory_space<vmem>>, %arg24: memref<2x8x128xf32, #tpu.memory_space<vmem>>) attributes {dimension_semantics = [#tpu.dimension_semantics<arbitrary>], iteration_bounds = array<i64: 1>, scalar_prefetch = 0 : i64, scratch_operands = 2 : i64, tpu.core_type = #tpu.core_type<tc>, window_params = [{pipeline_mode = #tpu.pipeline_mode<double_buffered>, transform_indices = @transform_0, window_bounds = array<i64: 1, 8, 128>}, {pipeline_mode = #tpu.pipeline_mode<synchronous>, transform_indices = @transform_1, window_bounds = array<i64: 8, 128>}, {pipeline_mode = #tpu.pipeline_mode<synchronous>, transform_indices = @transform_2, window_bounds = array<i64: 8, 8, 128>}, {pipeline_mode = #tpu.pipeline_mode<synchronous>, transform_indices = @transform_3, window_bounds = array<i64: 8, 8, 128>}, {pipeline_mode = #tpu.pipeline_mode<synchronous>, transform_indices = @transform_4, window_bounds = array<i64: 8, 8>}, {pipeline_mode = #tpu.pipeline_mode<synchronous>, transform_indices = @transform_5, window_bounds = array<i64: 2, 8, 128>}, {pipeline_mode = #tpu.pipeline_mode<synchronous>, transform_indices = @transform_6, window_bounds = array<i64: 2, 8, 128>}, {pipeline_mode = #tpu.pipeline_mode<synchronous>, transform_indices = @transform_7, window_bounds = array<i64: 128, 512>}, {pipeline_mode = #tpu.pipeline_mode<synchronous>, transform_indices = @transform_8, window_bounds = array<i64: 128, 512>}, {pipeline_mode = #tpu.pipeline_mode<synchronous>, transform_indices = @transform_9, window_bounds = array<i64: 128, 512>}, {pipeline_mode = #tpu.pipeline_mode<synchronous>, transform_indices = @transform_10, window_bounds = array<i64: 128, 512>}, {pipeline_mode = #tpu.pipeline_mode<synchronous>, transform_indices = @transform_11, window_bounds = array<i64: 1, 512>}, {pipeline_mode = #tpu.pipeline_mode<synchronous>, transform_indices = @transform_12, window_bounds = array<i64: 128, 512>}, {pipeline_mode = #tpu.pipeline_mode<synchronous>, transform_indices = @transform_13, window_bounds = array<i64: 128, 512>}, {pipeline_mode = #tpu.pipeline_mode<synchronous>, transform_indices = @transform_14, window_bounds = array<i64: 128, 512>}, {pipeline_mode = #tpu.pipeline_mode<synchronous>, transform_indices = @transform_15, window_bounds = array<i64: 1, 512>}, {pipeline_mode = #tpu.pipeline_mode<synchronous>, transform_indices = @transform_16, window_bounds = array<i64: 128, 128>}, {pipeline_mode = #tpu.pipeline_mode<synchronous>, transform_indices = @transform_17, window_bounds = array<i64: 1, 128>}, {pipeline_mode = #tpu.pipeline_mode<synchronous>, transform_indices = @transform_18, window_bounds = array<i64: 1, 128>}, {transform_indices = @transform_19, window_bounds = array<i64: 1, 8, 128>}, {pipeline_mode = #tpu.pipeline_mode<synchronous>, transform_indices = @transform_20, window_bounds = array<i64: 2, 8, 128>}, {pipeline_mode = #tpu.pipeline_mode<synchronous>, transform_indices = @transform_21, window_bounds = array<i64: 2, 8, 128>}]} {
    %c0_i32 = arith.constant 0 : i32
    %0 = arith.cmpi eq, %arg0, %c0_i32 : i32
    %1 = arith.extui %0 : i1 to i32
    %c0_i32_0 = arith.constant 0 : i32
    %2 = arith.cmpi ne, %1, %c0_i32_0 : i32
    scf.if %2 {
      %c0_82 = arith.constant 0 : index
      %c0_83 = arith.constant 0 : index
      %c0_84 = arith.constant 0 : index
      %139 = vector.load %arg6[%c0_82, %c0_83, %c0_84] : memref<2x8x128xf32, #tpu.memory_space<vmem>>, vector<2x8x128xf32>
      %c0_85 = arith.constant 0 : index
      %c0_86 = arith.constant 0 : index
      %c0_87 = arith.constant 0 : index
      %140 = vector.load %arg23[%c0_85, %c0_86, %c0_87] : memref<2x8x128xf32, #tpu.memory_space<vmem>>, vector<2x8x128xf32>
      tpu.vector_store %arg23[%c0_85, %c0_86, %c0_87], %139 {strides = array<i32>} : memref<2x8x128xf32, #tpu.memory_space<vmem>>, vector<2x8x128xf32>,
      %c0_88 = arith.constant 0 : index
      %c0_89 = arith.constant 0 : index
      %c0_90 = arith.constant 0 : index
      %141 = vector.load %arg7[%c0_88, %c0_89, %c0_90] : memref<2x8x128xf32, #tpu.memory_space<vmem>>, vector<2x8x128xf32>
      %c0_91 = arith.constant 0 : index
      %c0_92 = arith.constant 0 : index
      %c0_93 = arith.constant 0 : index
      %142 = vector.load %arg24[%c0_91, %c0_92, %c0_93] : memref<2x8x128xf32, #tpu.memory_space<vmem>>, vector<2x8x128xf32>
      tpu.vector_store %arg24[%c0_91, %c0_92, %c0_93], %141 {strides = array<i32>} : memref<2x8x128xf32, #tpu.memory_space<vmem>>, vector<2x8x128xf32>,
    } else {
    }
    %c0 = arith.constant 0 : index
    %c0_1 = arith.constant 0 : index
    %c0_2 = arith.constant 0 : index
    %3 = vector.load %arg23[%c0, %c0_1, %c0_2] : memref<2x8x128xf32, #tpu.memory_space<vmem>>, vector<1x8x128xf32>
    %4 = vector.shape_cast %3 : vector<1x8x128xf32> to vector<8x128xf32>
    %c1 = arith.constant 1 : index
    %c0_3 = arith.constant 0 : index
    %c0_4 = arith.constant 0 : index
    %5 = vector.load %arg23[%c1, %c0_3, %c0_4] : memref<2x8x128xf32, #tpu.memory_space<vmem>>, vector<1x8x128xf32>
    %6 = vector.shape_cast %5 : vector<1x8x128xf32> to vector<8x128xf32>
    %c0_5 = arith.constant 0 : index
    %c0_6 = arith.constant 0 : index
    %c0_7 = arith.constant 0 : index
    %7 = vector.load %arg1[%c0_5, %c0_6, %c0_7] : memref<1x8x128xf32, #tpu.memory_space<vmem>>, vector<1x8x128xf32>
    %8 = vector.shape_cast %7 : vector<1x8x128xf32> to vector<8x128xf32>
    %c0_8 = arith.constant 0 : index
    %c0_9 = arith.constant 0 : index
    %9 = vector.load %arg10[%c0_8, %c0_9] : memref<128x512xf32, #tpu.memory_space<vmem>>, vector<128x512xf32>
    %cst = arith.constant dense<0.000000e+00> : vector<8x512xf32>
    %10 = tpu.matmul %8, %9, %cst {dimension_numbers = #tpu.dot_dimension_numbers<[1], [0], [0], [1], [0, 0, 1, 1], [], []>} : vector<8x128xf32>, vector<128x512xf32>, vector<8x512xf32> -> vector<8x512xf32>
    %c0_10 = arith.constant 0 : index
    %c0_11 = arith.constant 0 : index
    %11 = vector.load %arg8[%c0_10, %c0_11] : memref<128x512xf32, #tpu.memory_space<vmem>>, vector<128x512xf32>
    %cst_12 = arith.constant dense<0.000000e+00> : vector<8x512xf32>
    %12 = tpu.matmul %6, %11, %cst_12 {dimension_numbers = #tpu.dot_dimension_numbers<[1], [0], [0], [1], [0, 0, 1, 1], [], []>} : vector<8x128xf32>, vector<128x512xf32>, vector<8x512xf32> -> vector<8x512xf32>
    %13 = arith.addf %10, %12 : vector<8x512xf32>
    %c0_13 = arith.constant 0 : index
    %c0_14 = arith.constant 0 : index
    %14 = vector.load %arg2[%c0_13, %c0_14] : memref<8x128xf32, #tpu.memory_space<vmem>>, vector<8x128xf32>
    %c0_15 = arith.constant 0 : index
    %c0_16 = arith.constant 0 : index
    %15 = vector.load %arg9[%c0_15, %c0_16] : memref<128x512xf32, #tpu.memory_space<vmem>>, vector<128x512xf32>
    %cst_17 = arith.constant dense<0.000000e+00> : vector<8x512xf32>
    %16 = tpu.matmul %14, %15, %cst_17 {dimension_numbers = #tpu.dot_dimension_numbers<[1], [0], [0], [1], [0, 0, 1, 1], [], []>} : vector<8x128xf32>, vector<128x512xf32>, vector<8x512xf32> -> vector<8x512xf32>
    %17 = arith.addf %13, %16 : vector<8x512xf32>
    %c0_18 = arith.constant 0 : index
    %c0_19 = arith.constant 0 : index
    %18 = vector.load %arg11[%c0_18, %c0_19] : memref<128x512xf32, #tpu.memory_space<vmem>>, vector<128x512xf32>
    %cst_20 = arith.constant dense<0.000000e+00> : vector<8x512xf32>
    %19 = tpu.matmul %4, %18, %cst_20 {dimension_numbers = #tpu.dot_dimension_numbers<[1], [0], [0], [1], [0, 0, 1, 1], [], []>} : vector<8x128xf32>, vector<128x512xf32>, vector<8x512xf32> -> vector<8x512xf32>
    %20 = arith.addf %17, %19 : vector<8x512xf32>
    %c0_21 = arith.constant 0 : index
    %c0_22 = arith.constant 0 : index
    %21 = vector.load %arg12[%c0_21, %c0_22] : memref<1x512xf32, #tpu.memory_space<vmem>>, vector<1x512xf32>
    %22 = vector.broadcast %21 : vector<1x512xf32> to vector<8x512xf32>
    %23 = arith.addf %20, %22 : vector<8x512xf32>
    %c0_23 = arith.constant 0 : index
    %c0_24 = arith.constant 0 : index
    %c0_25 = arith.constant 0 : index
    %24 = vector.load %arg24[%c0_23, %c0_24, %c0_25] : memref<2x8x128xf32, #tpu.memory_space<vmem>>, vector<1x8x128xf32>
    %25 = vector.shape_cast %24 : vector<1x8x128xf32> to vector<8x128xf32>
    %26 = vector.extract_strided_slice %23 {offsets = [0, 0], sizes = [8, 128], strides = [1, 1]} : vector<8x512xf32> to vector<8x128xf32>
    %27 = arith.negf %26 : vector<8x128xf32>
    %28 = math.exp %27 : vector<8x128xf32>
    %cst_26 = arith.constant 1.000000e+00 : f32
    %29 = vector.broadcast %cst_26 : f32 to vector<8x128xf32>
    %30 = arith.addf %29, %28 : vector<8x128xf32>
    %31 = arith.divf %29, %30 : vector<8x128xf32>
    %32 = vector.extract_strided_slice %23 {offsets = [0, 128], sizes = [8, 128], strides = [1, 1]} : vector<8x512xf32> to vector<8x128xf32>
    %33 = arith.negf %32 : vector<8x128xf32>
    %34 = math.exp %33 : vector<8x128xf32>
    %cst_27 = arith.constant 1.000000e+00 : f32
    %35 = vector.broadcast %cst_27 : f32 to vector<8x128xf32>
    %36 = arith.addf %35, %34 : vector<8x128xf32>
    %37 = arith.divf %35, %36 : vector<8x128xf32>
    %38 = vector.extract_strided_slice %23 {offsets = [0, 256], sizes = [8, 128], strides = [1, 1]} : vector<8x512xf32> to vector<8x128xf32>
    %39 = math.tanh %38 : vector<8x128xf32>
    %40 = vector.extract_strided_slice %23 {offsets = [0, 384], sizes = [8, 128], strides = [1, 1]} : vector<8x512xf32> to vector<8x128xf32>
    %41 = arith.negf %40 : vector<8x128xf32>
    %42 = math.exp %41 : vector<8x128xf32>
    %cst_28 = arith.constant 1.000000e+00 : f32
    %43 = vector.broadcast %cst_28 : f32 to vector<8x128xf32>
    %44 = arith.addf %43, %42 : vector<8x128xf32>
    %45 = arith.divf %43, %44 : vector<8x128xf32>
    %46 = arith.mulf %37, %25 : vector<8x128xf32>
    %47 = arith.mulf %31, %39 : vector<8x128xf32>
    %48 = arith.addf %46, %47 : vector<8x128xf32>
    %49 = math.tanh %48 : vector<8x128xf32>
    %50 = arith.mulf %45, %49 : vector<8x128xf32>
    %c0_29 = arith.constant 0 : index
    %c0_30 = arith.constant 0 : index
    %51 = vector.load %arg17[%c0_29, %c0_30] : memref<128x128xf32, #tpu.memory_space<vmem>>, vector<128x128xf32>
    %cst_31 = arith.constant dense<0.000000e+00> : vector<8x128xf32>
    %52 = tpu.matmul %50, %51, %cst_31 {dimension_numbers = #tpu.dot_dimension_numbers<[1], [0], [0], [1], [0, 0, 1, 1], [], []>} : vector<8x128xf32>, vector<128x128xf32>, vector<8x128xf32> -> vector<8x128xf32>
    %c0_32 = arith.constant 0 : index
    %c0_33 = arith.constant 0 : index
    %53 = vector.load %arg18[%c0_32, %c0_33] : memref<1x128xf32, #tpu.memory_space<vmem>>, vector<1x128xf32>
    %54 = vector.broadcast %53 : vector<1x128xf32> to vector<8x128xf32>
    %55 = arith.addf %52, %54 : vector<8x128xf32>
    %c0_34 = arith.constant 0 : index
    %c0_35 = arith.constant 0 : index
    %c0_36 = arith.constant 0 : index
    %56 = vector.load %arg4[%c0_34, %c0_35, %c0_36] : memref<8x8x128xf32, #tpu.memory_space<vmem>>, vector<8x8x128xf32>
    %57 = vector.shape_cast %55 : vector<8x128xf32> to vector<8x1x128xf32>
    %58 = vector.broadcast %57 : vector<8x1x128xf32> to vector<8x8x128xf32>
    %59 = arith.addf %56, %58 : vector<8x8x128xf32>
    %60 = math.tanh %59 : vector<8x8x128xf32>
    %c0_37 = arith.constant 0 : index
    %c0_38 = arith.constant 0 : index
    %61 = vector.load %arg19[%c0_37, %c0_38] : memref<1x128xf32, #tpu.memory_space<vmem>>, vector<1x128xf32>
    %62 = vector.shape_cast %61 : vector<1x128xf32> to vector<1x1x128xf32>
    %63 = vector.broadcast %62 : vector<1x1x128xf32> to vector<8x8x128xf32>
    %64 = arith.mulf %60, %63 : vector<8x8x128xf32>
    %cst_39 = arith.constant dense<0.000000e+00> : vector<8x8xf32>
    %65 = vector.multi_reduction <add>, %64, %cst_39 [2] : vector<8x8x128xf32> to vector<8x8xf32>
    %cst_40 = arith.constant dense<0xFF800000> : vector<8xf32>
    %66 = vector.multi_reduction <maximumf>, %65, %cst_40 [1] : vector<8x8xf32> to vector<8xf32>
    %67 = vector.shape_cast %66 : vector<8xf32> to vector<8x1xf32>
    %68 = vector.broadcast %67 : vector<8x1xf32> to vector<8x8xf32>
    %69 = arith.subf %65, %68 : vector<8x8xf32>
    %70 = math.exp %69 : vector<8x8xf32>
    %c0_41 = arith.constant 0 : index
    %c0_42 = arith.constant 0 : index
    %71 = vector.load %arg5[%c0_41, %c0_42] : memref<8x8xf32, #tpu.memory_space<vmem>>, vector<8x8xf32>
    %72 = arith.mulf %70, %71 : vector<8x8xf32>
    %cst_43 = arith.constant dense<0.000000e+00> : vector<8xf32>
    %73 = vector.multi_reduction <add>, %72, %cst_43 [1] : vector<8x8xf32> to vector<8xf32>
    %74 = vector.shape_cast %73 : vector<8xf32> to vector<8x1xf32>
    %75 = tpu.reciprocal %74 : vector<8x1xf32> -> vector<8x1xf32>
    %76 = vector.broadcast %75 : vector<8x1xf32> to vector<8x8xf32>
    %77 = arith.mulf %72, %76 : vector<8x8xf32>
    %78 = vector.shape_cast %77 : vector<8x8xf32> to vector<8x8x1xf32>
    %c0_44 = arith.constant 0 : index
    %c0_45 = arith.constant 0 : index
    %c0_46 = arith.constant 0 : index
    %79 = vector.load %arg3[%c0_44, %c0_45, %c0_46] : memref<8x8x128xf32, #tpu.memory_space<vmem>>, vector<8x8x128xf32>
    %80 = vector.broadcast %78 : vector<8x8x1xf32> to vector<8x8x128xf32>
    %81 = arith.mulf %80, %79 : vector<8x8x128xf32>
    %cst_47 = arith.constant dense<0.000000e+00> : vector<8x128xf32>
    %82 = vector.multi_reduction <add>, %81, %cst_47 [1] : vector<8x8x128xf32> to vector<8x128xf32>
    %c0_48 = arith.constant 0 : index
    %c0_49 = arith.constant 0 : index
    %83 = vector.load %arg13[%c0_48, %c0_49] : memref<128x512xf32, #tpu.memory_space<vmem>>, vector<128x512xf32>
    %cst_50 = arith.constant dense<0.000000e+00> : vector<8x512xf32>
    %84 = tpu.matmul %82, %83, %cst_50 {dimension_numbers = #tpu.dot_dimension_numbers<[1], [0], [0], [1], [0, 0, 1, 1], [], []>} : vector<8x128xf32>, vector<128x512xf32>, vector<8x512xf32> -> vector<8x512xf32>
    %c0_51 = arith.constant 0 : index
    %c0_52 = arith.constant 0 : index
    %85 = vector.load %arg14[%c0_51, %c0_52] : memref<128x512xf32, #tpu.memory_space<vmem>>, vector<128x512xf32>
    %cst_53 = arith.constant dense<0.000000e+00> : vector<8x512xf32>
    %86 = tpu.matmul %50, %85, %cst_53 {dimension_numbers = #tpu.dot_dimension_numbers<[1], [0], [0], [1], [0, 0, 1, 1], [], []>} : vector<8x128xf32>, vector<128x512xf32>, vector<8x512xf32> -> vector<8x512xf32>
    %87 = arith.addf %84, %86 : vector<8x512xf32>
    %c0_54 = arith.constant 0 : index
    %c0_55 = arith.constant 0 : index
    %88 = vector.load %arg15[%c0_54, %c0_55] : memref<128x512xf32, #tpu.memory_space<vmem>>, vector<128x512xf32>
    %cst_56 = arith.constant dense<0.000000e+00> : vector<8x512xf32>
    %89 = tpu.matmul %6, %88, %cst_56 {dimension_numbers = #tpu.dot_dimension_numbers<[1], [0], [0], [1], [0, 0, 1, 1], [], []>} : vector<8x128xf32>, vector<128x512xf32>, vector<8x512xf32> -> vector<8x512xf32>
    %90 = arith.addf %87, %89 : vector<8x512xf32>
    %c0_57 = arith.constant 0 : index
    %c0_58 = arith.constant 0 : index
    %91 = vector.load %arg16[%c0_57, %c0_58] : memref<1x512xf32, #tpu.memory_space<vmem>>, vector<1x512xf32>
    %92 = vector.broadcast %91 : vector<1x512xf32> to vector<8x512xf32>
    %93 = arith.addf %90, %92 : vector<8x512xf32>
    %c1_59 = arith.constant 1 : index
    %c0_60 = arith.constant 0 : index
    %c0_61 = arith.constant 0 : index
    %94 = vector.load %arg24[%c1_59, %c0_60, %c0_61] : memref<2x8x128xf32, #tpu.memory_space<vmem>>, vector<1x8x128xf32>
    %95 = vector.shape_cast %94 : vector<1x8x128xf32> to vector<8x128xf32>
    %96 = vector.extract_strided_slice %93 {offsets = [0, 0], sizes = [8, 128], strides = [1, 1]} : vector<8x512xf32> to vector<8x128xf32>
    %97 = arith.negf %96 : vector<8x128xf32>
    %98 = math.exp %97 : vector<8x128xf32>
    %cst_62 = arith.constant 1.000000e+00 : f32
    %99 = vector.broadcast %cst_62 : f32 to vector<8x128xf32>
    %100 = arith.addf %99, %98 : vector<8x128xf32>
    %101 = arith.divf %99, %100 : vector<8x128xf32>
    %102 = vector.extract_strided_slice %93 {offsets = [0, 128], sizes = [8, 128], strides = [1, 1]} : vector<8x512xf32> to vector<8x128xf32>
    %103 = arith.negf %102 : vector<8x128xf32>
    %104 = math.exp %103 : vector<8x128xf32>
    %cst_63 = arith.constant 1.000000e+00 : f32
    %105 = vector.broadcast %cst_63 : f32 to vector<8x128xf32>
    %106 = arith.addf %105, %104 : vector<8x128xf32>
    %107 = arith.divf %105, %106 : vector<8x128xf32>
    %108 = vector.extract_strided_slice %93 {offsets = [0, 256], sizes = [8, 128], strides = [1, 1]} : vector<8x512xf32> to vector<8x128xf32>
    %109 = math.tanh %108 : vector<8x128xf32>
    %110 = vector.extract_strided_slice %93 {offsets = [0, 384], sizes = [8, 128], strides = [1, 1]} : vector<8x512xf32> to vector<8x128xf32>
    %111 = arith.negf %110 : vector<8x128xf32>
    %112 = math.exp %111 : vector<8x128xf32>
    %cst_64 = arith.constant 1.000000e+00 : f32
    %113 = vector.broadcast %cst_64 : f32 to vector<8x128xf32>
    %114 = arith.addf %113, %112 : vector<8x128xf32>
    %115 = arith.divf %113, %114 : vector<8x128xf32>
    %116 = arith.mulf %107, %95 : vector<8x128xf32>
    %117 = arith.mulf %101, %109 : vector<8x128xf32>
    %118 = arith.addf %116, %117 : vector<8x128xf32>
    %119 = math.tanh %118 : vector<8x128xf32>
    %120 = arith.mulf %115, %119 : vector<8x128xf32>
    %c0_65 = arith.constant 0 : index
    %c0_66 = arith.constant 0 : index
    %c0_67 = arith.constant 0 : index
    %121 = vector.load %arg23[%c0_65, %c0_66, %c0_67] : memref<2x8x128xf32, #tpu.memory_space<vmem>>, vector<1x8x128xf32>
    %122 = vector.shape_cast %121 : vector<1x8x128xf32> to vector<8x128xf32>
    %123 = vector.shape_cast %50 : vector<8x128xf32> to vector<1x8x128xf32>
    tpu.vector_store %arg23[%c0_65, %c0_66, %c0_67], %123 {strides = array<i32>} : memref<2x8x128xf32, #tpu.memory_space<vmem>>, vector<1x8x128xf32>,
    %c1_68 = arith.constant 1 : index
    %c0_69 = arith.constant 0 : index
    %c0_70 = arith.constant 0 : index
    %124 = vector.load %arg23[%c1_68, %c0_69, %c0_70] : memref<2x8x128xf32, #tpu.memory_space<vmem>>, vector<1x8x128xf32>
    %125 = vector.shape_cast %124 : vector<1x8x128xf32> to vector<8x128xf32>
    %126 = vector.shape_cast %120 : vector<8x128xf32> to vector<1x8x128xf32>
    tpu.vector_store %arg23[%c1_68, %c0_69, %c0_70], %126 {strides = array<i32>} : memref<2x8x128xf32, #tpu.memory_space<vmem>>, vector<1x8x128xf32>,
    %c0_71 = arith.constant 0 : index
    %c0_72 = arith.constant 0 : index
    %c0_73 = arith.constant 0 : index
    %127 = vector.load %arg24[%c0_71, %c0_72, %c0_73] : memref<2x8x128xf32, #tpu.memory_space<vmem>>, vector<1x8x128xf32>
    %128 = vector.shape_cast %127 : vector<1x8x128xf32> to vector<8x128xf32>
    %129 = vector.shape_cast %48 : vector<8x128xf32> to vector<1x8x128xf32>
    tpu.vector_store %arg24[%c0_71, %c0_72, %c0_73], %129 {strides = array<i32>} : memref<2x8x128xf32, #tpu.memory_space<vmem>>, vector<1x8x128xf32>,
    %c1_74 = arith.constant 1 : index
    %c0_75 = arith.constant 0 : index
    %c0_76 = arith.constant 0 : index
    %130 = vector.load %arg24[%c1_74, %c0_75, %c0_76] : memref<2x8x128xf32, #tpu.memory_space<vmem>>, vector<1x8x128xf32>
    %131 = vector.shape_cast %130 : vector<1x8x128xf32> to vector<8x128xf32>
    %132 = vector.shape_cast %118 : vector<8x128xf32> to vector<1x8x128xf32>
    tpu.vector_store %arg24[%c1_74, %c0_75, %c0_76], %132 {strides = array<i32>} : memref<2x8x128xf32, #tpu.memory_space<vmem>>, vector<1x8x128xf32>,
    %c0_77 = arith.constant 0 : index
    %c0_78 = arith.constant 0 : index
    %c0_79 = arith.constant 0 : index
    %133 = vector.load %arg20[%c0_77, %c0_78, %c0_79] : memref<1x8x128xf32, #tpu.memory_space<vmem>>, vector<1x8x128xf32>
    %134 = vector.shape_cast %133 : vector<1x8x128xf32> to vector<8x128xf32>
    %135 = vector.shape_cast %120 : vector<8x128xf32> to vector<1x8x128xf32>
    tpu.vector_store %arg20[%c0_77, %c0_78, %c0_79], %135 {strides = array<i32>} : memref<1x8x128xf32, #tpu.memory_space<vmem>>, vector<1x8x128xf32>,
    %c0_i32_80 = arith.constant 0 : i32
    %136 = arith.cmpi eq, %arg0, %c0_i32_80 : i32
    %137 = arith.extui %136 : i1 to i32
    %c0_i32_81 = arith.constant 0 : i32
    %138 = arith.cmpi ne, %137, %c0_i32_81 : i32
    scf.if %138 {
      %c0_82 = arith.constant 0 : index
      %c0_83 = arith.constant 0 : index
      %c0_84 = arith.constant 0 : index
      %139 = vector.load %arg23[%c0_82, %c0_83, %c0_84] : memref<2x8x128xf32, #tpu.memory_space<vmem>>, vector<2x8x128xf32>
      %c0_85 = arith.constant 0 : index
      %c0_86 = arith.constant 0 : index
      %c0_87 = arith.constant 0 : index
      %140 = vector.load %arg21[%c0_85, %c0_86, %c0_87] : memref<2x8x128xf32, #tpu.memory_space<vmem>>, vector<2x8x128xf32>
      tpu.vector_store %arg21[%c0_85, %c0_86, %c0_87], %139 {strides = array<i32>} : memref<2x8x128xf32, #tpu.memory_space<vmem>>, vector<2x8x128xf32>,
      %c0_88 = arith.constant 0 : index
      %c0_89 = arith.constant 0 : index
      %c0_90 = arith.constant 0 : index
      %141 = vector.load %arg24[%c0_88, %c0_89, %c0_90] : memref<2x8x128xf32, #tpu.memory_space<vmem>>, vector<2x8x128xf32>
      %c0_91 = arith.constant 0 : index
      %c0_92 = arith.constant 0 : index
      %c0_93 = arith.constant 0 : index
      %142 = vector.load %arg22[%c0_91, %c0_92, %c0_93] : memref<2x8x128xf32, #tpu.memory_space<vmem>>, vector<2x8x128xf32>
      tpu.vector_store %arg22[%c0_91, %c0_92, %c0_93], %141 {strides = array<i32>} : memref<2x8x128xf32, #tpu.memory_space<vmem>>, vector<2x8x128xf32>,
    } else {
    }
    return
  }
  func.func @transform_0(%arg0: i32) -> (i32, i32, i32) {
    %c0_i32 = arith.constant 0 : i32
    %c0_i32_0 = arith.constant 0 : i32
    %c0_i32_1 = arith.constant 0 : i32
    return %arg0, %c0_i32, %c0_i32_0 : i32, i32, i32
  }
  func.func @transform_1(%arg0: i32) -> (i32, i32) {
    %c0_i32 = arith.constant 0 : i32
    %c0_i32_0 = arith.constant 0 : i32
    %c0_i32_1 = arith.constant 0 : i32
    return %c0_i32, %c0_i32_0 : i32, i32
  }
  func.func @transform_2(%arg0: i32) -> (i32, i32, i32) {
    %c0_i32 = arith.constant 0 : i32
    %c0_i32_0 = arith.constant 0 : i32
    %c0_i32_1 = arith.constant 0 : i32
    %c0_i32_2 = arith.constant 0 : i32
    return %c0_i32, %c0_i32_0, %c0_i32_1 : i32, i32, i32
  }
  func.func @transform_3(%arg0: i32) -> (i32, i32, i32) {
    %c0_i32 = arith.constant 0 : i32
    %c0_i32_0 = arith.constant 0 : i32
    %c0_i32_1 = arith.constant 0 : i32
    %c0_i32_2 = arith.constant 0 : i32
    return %c0_i32, %c0_i32_0, %c0_i32_1 : i32, i32, i32
  }
  func.func @transform_4(%arg0: i32) -> (i32, i32) {
    %c0_i32 = arith.constant 0 : i32
    %c0_i32_0 = arith.constant 0 : i32
    %c0_i32_1 = arith.constant 0 : i32
    return %c0_i32, %c0_i32_0 : i32, i32
  }
  func.func @transform_5(%arg0: i32) -> (i32, i32, i32) {
    %c0_i32 = arith.constant 0 : i32
    %c0_i32_0 = arith.constant 0 : i32
    %c0_i32_1 = arith.constant 0 : i32
    %c0_i32_2 = arith.constant 0 : i32
    return %c0_i32, %c0_i32_0, %c0_i32_1 : i32, i32, i32
  }
  func.func @transform_6(%arg0: i32) -> (i32, i32, i32) {
    %c0_i32 = arith.constant 0 : i32
    %c0_i32_0 = arith.constant 0 : i32
    %c0_i32_1 = arith.constant 0 : i32
    %c0_i32_2 = arith.constant 0 : i32
    return %c0_i32, %c0_i32_0, %c0_i32_1 : i32, i32, i32
  }
  func.func @transform_7(%arg0: i32) -> (i32, i32) {
    %c0_i32 = arith.constant 0 : i32
    %c0_i32_0 = arith.constant 0 : i32
    %c0_i32_1 = arith.constant 0 : i32
    return %c0_i32, %c0_i32_0 : i32, i32
  }
  func.func @transform_8(%arg0: i32) -> (i32, i32) {
    %c0_i32 = arith.constant 0 : i32
    %c0_i32_0 = arith.constant 0 : i32
    %c0_i32_1 = arith.constant 0 : i32
    return %c0_i32, %c0_i32_0 : i32, i32
  }
  func.func @transform_9(%arg0: i32) -> (i32, i32) {
    %c0_i32 = arith.constant 0 : i32
    %c0_i32_0 = arith.constant 0 : i32
    %c0_i32_1 = arith.constant 0 : i32
    return %c0_i32, %c0_i32_0 : i32, i32
  }
  func.func @transform_10(%arg0: i32) -> (i32, i32) {
    %c0_i32 = arith.constant 0 : i32
    %c0_i32_0 = arith.constant 0 : i32
    %c0_i32_1 = arith.constant 0 : i32
    return %c0_i32, %c0_i32_0 : i32, i32
  }
  func.func @transform_11(%arg0: i32) -> (i32, i32) {
    %c0_i32 = arith.constant 0 : i32
    %c0_i32_0 = arith.constant 0 : i32
    %c0_i32_1 = arith.constant 0 : i32
    return %c0_i32, %c0_i32_0 : i32, i32
  }
  func.func @transform_12(%arg0: i32) -> (i32, i32) {
    %c0_i32 = arith.constant 0 : i32
    %c0_i32_0 = arith.constant 0 : i32
    %c0_i32_1 = arith.constant 0 : i32
    return %c0_i32, %c0_i32_0 : i32, i32
  }
  func.func @transform_13(%arg0: i32) -> (i32, i32) {
    %c0_i32 = arith.constant 0 : i32
    %c0_i32_0 = arith.constant 0 : i32
    %c0_i32_1 = arith.constant 0 : i32
    return %c0_i32, %c0_i32_0 : i32, i32
  }
  func.func @transform_14(%arg0: i32) -> (i32, i32) {
    %c0_i32 = arith.constant 0 : i32
    %c0_i32_0 = arith.constant 0 : i32
    %c0_i32_1 = arith.constant 0 : i32
    return %c0_i32, %c0_i32_0 : i32, i32
  }
  func.func @transform_15(%arg0: i32) -> (i32, i32) {
    %c0_i32 = arith.constant 0 : i32
    %c0_i32_0 = arith.constant 0 : i32
    %c0_i32_1 = arith.constant 0 : i32
    return %c0_i32, %c0_i32_0 : i32, i32
  }
  func.func @transform_16(%arg0: i32) -> (i32, i32) {
    %c0_i32 = arith.constant 0 : i32
    %c0_i32_0 = arith.constant 0 : i32
    %c0_i32_1 = arith.constant 0 : i32
    return %c0_i32, %c0_i32_0 : i32, i32
  }
  func.func @transform_17(%arg0: i32) -> (i32, i32) {
    %c0_i32 = arith.constant 0 : i32
    %c0_i32_0 = arith.constant 0 : i32
    %c0_i32_1 = arith.constant 0 : i32
    return %c0_i32, %c0_i32_0 : i32, i32
  }
  func.func @transform_18(%arg0: i32) -> (i32, i32) {
    %c0_i32 = arith.constant 0 : i32
    %c0_i32_0 = arith.constant 0 : i32
    %c0_i32_1 = arith.constant 0 : i32
    return %c0_i32, %c0_i32_0 : i32, i32
  }
  func.func @transform_19(%arg0: i32) -> (i32, i32, i32) {
    %c0_i32 = arith.constant 0 : i32
    %c0_i32_0 = arith.constant 0 : i32
    %c0_i32_1 = arith.constant 0 : i32
    return %arg0, %c0_i32, %c0_i32_0 : i32, i32, i32
  }
  func.func @transform_20(%arg0: i32) -> (i32, i32, i32) {
    %c0_i32 = arith.constant 0 : i32
    %c0_i32_0 = arith.constant 0 : i32
    %c0_i32_1 = arith.constant 0 : i32
    %c0_i32_2 = arith.constant 0 : i32
    return %c0_i32, %c0_i32_0, %c0_i32_1 : i32, i32, i32
  }
  func.func @transform_21(%arg0: i32) -> (i32, i32, i32) {
    %c0_i32 = arith.constant 0 : i32
    %c0_i32_0 = arith.constant 0 : i32
    %c0_i32_1 = arith.constant 0 : i32
    %c0_i32_2 = arith.constant 0 : i32
    return %c0_i32, %c0_i32_0, %c0_i32_1 : i32, i32, i32
  }
}

</mosaic_0001>

<bundles_post_ra>
// kernel: tpu_custom_call.1
= control target key start
LH: loop header
LB: loop body
LE: loop exit
PB: predicated region body
PF: predicated region fallthrough
CT: control target
= control target key end

     0   :  { %s2957_s0 = inlined_call_operand.hbm [shape: f32[1,8,128], index: 0, kind: input, shape index: {}]   ;;  %s2958_s1 = inlined_call_operand.hbm [shape: f32[8,128], index: 1, kind: input, shape index: {}]   ;;  %s2959_s2 = inlined_call_operand.hbm [shape: f32[8,8,128], index: 2, kind: input, shape index: {}]   ;;  %s2960_s3 = inlined_call_operand.hbm [shape: f32[8,8,128], index: 3, kind: input, shape index: {}]   ;;  %s2961_s4 = inlined_call_operand.hbm [shape: f32[8,8], index: 4, kind: input, shape index: {}]   ;;  %s2962_s5 = inlined_call_operand.hbm [shape: f32[2,8,128], index: 5, kind: input, shape index: {}]   ;;  %s2963_s6 = inlined_call_operand.hbm [shape: f32[2,8,128], index: 6, kind: input, shape index: {}]   ;;  %s2964_s7 = inlined_call_operand.hbm [shape: f32[128,512], index: 7, kind: input, shape index: {}]   ;;  %s2965_s8 = inlined_call_operand.hbm [shape: f32[128,512], index: 8, kind: input, shape index: {}]   ;;  %s2966_s9 = inlined_call_operand.hbm [shape: f32[128,512], index: 9, kind: input, shape index: {}]   ;;  %s2967_s10 = inlined_call_operand.hbm [shape: f32[128,512], index: 10, kind: input, shape index: {}]   ;;  %s2968_s11 = inlined_call_operand.vmem [shape: f32[1,512], index: 11, kind: input, shape index: {}]   ;;  %s2969_s12 = inlined_call_operand.hbm [shape: f32[128,512], index: 12, kind: input, shape index: {}]   ;;  %s2970_s13 = inlined_call_operand.hbm [shape: f32[128,512], index: 13, kind: input, shape index: {}]   ;;  %s2971_s14 = inlined_call_operand.hbm [shape: f32[128,512], index: 14, kind: input, shape index: {}]   ;;  %s2972_s15 = inlined_call_operand.vmem [shape: f32[1,512], index: 15, kind: input, shape index: {}]   ;;  %s2973_s16 = inlined_call_operand.hbm [shape: f32[128,128], index: 16, kind: input, shape index: {}]   ;;  %s2974_s17 = inlined_call_operand.vmem [shape: f32[1,128], index: 17, kind: input, shape index: {}]   ;;  %s2975_s18 = inlined_call_operand.vmem [shape: f32[1,128], index: 18, kind: input, shape index: {}]   ;;  %s2976_s19 = inlined_call_operand.hbm [shape: f32[1,8,128], index: 19, kind: output, shape index: {0}]   ;;  %s2977_s20 = inlined_call_operand.hbm [shape: f32[2,8,128], index: 20, kind: output, shape index: {1}]   ;;  %s2978_s21 = inlined_call_operand.hbm [shape: f32[2,8,128], index: 21, kind: output, shape index: {2}]  }
   0x1   :  { %2979 = sst [smem:[#allocation42_spill]] %s2957_s0 }
   0x2   :  { %2980 = sst [smem:[#allocation43_spill]] %s2958_s1 }
   0x3   :  { %2981 = sst [smem:[#allocation44_spill]] %s2959_s2 }
   0x4   :  { %2982 = sst [smem:[#allocation45_spill]] %s2960_s3 }
   0x5   :  { %2983 = sst [smem:[#allocation46_spill]] %s2961_s4 }
   0x6   :  { %2984 = sst [smem:[#allocation47_spill]] %s2962_s5 }
   0x7   :  { %2985 = sst [smem:[#allocation48_spill]] %s2978_s21 }
   0x8   :  { %27 = vsyncpa [#allocation5], 0 }
   0x9   :  { %28 = vsyncpa [#allocation8], 0 }
   0xa   :  { %29 = vsyncpa [#allocation11], 0 }
   0xb   :  { %30 = vsyncpa [#allocation14], 0 }
   0xc   :  { %31 = vsyncpa [#allocation17], 0 }
   0xd   :  { %32 = vsyncpa [#allocation20], 0 }
   0xe   :  { %33 = vsyncpa [#allocation23], 0 }
   0xf   :  { %34 = vsyncpa [#allocation26], 0 }
  0x10   :  { %35 = vsyncpa [#allocation6], 0  ;;  %s2986_s26 = sld [smem:[#allocation43_spill]] }
  0x16   :  { %s53_s27 = sshll.u32 %s2986_s26, 4  ;;  %s54_s27 = int_to_ptr.hbm [resolvable:$true] %s53_s27 }
  0x17   :  { %36 = vsyncpa [#allocation30], 0  ;;  %s2597_s3 = smov [#allocation7]   ;;  %s2987_s4 = sld [smem:[#allocation45_spill]] }
  0x18   :  { %s55_s28 = sshll.u32 %s2597_s3, 4  ;;  %s2598_s5 = smov [#allocation10]   ;;  %s56_s28 = int_to_ptr.vmem [resolvable:$true] %s55_s28 }
  0x19   :  { %58 = dma.hbm_to_vmem [thread:$0]  %s54_s27, 128, %s56_s28, [#allocation8]  }
  0x1a   :  { %s78_s22 = sshll.u32 %s2598_s5, 4  ;;  %s2988_s24 = sld [smem:[#allocation47_spill]]  ;;  %s79_s22 = int_to_ptr.vmem [resolvable:$true] %s78_s22 }
  0x1b   :  { %s2599_s2 = smov 128   ;;  %s2600_s25 = smov 8  }
  0x1c   :  { %s126_s3 = sshll.u32 %s2964_s7, 4  ;;  %s2601_s28 = smov [#allocation13]   ;;  %s127_s3 = int_to_ptr.hbm [resolvable:$true] %s126_s3 }
  0x1d   :  { %s76_s30 = sshll.u32 %s2987_s4, 4  ;;  %s102_s29 = sshll.u32 %s2601_s28, 4  ;;  %s77_s30 = int_to_ptr.hbm [resolvable:$true] %s76_s30  ;;  %s103_s29 = int_to_ptr.vmem [resolvable:$true] %s102_s29 }
  0x1e   :  { %84 = dma.hbm_to_vmem [thread:$0]  %s77_s30, 1024, %s79_s22, [#allocation11], %s2599_s2, %s2599_s2, %s2600_s25  }
  0x1f   :  { %s2602_s0 = smov [#allocation16]   ;;  %s2603_s5 = smov 512  }
  0x20   :  { %s100_s21 = sshll.u32 %s2988_s24, 4  ;;  %s128_s4 = sshll.u32 %s2602_s0, 4  ;;  %s101_s21 = int_to_ptr.hbm [resolvable:$true] %s100_s21  ;;  %s129_s4 = int_to_ptr.vmem [resolvable:$true] %s128_s4 }
  0x21   :  { %108 = dma.hbm_to_vmem [thread:$0]  %s101_s21, 256, %s103_s29, [#allocation14], %s2599_s2, %s2599_s2, %s2600_s25  }
  0x22   :  { %s2604_s23 = smov 32   ;;  %s152_s7 = sshll.u32 %s2966_s9, 4  ;;  %s153_s7 = int_to_ptr.hbm [resolvable:$true] %s152_s7 }
  0x23   :  { %134 = dma.hbm_to_vmem [thread:$0]  %s127_s3, 8192, %s129_s4, [#allocation17], %s2603_s5, %s2603_s5, %s2604_s23  }
  0x24   :  { %s2605_s1 = smov [#allocation19]   ;;  %s180_s21 = sshll.u32 %s2969_s12, 4  ;;  %s181_s21 = int_to_ptr.hbm [resolvable:$true] %s180_s21 }
  0x25   :  { %s154_s24 = sshll.u32 %s2605_s1, 4  ;;  %s2606_s28 = smov [#allocation22]   ;;  %s155_s24 = int_to_ptr.vmem [resolvable:$true] %s154_s24 }
  0x26   :  { %160 = dma.hbm_to_vmem [thread:$0]  %s153_s7, 8192, %s155_s24, [#allocation20], %s2603_s5, %s2603_s5, %s2604_s23  }
  0x27   :  { %s182_s29 = sshll.u32 %s2606_s28, 4  ;;  %s206_s4 = sshll.u32 %s2971_s14, 4  ;;  %s183_s29 = int_to_ptr.vmem [resolvable:$true] %s182_s29  ;;  %s207_s4 = int_to_ptr.hbm [resolvable:$true] %s206_s4 }
  0x28   :  { %188 = dma.hbm_to_vmem [thread:$0]  %s181_s21, 8192, %s183_s29, [#allocation23], %s2603_s5, %s2603_s5, %s2604_s23  }
  0x29   :  { %s2989_s12 = sld [smem:[#allocation42_spill]]  ;;  %s2607_s1 = smov [#allocation25]  }
  0x2a   :  { %s208_s26 = sshll.u32 %s2607_s1, 4  ;;  %s2608_s7 = smov [#allocation4]   ;;  %s209_s26 = int_to_ptr.vmem [resolvable:$true] %s208_s26 }
  0x2b   :  { %214 = dma.hbm_to_vmem [thread:$0]  %s207_s4, 8192, %s209_s26, [#allocation26], %s2603_s5, %s2603_s5, %s2604_s23  }
  0x2c   :  { %s44_s14 = sshll.u32 %s2608_s7, 4  ;;  %s2990_s28 = sld [smem:[#allocation44_spill]]  ;;  %s45_s14 = int_to_ptr.vmem [resolvable:$true] %s44_s14 }
  0x2d   :  { %s2991_s0 = sld [smem:[#allocation46_spill]]  ;;  %s2609_s30 = smov [#allocation9]  }
  0x2e   :  { %s2610_s4 = smov [#allocation12]   ;;  %s113_s24 = sshll.u32 %s2963_s6, 4  ;;  %s114_s24 = int_to_ptr.hbm [resolvable:$true] %s113_s24 }
  0x2f   :  { %s42_s22 = sshll.u32 %s2989_s12, 4  ;;  %s65_s12 = sshll.u32 %s2609_s30, 4  ;;  %s43_s22 = int_to_ptr.hbm [resolvable:$true] %s42_s22  ;;  %s66_s12 = int_to_ptr.vmem [resolvable:$true] %s65_s12 }
  0x30   :  { %47 = dma.hbm_to_vmem [thread:$0]  %s43_s22, 128, %s45_s14, [#allocation5]  }
  0x31   :  { %s92_s1 = sshll.u32 %s2610_s4, 4  ;;  %s139_s27 = sshll.u32 %s2965_s8, 4  ;;  %s93_s1 = int_to_ptr.vmem [resolvable:$true] %s92_s1  ;;  %s140_s27 = int_to_ptr.hbm [resolvable:$true] %s139_s27 }
  0x32   :  { %s63_s3 = sshll.u32 %s2990_s28, 4  ;;  %s2611_s28 = smov [#allocation15]   ;;  %s64_s3 = int_to_ptr.hbm [resolvable:$true] %s63_s3 }
  0x33   :  { %s90_s9 = sshll.u32 %s2991_s0, 4  ;;  %s115_s21 = sshll.u32 %s2611_s28, 4  ;;  %s91_s9 = int_to_ptr.hbm [resolvable:$true] %s90_s9  ;;  %s116_s21 = int_to_ptr.vmem [resolvable:$true] %s115_s21 }
  0x34   :  { %71 = dma.hbm_to_vmem [thread:$0]  %s64_s3, 1024, %s66_s12, [#allocation8], %s2599_s2, %s2599_s2, %s2600_s25  }
  0x35   :  { %95 = dma.hbm_to_vmem [thread:$0]  %s91_s9, 128, %s93_s1, [#allocation11]  }
  0x36   :  { %121 = dma.hbm_to_vmem [thread:$0]  %s114_s24, 256, %s116_s21, [#allocation14], %s2599_s2, %s2599_s2, %s2600_s25  }
  0x37   :  { %s2612_s3 = smov [#allocation18]   ;;  %s165_s6 = sshll.u32 %s2967_s10, 4  ;;  %s166_s6 = int_to_ptr.hbm [resolvable:$true] %s165_s6 }
  0x38   :  { %s141_s29 = sshll.u32 %s2612_s3, 4  ;;  %s193_s12 = sshll.u32 %s2970_s13, 4  ;;  %s142_s29 = int_to_ptr.vmem [resolvable:$true] %s141_s29  ;;  %s194_s12 = int_to_ptr.hbm [resolvable:$true] %s193_s12 }
  0x39   :  { %147 = dma.hbm_to_vmem [thread:$0]  %s140_s27, 8192, %s142_s29, [#allocation17], %s2603_s5, %s2603_s5, %s2604_s23  }
  0x3a   :  { %s2613_s4 = smov [#allocation21]   ;;  %s2614_s26 = smov [#allocation24]  }
  0x3b   :  { %s167_s1 = sshll.u32 %s2613_s4, 4  ;;  %s195_s10 = sshll.u32 %s2614_s26, 4  ;;  %s168_s1 = int_to_ptr.vmem [resolvable:$true] %s167_s1  ;;  %s196_s10 = int_to_ptr.vmem [resolvable:$true] %s195_s10 }
  0x3c   :  { %173 = dma.hbm_to_vmem [thread:$0]  %s166_s6, 8192, %s168_s1, [#allocation20], %s2603_s5, %s2603_s5, %s2604_s23  }
  0x3d   :  { %s221_s22 = sshll.u32 %s2973_s16, 4  ;;  %s2615_s13 = smov [#allocation27]   ;;  %s222_s22 = int_to_ptr.hbm [resolvable:$true] %s221_s22 }
  0x3e   :  { %201 = dma.hbm_to_vmem [thread:$0]  %s194_s12, 8192, %s196_s10, [#allocation23], %s2603_s5, %s2603_s5, %s2604_s23  }
  0x3f   :  { %s223_s14 = sshll.u32 %s2615_s13, 4  ;;  %s224_s14 = int_to_ptr.vmem [resolvable:$true] %s223_s14 }
  0x40   :  { %229 = dma.hbm_to_vmem [thread:$0]  %s222_s22, 2048, %s224_s14, [#allocation26], %s2599_s2, %s2599_s2, %s2600_s25  }
  0x41   :  { %2577 = dma.done.wait [#allocation5], 128  }
  0x42   :  { %2578 = vsyncadd [#allocation5], 4294967168 }
  0x43   :  { %2579 = dma.done.wait [#allocation8], 1152  }
  0x44   :  { %2580 = vsyncadd [#allocation8], 4294966144 }
  0x45   :  { %2581 = dma.done.wait [#allocation11], 1152  }
  0x46   :  { %2582 = vsyncadd [#allocation11], 4294966144 }
  0x47   :  { %2583 = dma.done.wait [#allocation14], 512  }
  0x48   :  { %2584 = vsyncadd [#allocation14], 4294966784 }
  0x49   :  { %2585 = dma.done.wait [#allocation17], 16384  }
  0x4a   :  { %2586 = vsyncadd [#allocation17], 4294950912 }
  0x4b   :  { %2587 = dma.done.wait [#allocation20], 16384  }
  0x4c   :  { %2588 = vsyncadd [#allocation20], 4294950912 }
  0x4d   :  { %2589 = dma.done.wait [#allocation23], 16384  }
  0x4e   :  { %2590 = vsyncadd [#allocation23], 4294950912 }
  0x4f   :  { %2591 = dma.done.wait [#allocation26], 10240  }
  0x50   :  { %2592 = vsyncadd [#allocation26], 4294957056  ;;  %v434_v0 = vld [vmem:[#allocation16 + $0x1e0] sm:$0xff]  ;;  %v435_v1 = vld [vmem:[#allocation16 + $0x1e8] sm:$0xff]  ;;  %vm1107_vm12 = vcmask 1041409   ;;  %vm1109_vm13 = vcmask 1042434  }
  0x51   :  { %v436_v2 = vld [vmem:[#allocation16 + $0x1f0] sm:$0xff]  ;;  %438 = vmatpush.msra.mxu0 %v434_v0  ;;  %458 = vmatpush.msra.mxu1 %v435_v1  ;;  %v437_v3 = vld [vmem:[#allocation16 + $0x1f8] sm:$0xff]  ;;  %v430_v4 = vld [vmem:[#allocation16 + $0x1c0] sm:$0xff]  ;;  %vm1111_vm14 = vcmask 1043459   ;;  %vm1113_vm15 = vcmask 1044484   ;;  %s1999_s0 = sshll.u32 %s2977_s20, 4  ;;  %s2000_s0 = int_to_ptr.hbm [resolvable:$true] %s1999_s0 }
  0x52   :  { %v431_v5 = vld [vmem:[#allocation16 + $0x1c8] sm:$0xff]  ;;  %478 = vmatpush.msra.mxu2 %v436_v2  ;;  %498 = vmatpush.msra.mxu3 %v437_v3  ;;  %v432_v6 = vld [vmem:[#allocation16 + $0x1d0] sm:$0xff]  ;;  %v433_v7 = vld [vmem:[#allocation16 + $0x1d8] sm:$0xff]  ;;  %s2618_s30 = smov [#allocation28]   ;;  %s1989_s12 = sshll.u32 %s2976_s19, 4  ;;  %s1990_s12 = int_to_ptr.hbm [resolvable:$true] %s1989_s12 }
  0x53   :  { %v426_v8 = vld [vmem:[#allocation16 + $0x1a0] sm:$0xff]  ;;  %439 = vmatpush.msra.mxu0 %v430_v4  ;;  %459 = vmatpush.msra.mxu1 %v431_v5  ;;  %v427_v9 = vld [vmem:[#allocation16 + $0x1a8] sm:$0xff]  ;;  %v428_v10 = vld [vmem:[#allocation16 + $0x1b0] sm:$0xff]  ;;  %s1987_s6 = sshll.u32 %s2618_s30, 4  ;;  %s2619_s4 = smov [#allocation31]   ;;  %s1988_s6 = int_to_ptr.vmem [resolvable:$true] %s1987_s6 }
  0x54   :  { %v429_v11 = vld [vmem:[#allocation16 + $0x1b8] sm:$0xff]  ;;  %479 = vmatpush.msra.mxu2 %v432_v6  ;;  %499 = vmatpush.msra.mxu3 %v433_v7  ;;  %v422_v12 = vld [vmem:[#allocation16 + $0x180] sm:$0xff]  ;;  %v423_v13 = vld [vmem:[#allocation16 + $0x188] sm:$0xff]  ;;  %s2010_s1 = sshll.u32 %s2619_s4, 4  ;;  %s2994_s7 = sld [smem:[#allocation48_spill]]  ;;  %s2011_s1 = int_to_ptr.vmem [resolvable:$true] %s2010_s1 }
  0x55   :  { %440 = vmatpush.msra.mxu0 %v426_v8  ;;  %460 = vmatpush.msra.mxu1 %v427_v9  ;;  %v424_v14 = vld [vmem:[#allocation16 + $0x190] sm:$0xff]  ;;  %v425_v15 = vld [vmem:[#allocation16 + $0x198] sm:$0xff]  ;;  %v418_v16 = vld [vmem:[#allocation16 + $0x160] sm:$0xff] }
  0x56   :  { %480 = vmatpush.msra.mxu2 %v428_v10  ;;  %500 = vmatpush.msra.mxu3 %v429_v11  ;;  %v419_v17 = vld [vmem:[#allocation16 + $0x168] sm:$0xff]  ;;  %v420_v18 = vld [vmem:[#allocation16 + $0x170] sm:$0xff]  ;;  %v421_v19 = vld [vmem:[#allocation16 + $0x178] sm:$0xff] }
  0x57   :  { %441 = vmatpush.msra.mxu0 %v422_v12  ;;  %461 = vmatpush.msra.mxu1 %v423_v13  ;;  %v414_v20 = vld [vmem:[#allocation16 + $0x140] sm:$0xff]  ;;  %v415_v21 = vld [vmem:[#allocation16 + $0x148] sm:$0xff]  ;;  %v416_v22 = vld [vmem:[#allocation16 + $0x150] sm:$0xff] }
  0x58   :  { %481 = vmatpush.msra.mxu2 %v424_v14  ;;  %501 = vmatpush.msra.mxu3 %v425_v15  ;;  %v417_v23 = vld [vmem:[#allocation16 + $0x158] sm:$0xff]  ;;  %v410_v24 = vld [vmem:[#allocation16 + $0x120] sm:$0xff]  ;;  %v411_v25 = vld [vmem:[#allocation16 + $0x128] sm:$0xff] }
  0x59   :  { %442 = vmatpush.msra.mxu0 %v418_v16  ;;  %462 = vmatpush.msra.mxu1 %v419_v17  ;;  %v412_v26 = vld [vmem:[#allocation16 + $0x130] sm:$0xff]  ;;  %v413_v27 = vld [vmem:[#allocation16 + $0x138] sm:$0xff]  ;;  %v406_v28 = vld [vmem:[#allocation16 + $0x100] sm:$0xff] }
  0x5a   :  { %482 = vmatpush.msra.mxu2 %v420_v18  ;;  %502 = vmatpush.msra.mxu3 %v421_v19  ;;  %v407_v29 = vld [vmem:[#allocation16 + $0x108] sm:$0xff]  ;;  %v408_v30 = vld [vmem:[#allocation16 + $0x110] sm:$0xff]  ;;  %v409_v31 = vld [vmem:[#allocation16 + $0x118] sm:$0xff]  ;;  %s2012_s24 = sshll.u32 %s2994_s7, 4  ;;  %s2013_s24 = int_to_ptr.hbm [resolvable:$true] %s2012_s24 }
  0x5b   :  { %443 = vmatpush.msra.mxu0 %v414_v20  ;;  %463 = vmatpush.msra.mxu1 %v415_v21  ;;  %v402_v32 = vld [vmem:[#allocation16 + $0xe0] sm:$0xff]  ;;  %v403_v33 = vld [vmem:[#allocation16 + $0xe8] sm:$0xff]  ;;  %v404_v34 = vld [vmem:[#allocation16 + $0xf0] sm:$0xff] }
  0x5c   :  { %483 = vmatpush.msra.mxu2 %v416_v22  ;;  %503 = vmatpush.msra.mxu3 %v417_v23  ;;  %v405_v35 = vld [vmem:[#allocation16 + $0xf8] sm:$0xff]  ;;  %v398_v36 = vld [vmem:[#allocation16 + $0xc0] sm:$0xff]  ;;  %v399_v37 = vld [vmem:[#allocation16 + $0xc8] sm:$0xff] }
  0x5d   :  { %444 = vmatpush.msra.mxu0 %v410_v24  ;;  %464 = vmatpush.msra.mxu1 %v411_v25  ;;  %v400_v38 = vld [vmem:[#allocation16 + $0xd0] sm:$0xff]  ;;  %v401_v39 = vld [vmem:[#allocation16 + $0xd8] sm:$0xff]  ;;  %v394_v40 = vld [vmem:[#allocation16 + $0xa0] sm:$0xff] }
  0x5e   :  { %484 = vmatpush.msra.mxu2 %v412_v26  ;;  %504 = vmatpush.msra.mxu3 %v413_v27  ;;  %v395_v41 = vld [vmem:[#allocation16 + $0xa8] sm:$0xff]  ;;  %v396_v42 = vld [vmem:[#allocation16 + $0xb0] sm:$0xff]  ;;  %v397_v43 = vld [vmem:[#allocation16 + $0xb8] sm:$0xff] }
  0x5f   :  { %445 = vmatpush.msra.mxu0 %v406_v28  ;;  %465 = vmatpush.msra.mxu1 %v407_v29  ;;  %v390_v44 = vld [vmem:[#allocation16 + $0x80] sm:$0xff]  ;;  %v391_v45 = vld [vmem:[#allocation16 + $0x88] sm:$0xff]  ;;  %v392_v46 = vld [vmem:[#allocation16 + $0x90] sm:$0xff] }
  0x60   :  { %485 = vmatpush.msra.mxu2 %v408_v30  ;;  %505 = vmatpush.msra.mxu3 %v409_v31  ;;  %v393_v47 = vld [vmem:[#allocation16 + $0x98] sm:$0xff]  ;;  %v386_v48 = vld [vmem:[#allocation16 + $0x60] sm:$0xff]  ;;  %v387_v49 = vld [vmem:[#allocation16 + $0x68] sm:$0xff] }
  0x61   :  { %446 = vmatpush.msra.mxu0 %v402_v32  ;;  %466 = vmatpush.msra.mxu1 %v403_v33  ;;  %v388_v50 = vld [vmem:[#allocation16 + $0x70] sm:$0xff]  ;;  %v389_v51 = vld [vmem:[#allocation16 + $0x78] sm:$0xff]  ;;  %v382_v52 = vld [vmem:[#allocation16 + $0x40] sm:$0xff] }
  0x62   :  { %486 = vmatpush.msra.mxu2 %v404_v34  ;;  %506 = vmatpush.msra.mxu3 %v405_v35  ;;  %v383_v53 = vld [vmem:[#allocation16 + $0x48] sm:$0xff]  ;;  %v384_v54 = vld [vmem:[#allocation16 + $0x50] sm:$0xff]  ;;  %v385_v55 = vld [vmem:[#allocation16 + $0x58] sm:$0xff] }
  0x63   :  { %447 = vmatpush.msra.mxu0 %v398_v36  ;;  %467 = vmatpush.msra.mxu1 %v399_v37  ;;  %v378_v56 = vld [vmem:[#allocation16 + $0x20] sm:$0xff]  ;;  %v379_v57 = vld [vmem:[#allocation16 + $0x28] sm:$0xff]  ;;  %v380_v58 = vld [vmem:[#allocation16 + $0x30] sm:$0xff] }
  0x64   :  { %487 = vmatpush.msra.mxu2 %v400_v38  ;;  %507 = vmatpush.msra.mxu3 %v401_v39  ;;  %v381_v59 = vld [vmem:[#allocation16 + $0x38] sm:$0xff]  ;;  %v374_v60 = vld [vmem:[#allocation16] sm:$0xff]  ;;  %v375_v61 = vld [vmem:[#allocation16 + $0x8] sm:$0xff] }
  0x65   :  { %448 = vmatpush.msra.mxu0 %v394_v40  ;;  %468 = vmatpush.msra.mxu1 %v395_v41  ;;  %v376_v62 = vld [vmem:[#allocation16 + $0x10] sm:$0xff]  ;;  %v377_v63 = vld [vmem:[#allocation16 + $0x18] sm:$0xff]  ;;  %v370_v0 = vld [vmem:[#allocation19 + $0x1e0] sm:$0xff] }
  0x66   :  { %488 = vmatpush.msra.mxu2 %v396_v42  ;;  %508 = vmatpush.msra.mxu3 %v397_v43  ;;  %v371_v1 = vld [vmem:[#allocation19 + $0x1e8] sm:$0xff]  ;;  %v372_v2 = vld [vmem:[#allocation19 + $0x1f0] sm:$0xff]  ;;  %v373_v3 = vld [vmem:[#allocation19 + $0x1f8] sm:$0xff] }
  0x67   :  { %449 = vmatpush.msra.mxu0 %v390_v44  ;;  %469 = vmatpush.msra.mxu1 %v391_v45  ;;  %v366_v4 = vld [vmem:[#allocation19 + $0x1c0] sm:$0xff]  ;;  %v367_v5 = vld [vmem:[#allocation19 + $0x1c8] sm:$0xff]  ;;  %v368_v6 = vld [vmem:[#allocation19 + $0x1d0] sm:$0xff] }
  0x68   :  { %489 = vmatpush.msra.mxu2 %v392_v46  ;;  %509 = vmatpush.msra.mxu3 %v393_v47  ;;  %v369_v7 = vld [vmem:[#allocation19 + $0x1d8] sm:$0xff]  ;;  %v362_v8 = vld [vmem:[#allocation19 + $0x1a0] sm:$0xff]  ;;  %v363_v9 = vld [vmem:[#allocation19 + $0x1a8] sm:$0xff] }
  0x69   :  { %450 = vmatpush.msra.mxu0 %v386_v48  ;;  %470 = vmatpush.msra.mxu1 %v387_v49  ;;  %v364_v10 = vld [vmem:[#allocation19 + $0x1b0] sm:$0xff]  ;;  %v365_v11 = vld [vmem:[#allocation19 + $0x1b8] sm:$0xff]  ;;  %v358_v12 = vld [vmem:[#allocation19 + $0x180] sm:$0xff] }
  0x6a   :  { %490 = vmatpush.msra.mxu2 %v388_v50  ;;  %510 = vmatpush.msra.mxu3 %v389_v51  ;;  %v359_v13 = vld [vmem:[#allocation19 + $0x188] sm:$0xff]  ;;  %v360_v14 = vld [vmem:[#allocation19 + $0x190] sm:$0xff]  ;;  %v361_v15 = vld [vmem:[#allocation19 + $0x198] sm:$0xff] }
  0x6b   :  { %451 = vmatpush.msra.mxu0 %v382_v52  ;;  %471 = vmatpush.msra.mxu1 %v383_v53  ;;  %v354_v16 = vld [vmem:[#allocation19 + $0x160] sm:$0xff]  ;;  %v355_v17 = vld [vmem:[#allocation19 + $0x168] sm:$0xff]  ;;  %v356_v18 = vld [vmem:[#allocation19 + $0x170] sm:$0xff] }
  0x6c   :  { %491 = vmatpush.msra.mxu2 %v384_v54  ;;  %511 = vmatpush.msra.mxu3 %v385_v55  ;;  %v357_v19 = vld [vmem:[#allocation19 + $0x178] sm:$0xff]  ;;  %v350_v20 = vld [vmem:[#allocation19 + $0x140] sm:$0xff]  ;;  %v351_v21 = vld [vmem:[#allocation19 + $0x148] sm:$0xff] }
  0x6d   :  { %452 = vmatpush.msra.mxu0 %v378_v56  ;;  %472 = vmatpush.msra.mxu1 %v379_v57  ;;  %v352_v22 = vld [vmem:[#allocation19 + $0x150] sm:$0xff]  ;;  %v353_v23 = vld [vmem:[#allocation19 + $0x158] sm:$0xff]  ;;  %v346_v24 = vld [vmem:[#allocation19 + $0x120] sm:$0xff] }
  0x6e   :  { %492 = vmatpush.msra.mxu2 %v380_v58  ;;  %512 = vmatpush.msra.mxu3 %v381_v59  ;;  %v347_v25 = vld [vmem:[#allocation19 + $0x128] sm:$0xff]  ;;  %v348_v26 = vld [vmem:[#allocation19 + $0x130] sm:$0xff]  ;;  %v349_v27 = vld [vmem:[#allocation19 + $0x138] sm:$0xff] }
  0x6f   :  { %453 = vmatpush.msra.mxu0 %v374_v60  ;;  %473 = vmatpush.msra.mxu1 %v375_v61  ;;  %v342_v28 = vld [vmem:[#allocation19 + $0x100] sm:$0xff]  ;;  %v343_v29 = vld [vmem:[#allocation19 + $0x108] sm:$0xff]  ;;  %v344_v30 = vld [vmem:[#allocation19 + $0x110] sm:$0xff] }
  0x70   :  { %493 = vmatpush.msra.mxu2 %v376_v62  ;;  %513 = vmatpush.msra.mxu3 %v377_v63  ;;  %v345_v31 = vld [vmem:[#allocation19 + $0x118] sm:$0xff]  ;;  %v338_v32 = vld [vmem:[#allocation19 + $0xe0] sm:$0xff]  ;;  %v339_v33 = vld [vmem:[#allocation19 + $0xe8] sm:$0xff] }
  0x71   :  { %518 = vmatpush.msrb.mxu0 %v370_v0  ;;  %538 = vmatpush.msrb.mxu1 %v371_v1  ;;  %v340_v34 = vld [vmem:[#allocation19 + $0xf0] sm:$0xff]  ;;  %v341_v35 = vld [vmem:[#allocation19 + $0xf8] sm:$0xff]  ;;  %v334_v36 = vld [vmem:[#allocation19 + $0xc0] sm:$0xff] }
  0x72   :  { %558 = vmatpush.msrb.mxu2 %v372_v2  ;;  %578 = vmatpush.msrb.mxu3 %v373_v3  ;;  %v335_v37 = vld [vmem:[#allocation19 + $0xc8] sm:$0xff]  ;;  %v336_v38 = vld [vmem:[#allocation19 + $0xd0] sm:$0xff]  ;;  %v337_v39 = vld [vmem:[#allocation19 + $0xd8] sm:$0xff] }
  0x73   :  { %519 = vmatpush.msrb.mxu0 %v366_v4  ;;  %539 = vmatpush.msrb.mxu1 %v367_v5  ;;  %v330_v40 = vld [vmem:[#allocation19 + $0xa0] sm:$0xff]  ;;  %v331_v41 = vld [vmem:[#allocation19 + $0xa8] sm:$0xff]  ;;  %v332_v42 = vld [vmem:[#allocation19 + $0xb0] sm:$0xff] }
  0x74   :  { %559 = vmatpush.msrb.mxu2 %v368_v6  ;;  %579 = vmatpush.msrb.mxu3 %v369_v7  ;;  %v333_v43 = vld [vmem:[#allocation19 + $0xb8] sm:$0xff]  ;;  %v326_v44 = vld [vmem:[#allocation19 + $0x80] sm:$0xff]  ;;  %v327_v45 = vld [vmem:[#allocation19 + $0x88] sm:$0xff] }
  0x75   :  { %520 = vmatpush.msrb.mxu0 %v362_v8  ;;  %540 = vmatpush.msrb.mxu1 %v363_v9  ;;  %v328_v46 = vld [vmem:[#allocation19 + $0x90] sm:$0xff]  ;;  %v329_v47 = vld [vmem:[#allocation19 + $0x98] sm:$0xff]  ;;  %v299_v48 = vld [vmem:[#allocation13 + $0x8] sm:$0xff] }
  0x76   :  { %560 = vmatpush.msrb.mxu2 %v364_v10  ;;  %580 = vmatpush.msrb.mxu3 %v365_v11  ;;  %v322_v49 = vld [vmem:[#allocation19 + $0x60] sm:$0xff]  ;;  %v323_v50 = vld [vmem:[#allocation19 + $0x68] sm:$0xff]  ;;  %v324_v51 = vld [vmem:[#allocation19 + $0x70] sm:$0xff] }
  0x77   :  { %521 = vmatpush.msrb.mxu0 %v358_v12  ;;  %541 = vmatpush.msrb.mxu1 %v359_v13  ;;  %v325_v52 = vld [vmem:[#allocation19 + $0x78] sm:$0xff]  ;;  %v318_v53 = vld [vmem:[#allocation19 + $0x40] sm:$0xff]  ;;  %v319_v54 = vld [vmem:[#allocation19 + $0x48] sm:$0xff] }
  0x78   :  { %561 = vmatpush.msrb.mxu2 %v360_v14  ;;  %581 = vmatpush.msrb.mxu3 %v361_v15  ;;  %v320_v55 = vld [vmem:[#allocation19 + $0x50] sm:$0xff]  ;;  %v321_v56 = vld [vmem:[#allocation19 + $0x58] sm:$0xff]  ;;  %v314_v57 = vld [vmem:[#allocation19 + $0x20] sm:$0xff] }
  0x79   :  { %522 = vmatpush.msrb.mxu0 %v354_v16  ;;  %542 = vmatpush.msrb.mxu1 %v355_v17  ;;  %v315_v58 = vld [vmem:[#allocation19 + $0x28] sm:$0xff]  ;;  %v316_v59 = vld [vmem:[#allocation19 + $0x30] sm:$0xff]  ;;  %v317_v60 = vld [vmem:[#allocation19 + $0x38] sm:$0xff] }
  0x7a   :  { %562 = vmatpush.msrb.mxu2 %v356_v18  ;;  %582 = vmatpush.msrb.mxu3 %v357_v19  ;;  %v310_v61 = vld [vmem:[#allocation19] sm:$0xff]  ;;  %v311_v62 = vld [vmem:[#allocation19 + $0x8] sm:$0xff]  ;;  %v312_v63 = vld [vmem:[#allocation19 + $0x10] sm:$0xff] }
  0x7b   :  { %523 = vmatpush.msrb.mxu0 %v350_v20  ;;  %543 = vmatpush.msrb.mxu1 %v351_v21  ;;  %v313_v0 = vld [vmem:[#allocation19 + $0x18] sm:$0xff]  ;;  %v2811_v1 = vld [vmem:[#allocation4] sm:$0xff]  ;;  %v659_v2 = vld [vmem:[#allocation18 + $0x1e0] sm:$0xff] }
  0x7c   :  { %563 = vmatpush.msrb.mxu2 %v352_v22  ;;  %583 = vmatpush.msrb.mxu3 %v353_v23  ;;  %v660_v3 = vld [vmem:[#allocation18 + $0x1e8] sm:$0xff]  ;;  %v661_v4 = vld [vmem:[#allocation18 + $0x1f0] sm:$0xff]  ;;  %v662_v5 = vld [vmem:[#allocation18 + $0x1f8] sm:$0xff] }
  0x7d   :  { %524 = vmatpush.msrb.mxu0 %v346_v24  ;;  %544 = vmatpush.msrb.mxu1 %v347_v25  ;;  %v655_v6 = vld [vmem:[#allocation18 + $0x1c0] sm:$0xff]  ;;  %v656_v7 = vld [vmem:[#allocation18 + $0x1c8] sm:$0xff]  ;;  %v657_v8 = vld [vmem:[#allocation18 + $0x1d0] sm:$0xff] }
  0x7e   :  { %564 = vmatpush.msrb.mxu2 %v348_v26  ;;  %584 = vmatpush.msrb.mxu3 %v349_v27  ;;  %v658_v9 = vld [vmem:[#allocation18 + $0x1d8] sm:$0xff]  ;;  %v651_v10 = vld [vmem:[#allocation18 + $0x1a0] sm:$0xff]  ;;  %v652_v11 = vld [vmem:[#allocation18 + $0x1a8] sm:$0xff] }
  0x7f   :  { %525 = vmatpush.msrb.mxu0 %v342_v28  ;;  %545 = vmatpush.msrb.mxu1 %v343_v29  ;;  %v653_v12 = vld [vmem:[#allocation18 + $0x1b0] sm:$0xff]  ;;  %v654_v13 = vld [vmem:[#allocation18 + $0x1b8] sm:$0xff]  ;;  %v647_v14 = vld [vmem:[#allocation18 + $0x180] sm:$0xff] }
  0x80   :  { %565 = vmatpush.msrb.mxu2 %v344_v30  ;;  %585 = vmatpush.msrb.mxu3 %v345_v31  ;;  %v648_v15 = vld [vmem:[#allocation18 + $0x188] sm:$0xff]  ;;  %v649_v16 = vld [vmem:[#allocation18 + $0x190] sm:$0xff]  ;;  %v650_v17 = vld [vmem:[#allocation18 + $0x198] sm:$0xff] }
  0x81   :  { %526 = vmatpush.msrb.mxu0 %v338_v32  ;;  %546 = vmatpush.msrb.mxu1 %v339_v33  ;;  %v643_v18 = vld [vmem:[#allocation18 + $0x160] sm:$0xff]  ;;  %v644_v19 = vld [vmem:[#allocation18 + $0x168] sm:$0xff]  ;;  %v645_v20 = vld [vmem:[#allocation18 + $0x170] sm:$0xff] }
  0x82   :  { %566 = vmatpush.msrb.mxu2 %v340_v34  ;;  %586 = vmatpush.msrb.mxu3 %v341_v35  ;;  %v646_v21 = vld [vmem:[#allocation18 + $0x178] sm:$0xff]  ;;  %v639_v22 = vld [vmem:[#allocation18 + $0x140] sm:$0xff]  ;;  %v640_v23 = vld [vmem:[#allocation18 + $0x148] sm:$0xff] }
  0x83   :  { %527 = vmatpush.msrb.mxu0 %v334_v36  ;;  %547 = vmatpush.msrb.mxu1 %v335_v37  ;;  %v641_v24 = vld [vmem:[#allocation18 + $0x150] sm:$0xff]  ;;  %v642_v25 = vld [vmem:[#allocation18 + $0x158] sm:$0xff]  ;;  %v635_v26 = vld [vmem:[#allocation18 + $0x120] sm:$0xff] }
  0x84   :  { %567 = vmatpush.msrb.mxu2 %v336_v38  ;;  %587 = vmatpush.msrb.mxu3 %v337_v39  ;;  %v636_v27 = vld [vmem:[#allocation18 + $0x128] sm:$0xff]  ;;  %v637_v28 = vld [vmem:[#allocation18 + $0x130] sm:$0xff]  ;;  %v638_v29 = vld [vmem:[#allocation18 + $0x138] sm:$0xff] }
  0x85   :  { %528 = vmatpush.msrb.mxu0 %v330_v40  ;;  %548 = vmatpush.msrb.mxu1 %v331_v41  ;;  %v631_v30 = vld [vmem:[#allocation18 + $0x100] sm:$0xff]  ;;  %v632_v31 = vld [vmem:[#allocation18 + $0x108] sm:$0xff]  ;;  %v633_v32 = vld [vmem:[#allocation18 + $0x110] sm:$0xff] }
  0x86   :  { %568 = vmatpush.msrb.mxu2 %v332_v42  ;;  %588 = vmatpush.msrb.mxu3 %v333_v43  ;;  %v634_v33 = vld [vmem:[#allocation18 + $0x118] sm:$0xff]  ;;  %v627_v34 = vld [vmem:[#allocation18 + $0xe0] sm:$0xff]  ;;  %v628_v35 = vld [vmem:[#allocation18 + $0xe8] sm:$0xff] }
  0x87   :  { %529 = vmatpush.msrb.mxu0 %v326_v44  ;;  %549 = vmatpush.msrb.mxu1 %v327_v45  ;;  %v629_v36 = vld [vmem:[#allocation18 + $0xf0] sm:$0xff]  ;;  %v630_v37 = vld [vmem:[#allocation18 + $0xf8] sm:$0xff]  ;;  %v623_v38 = vld [vmem:[#allocation18 + $0xc0] sm:$0xff] }
  0x88   :  { %569 = vmatpush.msrb.mxu2 %v328_v46  ;;  %589 = vmatpush.msrb.mxu3 %v329_v47  ;;  %v624_v39 = vld [vmem:[#allocation18 + $0xc8] sm:$0xff]  ;;  %v625_v40 = vld [vmem:[#allocation18 + $0xd0] sm:$0xff]  ;;  %v626_v41 = vld [vmem:[#allocation18 + $0xd8] sm:$0xff] }
  0x89   :  { %454 = vmatmul.f32.vlgmr.msra.gmra.mxu0 %v299_v48  ;;  %474 = vmatmul.f32.vlgmr.msra.gmra.mxu1 %v299_v48  ;;  %v619_v42 = vld [vmem:[#allocation18 + $0xa0] sm:$0xff]  ;;  %v620_v43 = vld [vmem:[#allocation18 + $0xa8] sm:$0xff]  ;;  %v621_v44 = vld [vmem:[#allocation18 + $0xb0] sm:$0xff] }
  0x8a   :  { %530 = vmatpush.msrb.mxu0 %v322_v49  ;;  %550 = vmatpush.msrb.mxu1 %v323_v50  ;;  %v622_v45 = vld [vmem:[#allocation18 + $0xb8] sm:$0xff]  ;;  %v615_v46 = vld [vmem:[#allocation18 + $0x80] sm:$0xff]  ;;  %v616_v47 = vld [vmem:[#allocation18 + $0x88] sm:$0xff] }
  0x8b   :  { %570 = vmatpush.msrb.mxu2 %v324_v51  ;;  %590 = vmatpush.msrb.mxu3 %v325_v52  ;;  %v618_v49 = vld [vmem:[#allocation18 + $0x98] sm:$0xff]  ;;  %v611_v50 = vld [vmem:[#allocation18 + $0x60] sm:$0xff]  ;;  %v612_v51 = vld [vmem:[#allocation18 + $0x68] sm:$0xff] }
  0x8c   :  { %531 = vmatpush.msrb.mxu0 %v318_v53  ;;  %551 = vmatpush.msrb.mxu1 %v319_v54  ;;  %v613_v52 = vld [vmem:[#allocation18 + $0x70] sm:$0xff]  ;;  %v614_v53 = vld [vmem:[#allocation18 + $0x78] sm:$0xff]  ;;  %v607_v54 = vld [vmem:[#allocation18 + $0x40] sm:$0xff] }
  0x8d   :  { %571 = vmatpush.msrb.mxu2 %v320_v55  ;;  %591 = vmatpush.msrb.mxu3 %v321_v56  ;;  %v608_v55 = vld [vmem:[#allocation18 + $0x48] sm:$0xff]  ;;  %v609_v56 = vld [vmem:[#allocation18 + $0x50] sm:$0xff] }
  0x8e   :  { %514 = vmatmul.f32.vlgmr.msra.gmra.mxu3 %v299_v48  ;;  %532 = vmatpush.msrb.mxu0 %v314_v57  ;;  %v610_v57 = vld [vmem:[#allocation18 + $0x58] sm:$0xff] }
  0x8f   :  { %552 = vmatpush.msrb.mxu1 %v315_v58  ;;  %572 = vmatpush.msrb.mxu2 %v316_v59  ;;  %v603_v58 = vld [vmem:[#allocation18 + $0x20] sm:$0xff]  ;;  %v604_v59 = vld [vmem:[#allocation18 + $0x28] sm:$0xff] }
  0x90   :  { %592 = vmatpush.msrb.mxu3 %v317_v60  ;;  %533 = vmatpush.msrb.mxu0 %v310_v61  ;;  %v605_v60 = vld [vmem:[#allocation18 + $0x30] sm:$0xff]  ;;  %v606_v61 = vld [vmem:[#allocation18 + $0x38] sm:$0xff] }
  0x91   :  { %553 = vmatpush.msrb.mxu1 %v311_v62  ;;  %573 = vmatpush.msrb.mxu2 %v312_v63  ;;  %v599_v62 = vld [vmem:[#allocation18] sm:$0xff]  ;;  %v600_v63 = vld [vmem:[#allocation18 + $0x8] sm:$0xff] }
  0x92   :  { %593 = vmatpush.msrb.mxu3 %v313_v0  ;;  %494 = vmatmul.f32.vlgmr.msra.gmra.mxu2 %v299_v48  ;;  %v617_v48 = vld [vmem:[#allocation18 + $0x90] sm:$0xff] }
  0x93   :  { %534 = vmatmul.f32.vlgmr.msrb.gmra.mxu0 %v2811_v1  ;;  %554 = vmatmul.f32.vlgmr.msrb.gmra.mxu1 %v2811_v1  ;;  %v601_v0 = vld [vmem:[#allocation18 + $0x10] sm:$0xff] }
  0x94   :  { %663 = vmatpush.msra.mxu0 %v659_v2  ;;  %683 = vmatpush.msra.mxu1 %v660_v3  ;;  %v598_v2 = vld [vmem:[#allocation7] sm:$0xff]  ;;  %v807_v3 = vld [vmem:[#allocation21 + $0x1e0] sm:$0xff] }
  0x95   :  { %703 = vmatpush.msra.mxu2 %v661_v4  ;;  %723 = vmatpush.msra.mxu3 %v662_v5  ;;  %v808_v4 = vld [vmem:[#allocation21 + $0x1e8] sm:$0xff]  ;;  %v809_v5 = vld [vmem:[#allocation21 + $0x1f0] sm:$0xff] }
  0x96   :  { %664 = vmatpush.msra.mxu0 %v655_v6  ;;  %684 = vmatpush.msra.mxu1 %v656_v7  ;;  %v810_v6 = vld [vmem:[#allocation21 + $0x1f8] sm:$0xff]  ;;  %v803_v7 = vld [vmem:[#allocation21 + $0x1c0] sm:$0xff] }
  0x97   :  { %704 = vmatpush.msra.mxu2 %v657_v8  ;;  %724 = vmatpush.msra.mxu3 %v658_v9  ;;  %v804_v8 = vld [vmem:[#allocation21 + $0x1c8] sm:$0xff]  ;;  %v805_v9 = vld [vmem:[#allocation21 + $0x1d0] sm:$0xff] }
  0x98   :  { %665 = vmatpush.msra.mxu0 %v651_v10  ;;  %685 = vmatpush.msra.mxu1 %v652_v11  ;;  %v806_v10 = vld [vmem:[#allocation21 + $0x1d8] sm:$0xff]  ;;  %v799_v11 = vld [vmem:[#allocation21 + $0x1a0] sm:$0xff] }
  0x99   :  { %705 = vmatpush.msra.mxu2 %v653_v12  ;;  %725 = vmatpush.msra.mxu3 %v654_v13  ;;  %v800_v12 = vld [vmem:[#allocation21 + $0x1a8] sm:$0xff]  ;;  %v801_v13 = vld [vmem:[#allocation21 + $0x1b0] sm:$0xff] }
  0x9a   :  { %594 = vmatmul.f32.vlgmr.msrb.gmra.mxu3 %v2811_v1  ;;  %666 = vmatpush.msra.mxu0 %v647_v14  ;;  %v802_v14 = vld [vmem:[#allocation21 + $0x1b8] sm:$0xff] }
  0x9b   :  { %686 = vmatpush.msra.mxu1 %v648_v15  ;;  %706 = vmatpush.msra.mxu2 %v649_v16  ;;  %v795_v15 = vld [vmem:[#allocation21 + $0x180] sm:$0xff]  ;;  %v796_v16 = vld [vmem:[#allocation21 + $0x188] sm:$0xff] }
  0x9c   :  { %726 = vmatpush.msra.mxu3 %v650_v17  ;;  %667 = vmatpush.msra.mxu0 %v643_v18  ;;  %v797_v17 = vld [vmem:[#allocation21 + $0x190] sm:$0xff]  ;;  %v798_v18 = vld [vmem:[#allocation21 + $0x198] sm:$0xff] }
  0x9d   :  { %687 = vmatpush.msra.mxu1 %v644_v19  ;;  %707 = vmatpush.msra.mxu2 %v645_v20  ;;  %v791_v19 = vld [vmem:[#allocation21 + $0x160] sm:$0xff]  ;;  %v792_v20 = vld [vmem:[#allocation21 + $0x168] sm:$0xff] }
  0x9e   :  { %727 = vmatpush.msra.mxu3 %v646_v21  ;;  %668 = vmatpush.msra.mxu0 %v639_v22  ;;  %v793_v21 = vld [vmem:[#allocation21 + $0x170] sm:$0xff]  ;;  %v794_v22 = vld [vmem:[#allocation21 + $0x178] sm:$0xff] }
  0x9f   :  { %688 = vmatpush.msra.mxu1 %v640_v23  ;;  %708 = vmatpush.msra.mxu2 %v641_v24  ;;  %v787_v23 = vld [vmem:[#allocation21 + $0x140] sm:$0xff]  ;;  %v788_v24 = vld [vmem:[#allocation21 + $0x148] sm:$0xff] }
  0xa0   :  { %728 = vmatpush.msra.mxu3 %v642_v25  ;;  %669 = vmatpush.msra.mxu0 %v635_v26  ;;  %v789_v25 = vld [vmem:[#allocation21 + $0x150] sm:$0xff]  ;;  %v790_v26 = vld [vmem:[#allocation21 + $0x158] sm:$0xff] }
  0xa1   :  { %689 = vmatpush.msra.mxu1 %v636_v27  ;;  %709 = vmatpush.msra.mxu2 %v637_v28  ;;  %v783_v27 = vld [vmem:[#allocation21 + $0x120] sm:$0xff]  ;;  %v784_v28 = vld [vmem:[#allocation21 + $0x128] sm:$0xff] }
  0xa2   :  { %729 = vmatpush.msra.mxu3 %v638_v29  ;;  %670 = vmatpush.msra.mxu0 %v631_v30  ;;  %v785_v29 = vld [vmem:[#allocation21 + $0x130] sm:$0xff]  ;;  %v786_v30 = vld [vmem:[#allocation21 + $0x138] sm:$0xff] }
  0xa3   :  { %690 = vmatpush.msra.mxu1 %v632_v31  ;;  %710 = vmatpush.msra.mxu2 %v633_v32  ;;  %v779_v31 = vld [vmem:[#allocation21 + $0x100] sm:$0xff]  ;;  %v780_v32 = vld [vmem:[#allocation21 + $0x108] sm:$0xff] }
  0xa4   :  { %730 = vmatpush.msra.mxu3 %v634_v33  ;;  %574 = vmatmul.f32.vlgmr.msrb.gmra.mxu2 %v2811_v1  ;;  %v602_v1 = vld [vmem:[#allocation18 + $0x18] sm:$0xff]  ;;  %v781_v33 = vld [vmem:[#allocation21 + $0x110] sm:$0xff] }
  0xa5   :  { %671 = vmatpush.msra.mxu0 %v627_v34  ;;  %691 = vmatpush.msra.mxu1 %v628_v35  ;;  %v782_v34 = vld [vmem:[#allocation21 + $0x118] sm:$0xff]  ;;  %v775_v35 = vld [vmem:[#allocation21 + $0xe0] sm:$0xff] }
  0xa6   :  { %711 = vmatpush.msra.mxu2 %v629_v36  ;;  %731 = vmatpush.msra.mxu3 %v630_v37  ;;  %v776_v36 = vld [vmem:[#allocation21 + $0xe8] sm:$0xff]  ;;  %v777_v37 = vld [vmem:[#allocation21 + $0xf0] sm:$0xff] }
  0xa7   :  { %672 = vmatpush.msra.mxu0 %v623_v38  ;;  %692 = vmatpush.msra.mxu1 %v624_v39  ;;  %v778_v38 = vld [vmem:[#allocation21 + $0xf8] sm:$0xff]  ;;  %v771_v39 = vld [vmem:[#allocation21 + $0xc0] sm:$0xff] }
  0xa8   :  { %712 = vmatpush.msra.mxu2 %v625_v40  ;;  %732 = vmatpush.msra.mxu3 %v626_v41  ;;  %v772_v40 = vld [vmem:[#allocation21 + $0xc8] sm:$0xff]  ;;  %v773_v41 = vld [vmem:[#allocation21 + $0xd0] sm:$0xff] }
  0xa9   :  { %673 = vmatpush.msra.mxu0 %v619_v42  ;;  %693 = vmatpush.msra.mxu1 %v620_v43  ;;  %v774_v42 = vld [vmem:[#allocation21 + $0xd8] sm:$0xff]  ;;  %v767_v43 = vld [vmem:[#allocation21 + $0xa0] sm:$0xff] }
  0xaa   :  { %713 = vmatpush.msra.mxu2 %v621_v44  ;;  %733 = vmatpush.msra.mxu3 %v622_v45  ;;  %v768_v44 = vld [vmem:[#allocation21 + $0xa8] sm:$0xff]  ;;  %v769_v45 = vld [vmem:[#allocation21 + $0xb0] sm:$0xff] }
  0xab   :  { %674 = vmatpush.msra.mxu0 %v615_v46  ;;  %694 = vmatpush.msra.mxu1 %v616_v47  ;;  %v770_v46 = vld [vmem:[#allocation21 + $0xb8] sm:$0xff]  ;;  %v763_v47 = vld [vmem:[#allocation21 + $0x80] sm:$0xff] }
  0xac   :  { %714 = vmatpush.msra.mxu2 %v617_v48  ;;  %734 = vmatpush.msra.mxu3 %v618_v49  ;;  %v764_v48 = vld [vmem:[#allocation21 + $0x88] sm:$0xff]  ;;  %v765_v49 = vld [vmem:[#allocation21 + $0x90] sm:$0xff] }
  0xad   :  { %675 = vmatpush.msra.mxu0 %v611_v50  ;;  %695 = vmatpush.msra.mxu1 %v612_v51  ;;  %v766_v50 = vld [vmem:[#allocation21 + $0x98] sm:$0xff]  ;;  %v759_v51 = vld [vmem:[#allocation21 + $0x60] sm:$0xff] }
  0xae   :  { %715 = vmatpush.msra.mxu2 %v613_v52  ;;  %735 = vmatpush.msra.mxu3 %v614_v53  ;;  %v760_v52 = vld [vmem:[#allocation21 + $0x68] sm:$0xff]  ;;  %v761_v53 = vld [vmem:[#allocation21 + $0x70] sm:$0xff] }
  0xaf   :  { %676 = vmatpush.msra.mxu0 %v607_v54  ;;  %696 = vmatpush.msra.mxu1 %v608_v55  ;;  %v762_v54 = vld [vmem:[#allocation21 + $0x78] sm:$0xff]  ;;  %v755_v55 = vld [vmem:[#allocation21 + $0x40] sm:$0xff] }
  0xb0   :  { %716 = vmatpush.msra.mxu2 %v609_v56  ;;  %736 = vmatpush.msra.mxu3 %v610_v57  ;;  %v756_v56 = vld [vmem:[#allocation21 + $0x48] sm:$0xff]  ;;  %v757_v57 = vld [vmem:[#allocation21 + $0x50] sm:$0xff] }
  0xb1   :  { %677 = vmatpush.msra.mxu0 %v603_v58  ;;  %697 = vmatpush.msra.mxu1 %v604_v59  ;;  %v758_v58 = vld [vmem:[#allocation21 + $0x58] sm:$0xff]  ;;  %v751_v59 = vld [vmem:[#allocation21 + $0x20] sm:$0xff] }
  0xb2   :  { %717 = vmatpush.msra.mxu2 %v605_v60  ;;  %737 = vmatpush.msra.mxu3 %v606_v61  ;;  %v752_v60 = vld [vmem:[#allocation21 + $0x28] sm:$0xff]  ;;  %v753_v61 = vld [vmem:[#allocation21 + $0x30] sm:$0xff] }
  0xb3   :  { %678 = vmatpush.msra.mxu0 %v599_v62  ;;  %698 = vmatpush.msra.mxu1 %v600_v63  ;;  %v754_v62 = vld [vmem:[#allocation21 + $0x38] sm:$0xff]  ;;  %v747_v63 = vld [vmem:[#allocation21] sm:$0xff] }
  0xb4   :  { %718 = vmatpush.msra.mxu2 %v601_v0  ;;  %738 = vmatpush.msra.mxu3 %v602_v1  ;;  %v748_v0 = vld [vmem:[#allocation21 + $0x8] sm:$0xff]  ;;  %v749_v1 = vld [vmem:[#allocation21 + $0x10] sm:$0xff] }
  0xb5   :  { %679 = vmatmul.f32.vlgmr.msra.gmra.mxu0 %v598_v2  ;;  %699 = vmatmul.f32.vlgmr.msra.gmra.mxu1 %v598_v2 }
  0xb6   :  { %719 = vmatmul.f32.vlgmr.msra.gmra.mxu2 %v598_v2  ;;  %739 = vmatmul.f32.vlgmr.msra.gmra.mxu3 %v598_v2  ;;  %v750_v2 = vld [vmem:[#allocation21 + $0x18] sm:$0xff] }
  0xb7   :  { %811 = vmatpush.msrb.mxu0 %v807_v3  ;;  %831 = vmatpush.msrb.mxu1 %v808_v4  ;;  %v298_v3 = vld [vmem:[#allocation13] sm:$0xff]  ;;  %v988_v4 = vld [vmem:[#allocation27 + $0x78] sm:$0xff] }
  0xb8   :  { %851 = vmatpush.msrb.mxu2 %v809_v5  ;;  %871 = vmatpush.msrb.mxu3 %v810_v6  ;;  %v987_v5 = vld [vmem:[#allocation27 + $0x70] sm:$0xff]  ;;  %v986_v6 = vld [vmem:[#allocation27 + $0x68] sm:$0xff] }
  0xb9   :  { %812 = vmatpush.msrb.mxu0 %v803_v7  ;;  %832 = vmatpush.msrb.mxu1 %v804_v8  ;;  %v985_v7 = vld [vmem:[#allocation27 + $0x60] sm:$0xff]  ;;  %v984_v8 = vld [vmem:[#allocation27 + $0x58] sm:$0xff] }
  0xba   :  { %852 = vmatpush.msrb.mxu2 %v805_v9  ;;  %872 = vmatpush.msrb.mxu3 %v806_v10  ;;  %v983_v9 = vld [vmem:[#allocation27 + $0x50] sm:$0xff]  ;;  %v982_v10 = vld [vmem:[#allocation27 + $0x48] sm:$0xff] }
  0xbb   :  { %813 = vmatpush.msrb.mxu0 %v799_v11  ;;  %833 = vmatpush.msrb.mxu1 %v800_v12 }
  0xbc   :  { %853 = vmatpush.msrb.mxu2 %v801_v13  ;;  %873 = vmatpush.msrb.mxu3 %v802_v14  ;;  %v981_v13 = vld [vmem:[#allocation27 + $0x40] sm:$0xff]  ;;  %v980_v14 = vld [vmem:[#allocation27 + $0x38] sm:$0xff] }
  0xbd   :  { %814 = vmatpush.msrb.mxu0 %v795_v15  ;;  %834 = vmatpush.msrb.mxu1 %v796_v16  ;;  %v979_v15 = vld [vmem:[#allocation27 + $0x30] sm:$0xff] }
  0xbe   :  { %854 = vmatpush.msrb.mxu2 %v797_v17  ;;  %874 = vmatpush.msrb.mxu3 %v798_v18  ;;  %v978_v17 = vld [vmem:[#allocation27 + $0x28] sm:$0xff]  ;;  %v977_v18 = vld [vmem:[#allocation27 + $0x20] sm:$0xff] }
  0xbf   :  { %815 = vmatpush.msrb.mxu0 %v791_v19  ;;  %835 = vmatpush.msrb.mxu1 %v792_v20 }
  0xc0   :  { %855 = vmatpush.msrb.mxu2 %v793_v21  ;;  %875 = vmatpush.msrb.mxu3 %v794_v22  ;;  %v1559_v21 = vld [vmem:[#allocation24 + $0x1e0] sm:$0xff]  ;;  %v1560_v22 = vld [vmem:[#allocation24 + $0x1e8] sm:$0xff] }
  0xc1   :  { %816 = vmatpush.msrb.mxu0 %v787_v23  ;;  %836 = vmatpush.msrb.mxu1 %v788_v24  ;;  %v1561_v23 = vld [vmem:[#allocation24 + $0x1f0] sm:$0xff]  ;;  %v976_v24 = vld [vmem:[#allocation27 + $0x18] sm:$0xff] }
  0xc2   :  { %856 = vmatpush.msrb.mxu2 %v789_v25  ;;  %876 = vmatpush.msrb.mxu3 %v790_v26  ;;  %v1555_v25 = vld [vmem:[#allocation24 + $0x1c0] sm:$0xff]  ;;  %v1556_v26 = vld [vmem:[#allocation24 + $0x1c8] sm:$0xff] }
  0xc3   :  { %817 = vmatpush.msrb.mxu0 %v783_v27  ;;  %837 = vmatpush.msrb.mxu1 %v784_v28  ;;  %v1557_v27 = vld [vmem:[#allocation24 + $0x1d0] sm:$0xff] }
  0xc4   :  { %857 = vmatpush.msrb.mxu2 %v785_v29  ;;  %877 = vmatpush.msrb.mxu3 %v786_v30  ;;  %v975_v28 = vld [vmem:[#allocation27 + $0x10] sm:$0xff]  ;;  %v1551_v29 = vld [vmem:[#allocation24 + $0x1a0] sm:$0xff]  ;;  %v1552_v30 = vld [vmem:[#allocation24 + $0x1a8] sm:$0xff] }
  0xc5   :  { %818 = vmatpush.msrb.mxu0 %v779_v31  ;;  %838 = vmatpush.msrb.mxu1 %v780_v32  ;;  %v1553_v31 = vld [vmem:[#allocation24 + $0x1b0] sm:$0xff] }
  0xc6   :  { %858 = vmatpush.msrb.mxu2 %v781_v33  ;;  %878 = vmatpush.msrb.mxu3 %v782_v34  ;;  %v974_v33 = vld [vmem:[#allocation27 + $0x8] sm:$0xff]  ;;  %v1547_v34 = vld [vmem:[#allocation24 + $0x180] sm:$0xff] }
  0xc7   :  { %819 = vmatpush.msrb.mxu0 %v775_v35  ;;  %839 = vmatpush.msrb.mxu1 %v776_v36  ;;  %v1548_v35 = vld [vmem:[#allocation24 + $0x188] sm:$0xff]  ;;  %v1549_v36 = vld [vmem:[#allocation24 + $0x190] sm:$0xff] }
  0xc8   :  { %859 = vmatpush.msrb.mxu2 %v777_v37  ;;  %879 = vmatpush.msrb.mxu3 %v778_v38  ;;  %v973_v38 = vld [vmem:[#allocation27] sm:$0xff] }
  0xc9   :  { %820 = vmatpush.msrb.mxu0 %v771_v39  ;;  %840 = vmatpush.msrb.mxu1 %v772_v40 }
  0xca   :  { %860 = vmatpush.msrb.mxu2 %v773_v41  ;;  %880 = vmatpush.msrb.mxu3 %v774_v42  ;;  %v1543_v41 = vld [vmem:[#allocation24 + $0x160] sm:$0xff]  ;;  %v1544_v42 = vld [vmem:[#allocation24 + $0x168] sm:$0xff] }
  0xcb   :  { %821 = vmatpush.msrb.mxu0 %v767_v43  ;;  %841 = vmatpush.msrb.mxu1 %v768_v44  ;;  %v1545_v43 = vld [vmem:[#allocation24 + $0x170] sm:$0xff]  ;;  %v1562_v44 = vld [vmem:[#allocation24 + $0x1f8] sm:$0xff] }
  0xcc   :  { %861 = vmatpush.msrb.mxu2 %v769_v45  ;;  %881 = vmatpush.msrb.mxu3 %v770_v46  ;;  %v1539_v45 = vld [vmem:[#allocation24 + $0x140] sm:$0xff]  ;;  %v1540_v46 = vld [vmem:[#allocation24 + $0x148] sm:$0xff] }
  0xcd   :  { %822 = vmatpush.msrb.mxu0 %v763_v47  ;;  %842 = vmatpush.msrb.mxu1 %v764_v48  ;;  %v1541_v47 = vld [vmem:[#allocation24 + $0x150] sm:$0xff]  ;;  %v1558_v48 = vld [vmem:[#allocation24 + $0x1d8] sm:$0xff] }
  0xce   :  { %862 = vmatpush.msrb.mxu2 %v765_v49  ;;  %882 = vmatpush.msrb.mxu3 %v766_v50  ;;  %v2830_v49 = vld [vmem:[%s2968_s11] sm:$0xf]  ;;  %v1535_v50 = vld [vmem:[#allocation24 + $0x120] sm:$0xff] }
  0xcf   :  { %823 = vmatpush.msrb.mxu0 %v759_v51  ;;  %843 = vmatpush.msrb.mxu1 %v760_v52  ;;  %v1536_v51 = vld [vmem:[#allocation24 + $0x128] sm:$0xff] }
  0xd0   :  { %863 = vmatpush.msrb.mxu2 %v761_v53  ;;  %883 = vmatpush.msrb.mxu3 %v762_v54  ;;  %v1537_v54 = vld [vmem:[#allocation24 + $0x130] sm:$0xff] }
  0xd1   :  { %824 = vmatpush.msrb.mxu0 %v755_v55  ;;  %844 = vmatpush.msrb.mxu1 %v756_v56  ;;  %v1554_v55 = vld [vmem:[#allocation24 + $0x1b8] sm:$0xff]  ;;  %v1531_v56 = vld [vmem:[#allocation24 + $0x100] sm:$0xff] }
  0xd2   :  { %864 = vmatpush.msrb.mxu2 %v757_v57  ;;  %884 = vmatpush.msrb.mxu3 %v758_v58  ;;  %v1532_v57 = vld [vmem:[#allocation24 + $0x108] sm:$0xff]  ;;  %v1533_v58 = vld [vmem:[#allocation24 + $0x110] sm:$0xff] }
  0xd3   :  { %825 = vmatpush.msrb.mxu0 %v751_v59  ;;  %845 = vmatpush.msrb.mxu1 %v752_v60 }
  0xd4   :  { %865 = vmatpush.msrb.mxu2 %v753_v61  ;;  %885 = vmatpush.msrb.mxu3 %v754_v62 }
  0xd5   :  { %826 = vmatpush.msrb.mxu0 %v747_v63  ;;  %846 = vmatpush.msrb.mxu1 %v748_v0  ;;  %v897_v63 = vperm.slane %v2830_v49, 0  ;;  %v898_v0 = vperm.slane %v2830_v49, 1 }
  0xd6   :  { %866 = vmatpush.msrb.mxu2 %v749_v1  ;;  %886 = vmatpush.msrb.mxu3 %v750_v2  ;;  %v1550_v1 = vld [vmem:[#allocation24 + $0x198] sm:$0xff] }
  0xd7   :  { %827 = vmatmul.f32.vlgmr.msrb.gmra.mxu0 %v298_v3  ;;  %847 = vmatmul.f32.vlgmr.msrb.gmra.mxu1 %v298_v3 }
  0xd8   :  { %867 = vmatmul.f32.vlgmr.msrb.gmra.mxu2 %v298_v3  ;;  %887 = vmatmul.f32.vlgmr.msrb.gmra.mxu3 %v298_v3 }
  0xd9   :  { %993 = vmatpush.msra.mxu0 %v988_v4  ;;  %1563 = vmatpush.msra.mxu1 %v1559_v21  ;;  %v1527_v4 = vld [vmem:[#allocation24 + $0xe0] sm:$0xff] }
  0xda   :  { %1583 = vmatpush.msra.mxu2 %v1560_v22  ;;  %1603 = vmatpush.msra.mxu3 %v1561_v23  ;;  %v1538_v23 = vld [vmem:[#allocation24 + $0x138] sm:$0xff] }
  0xdb   :  { %994 = vmatpush.msra.mxu0 %v987_v5  ;;  %1564 = vmatpush.msra.mxu1 %v1555_v25  ;;  %v1528_v5 = vld [vmem:[#allocation24 + $0xe8] sm:$0xff]  ;;  %v900_v25 = vperm.slane %v2830_v49, 3 }
  0xdc   :  { %1584 = vmatpush.msra.mxu2 %v1556_v26  ;;  %1604 = vmatpush.msra.mxu3 %v1557_v27  ;;  %v1515_v26 = vld [vmem:[#allocation24 + $0x80] sm:$0xff]  ;;  %v1516_v27 = vld [vmem:[#allocation24 + $0x88] sm:$0xff] }
  0xdd   :  { %995 = vmatpush.msra.mxu0 %v986_v6  ;;  %1565 = vmatpush.msra.mxu1 %v1551_v29  ;;  %v1529_v6 = vld [vmem:[#allocation24 + $0xf0] sm:$0xff] }
  0xde   :  { %1585 = vmatpush.msra.mxu2 %v1552_v30  ;;  %1605 = vmatpush.msra.mxu3 %v1553_v31  ;;  %v1534_v30 = vld [vmem:[#allocation24 + $0x118] sm:$0xff]  ;;  %v1511_v31 = vld [vmem:[#allocation24 + $0x60] sm:$0xff] }
  0xdf   :  { %996 = vmatpush.msra.mxu0 %v985_v7  ;;  %1566 = vmatpush.msra.mxu1 %v1547_v34 }
  0xe0   :  { %1586 = vmatpush.msra.mxu2 %v1548_v35  ;;  %1606 = vmatpush.msra.mxu3 %v1549_v36  ;;  %v1513_v35 = vld [vmem:[#allocation24 + $0x70] sm:$0xff]  ;;  %v1530_v36 = vld [vmem:[#allocation24 + $0xf8] sm:$0xff] }
  0xe1   :  { %997 = vmatpush.msra.mxu0 %v984_v8  ;;  %1567 = vmatpush.msra.mxu1 %v1543_v41 }
  0xe2   :  { %1587 = vmatpush.msra.mxu2 %v1544_v42  ;;  %1607 = vmatpush.msra.mxu3 %v1545_v43  ;;  %v1503_v42 = vld [vmem:[#allocation24 + $0x20] sm:$0xff]  ;;  %v1504_v43 = vld [vmem:[#allocation24 + $0x28] sm:$0xff] }
  0xe3   :  { %998 = vmatpush.msra.mxu0 %v983_v9  ;;  %1568 = vmatpush.msra.mxu1 %v1539_v45  ;;  %v1546_v9 = vld [vmem:[#allocation24 + $0x178] sm:$0xff] }
  0xe4   :  { %1588 = vmatpush.msra.mxu2 %v1540_v46  ;;  %1608 = vmatpush.msra.mxu3 %v1541_v47  ;;  %v1522_v45 = vld [vmem:[#allocation24 + $0xb8] sm:$0xff]  ;;  %v1499_v47 = vld [vmem:[#allocation24] sm:$0xff] }
  0xe5   :  { %999 = vmatpush.msra.mxu0 %v982_v10  ;;  %1569 = vmatpush.msra.mxu1 %v1535_v50  ;;  %v1523_v10 = vld [vmem:[#allocation24 + $0xc0] sm:$0xff] }
  0xe6   :  { %1589 = vmatpush.msra.mxu2 %v1536_v51  ;;  %1609 = vmatpush.msra.mxu3 %v1537_v54  ;;  %v1501_v51 = vld [vmem:[#allocation24 + $0x10] sm:$0xff] }
  0xe7   :  { %1000 = vmatpush.msra.mxu0 %v981_v13  ;;  %1570 = vmatpush.msra.mxu1 %v1531_v56 }
  0xe8   :  { %1590 = vmatpush.msra.mxu2 %v1532_v57  ;;  %1610 = vmatpush.msra.mxu3 %v1533_v58 }
  0xe9   :  { %1001 = vmatpush.msra.mxu0 %v980_v14  ;;  %1571 = vmatpush.msra.mxu1 %v1527_v4 }
  0xea   :  { %1591 = vmatpush.msra.mxu2 %v1528_v5  ;;  %1611 = vmatpush.msra.mxu3 %v1529_v6 }
  0xeb   :  { %1002 = vmatpush.msra.mxu0 %v979_v15  ;;  %1572 = vmatpush.msra.mxu1 %v1523_v10  ;;  %v1542_v15 = vld [vmem:[#allocation24 + $0x158] sm:$0xff] }
  0xed   :  { %1003 = vmatpush.msra.mxu0 %v978_v17 }
  0xef   :  { %1004 = vmatpush.msra.mxu0 %v977_v18  ;;  %v1519_v18 = vld [vmem:[#allocation24 + $0xa0] sm:$0xff] }
  0xf0   :  { %1573 = vmatpush.msra.mxu1 %v1519_v18 }
  0xf1   :  { %1005 = vmatpush.msra.mxu0 %v976_v24 }
  0xf2   :  { %1574 = vmatpush.msra.mxu1 %v1515_v26 }
  0xf3   :  { %1006 = vmatpush.msra.mxu0 %v975_v28  ;;  %v1517_v28 = vld [vmem:[#allocation24 + $0x90] sm:$0xff] }
  0xf4   :  { %1575 = vmatpush.msra.mxu1 %v1511_v31 }
  0xf5   :  { %1007 = vmatpush.msra.mxu0 %v974_v33  ;;  %v1512_v33 = vld [vmem:[#allocation24 + $0x68] sm:$0xff] }
  0xf7   :  { %1008 = vmatpush.msra.mxu0 %v973_v38  ;;  %v1508_v38 = vld [vmem:[#allocation24 + $0x48] sm:$0xff] }
  0xf9   :  { %1623 = vmatpush.msrb.mxu0 %v1562_v44  ;;  %v1505_v44 = vld [vmem:[#allocation24 + $0x30] sm:$0xff] }
  0xfb   :  { %1624 = vmatpush.msrb.mxu0 %v1558_v48  ;;  %v1500_v48 = vld [vmem:[#allocation24 + $0x8] sm:$0xff] }
  0xfd   :  { %1625 = vmatpush.msrb.mxu0 %v1554_v55 }
  0xff   :  { %1626 = vmatpush.msrb.mxu0 %v1550_v1  ;;  %v1502_v1 = vld [vmem:[#allocation24 + $0x18] sm:$0xff] }
 0x101   :  { %1627 = vmatpush.msrb.mxu0 %v1546_v9 }
 0x103   :  { %1628 = vmatpush.msrb.mxu0 %v1542_v15 }
 0x105   :  { %1629 = vmatpush.msrb.mxu0 %v1538_v23 }
 0x106   :  { %v2817_v11 = vpop.f32.mrf.mxu0  ;;  %v2819_v12 = vpop.f32.mrf.mxu1 }
 0x107   :  { %1630 = vmatpush.msrb.mxu0 %v1534_v30 }
 0x109   :  { %1631 = vmatpush.msrb.mxu0 %v1530_v36 }
 0x110   :  { %v535_v19 = vpop.f32.mrf.mxu0  ;;  %v555_v20 = vpop.f32.mrf.mxu1 }
 0x111   :  { %v2821_v16 = vpop.f32.mrf.mxu3  ;;  %v536_v52 = vadd.f32 %v535_v19, %v2817_v11  ;;  %v556_v53 = vadd.f32 %v555_v20, %v2819_v12  ;;  %v1524_v11 = vld [vmem:[#allocation24 + $0xc8] sm:$0xff]  ;;  %v1525_v12 = vld [vmem:[#allocation24 + $0xd0] sm:$0xff] }
 0x112   :  { %1592 = vmatpush.msra.mxu2 %v1524_v11  ;;  %1612 = vmatpush.msra.mxu3 %v1525_v12  ;;  %v1520_v19 = vld [vmem:[#allocation24 + $0xa8] sm:$0xff]  ;;  %v1521_v20 = vld [vmem:[#allocation24 + $0xb0] sm:$0xff] }
 0x114   :  { %1593 = vmatpush.msra.mxu2 %v1520_v19  ;;  %1613 = vmatpush.msra.mxu3 %v1521_v20 }
 0x115   :  { %v2823_v32 = vpop.f32.mrf.mxu2 }
 0x116   :  { %1594 = vmatpush.msra.mxu2 %v1516_v27  ;;  %1614 = vmatpush.msra.mxu3 %v1517_v28 }
 0x118   :  { %1595 = vmatpush.msra.mxu2 %v1512_v33  ;;  %1615 = vmatpush.msra.mxu3 %v1513_v35 }
 0x11a   :  { %1596 = vmatpush.msra.mxu2 %v1508_v38 }
 0x11c   :  { %1597 = vmatpush.msra.mxu2 %v1504_v43  ;;  %v1013_v43 = vld [vmem:[#allocation10] sm:$0xff] }
 0x11d   :  { %v2825_v37 = vpop.f32.mrf.mxu3 }
 0x11e   :  { %v596_v17 = vadd.f32 %v2825_v37, %v2821_v16  ;;  %v1507_v37 = vld [vmem:[#allocation24 + $0x40] sm:$0xff]  ;;  %1598 = vmatpush.msra.mxu2 %v1500_v48  ;;  %v1017_v48 = vld [vmem:[#allocation10 + $0x20] sm:$0xff] }
 0x11f   :  { %1576 = vmatpush.msra.mxu1 %v1507_v37 }
 0x121   :  { %1577 = vmatpush.msra.mxu1 %v1503_v42 }
 0x123   :  { %1578 = vmatpush.msra.mxu1 %v1499_v47 }
 0x127   :  { %v2834_v59 = vpop.f32.mrf.mxu2 }
 0x128   :  { %v576_v54 = vadd.f32 %v2834_v59, %v2823_v32  ;;  %v1506_v32 = vld [vmem:[#allocation24 + $0x38] sm:$0xff] }
 0x132   :  { %v680_v39 = vpop.f32.mrf.mxu0  ;;  %v700_v40 = vpop.f32.mrf.mxu1 }
 0x133   :  { %v743_v60 = vadd.f32 %v680_v39, %v536_v52  ;;  %v744_v61 = vadd.f32 %v700_v40, %v556_v53  ;;  %v1509_v39 = vld [vmem:[#allocation24 + $0x50] sm:$0xff]  ;;  %v1526_v40 = vld [vmem:[#allocation24 + $0xd8] sm:$0xff] }
 0x134   :  { %1616 = vmatpush.msra.mxu3 %v1509_v39  ;;  %1632 = vmatpush.msrb.mxu0 %v1526_v40  ;;  %v1518_v52 = vld [vmem:[#allocation24 + $0x98] sm:$0xff]  ;;  %v2076_v40 = vld [vmem:[%s2974_s17] ss:$0 sm:$0xff] }
 0x136   :  { %1617 = vmatpush.msra.mxu3 %v1505_v44  ;;  %1633 = vmatpush.msrb.mxu0 %v1522_v45 }
 0x138   :  { %1618 = vmatpush.msra.mxu3 %v1501_v51  ;;  %1634 = vmatpush.msrb.mxu0 %v1518_v52 }
 0x139   :  { %v740_v62 = vpop.f32.mrf.mxu3  ;;  %v720_v29 = vpop.f32.mrf.mxu2 }
 0x13a   :  { %v746_v24 = vadd.f32 %v740_v62, %v596_v17  ;;  %v745_v58 = vadd.f32 %v720_v29, %v576_v54 }
 0x154   :  { %v828_v2 = vpop.f32.mrf.mxu0  ;;  %v848_v3 = vpop.f32.mrf.mxu1 }
 0x155   :  { %v891_v7 = vadd.f32 %v828_v2, %v743_v60  ;;  %v892_v8 = vadd.f32 %v848_v3, %v744_v61  ;;  %v1514_v60 = vld [vmem:[#allocation24 + $0x78] sm:$0xff] }
 0x156   :  { %v1510_v61 = vld [vmem:[#allocation24 + $0x58] sm:$0xff]  ;;  %1635 = vmatpush.msrb.mxu0 %v1514_v60 }
 0x157   :  { %v905_v13 = vadd.f32 %v897_v63, %v891_v7  ;;  %v906_v14 = vadd.f32 %v898_v0, %v892_v8  ;;  %v899_v63 = vperm.slane %v2830_v49, 2 }
 0x158   :  { %1636 = vmatpush.msrb.mxu0 %v1510_v61 }
 0x159   :  { %v2041_v21 = vmul.f32 -1.442695, %v905_v13  ;;  %v2042_v22 = vmul.f32 -1.442695, %v906_v14 }
 0x15a   :  { %1637 = vmatpush.msrb.mxu0 %v1506_v32 }
 0x15b   :  { %2078 = vpow2.f32 %v2041_v21  ;;  %v888_v16 = vpop.f32.mrf.mxu3  ;;  %v868_v57 = vpop.f32.mrf.mxu2  ;;  %v302_v21 = vld [vmem:[#allocation15] sm:$0xff] }
 0x15c   :  { %2080 = vpow2.f32 %v2042_v22  ;;  %v894_v34 = vadd.f32 %v888_v16, %v746_v24  ;;  %v893_v62 = vadd.f32 %v868_v57, %v745_v58  ;;  %1638 = vmatpush.msrb.mxu0 %v1502_v1  ;;  %v1014_v57 = vld [vmem:[#allocation10 + $0x8] sm:$0xff]  ;;  %v1097_v1 = vlaneseq }
 0x15e   :  { %v908_v41 = vadd.f32 %v900_v25, %v894_v34  ;;  %v907_v3 = vadd.f32 %v899_v63, %v893_v62  ;;  %v1018_v62 = vld [vmem:[#allocation10 + $0x28] sm:$0xff] }
 0x160   :  { %v2043_v46 = vmul.f32 -1.442695, %v908_v41 }
 0x161   :  { %v2079_v50 = vpop.eup %2078 }
 0x162   :  { %v2081_v53 = vpop.eup %2080  ;;  %v913_v55 = vadd.f32 1.0, %v2079_v50  ;;  %2082 = vpow2.f32 %v2043_v46  ;;  %v1015_v50 = vld [vmem:[#allocation10 + $0x10] sm:$0xff] }
 0x163   :  { %v932_v56 = vadd.f32 1.0, %v2081_v53 }
 0x164   :  { %2084 = vrcp.f32 %v913_v55  ;;  %v925_v9 = vand.u32 2147483648, %v913_v55  ;;  %v923_v11 = vand.u32 2147483647, %v913_v55  ;;  %vm919_vm2 = vweird.f32 %v913_v55 }
 0x165   :  { %2086 = vrcp.f32 %v932_v56  ;;  %v944_v10 = vand.u32 2147483648, %v932_v56  ;;  %v942_v13 = vand.u32 2147483647, %v932_v56  ;;  %vm938_vm3 = vweird.f32 %v932_v56 }
 0x166   :  { %v926_v17 = vor.u32 1.1754944e-38, %v925_v9  ;;  %vm924_vm6 = vcmp.eq.f32.partialorder %v923_v11, 8.507059e+37 }
 0x167   :  { %v945_v20 = vor.u32 1.1754944e-38, %v944_v10  ;;  %vm943_vm7 = vcmp.eq.f32.partialorder %v942_v13, 8.507059e+37  ;;  %v1019_v10 = vld [vmem:[#allocation10 + $0x30] sm:$0xff] }
 0x168   :  { %v2083_v59 = vpop.eup %2082 }
 0x169   :  { %v952_v0 = vadd.f32 1.0, %v2083_v59  ;;  %v1016_v59 = vld [vmem:[#allocation10 + $0x18] sm:$0xff] }
 0x16a   :  { %v2085_v2 = vpop.eup %2084 }
 0x16b   :  { %v2087_v4 = vpop.eup %2086  ;;  %v915_v5 = vmul.f32 %v2085_v2, %v913_v55  ;;  %2088 = vrcp.f32 %v952_v0  ;;  %vm920_vm0 = vweird.f32 %v2085_v2  ;;  %v964_v33 = vand.u32 2147483648, %v952_v0 }
 0x16c   :  { %v934_v6 = vmul.f32 %v2087_v4, %v932_v56  ;;  %2090 = vtanh.f32 %v907_v3  ;;  %vm939_vm1 = vweird.f32 %v2087_v4  ;;  %vm921_vm4 = vmor %vm919_vm2, %vm920_vm0  ;;  %vm958_vm9 = vweird.f32 %v952_v0 }
 0x16d   :  { %v916_v7 = vsub.f32 1.0, %v915_v5  ;;  %vm940_vm5 = vmor %vm938_vm3, %vm939_vm1  ;;  %v962_v34 = vand.u32 2147483647, %v952_v0  ;;  %v965_v36 = vor.u32 1.1754944e-38, %v964_v33  ;;  %vm1115_vm0 = vcmask 1045509  }
 0x16e   :  { %v935_v8 = vsub.f32 1.0, %v934_v6  ;;  %vm1117_vm1 = vcmask 1046534   ;;  %vm1119_vm2 = vcmask 1047559   ;;  %vm1122_vm3 = vcmask 64512  }
 0x16f   :  { %v917_v49 = vmul.f32 %v2085_v2, %v916_v7  ;;  %vm963_vm11 = vcmp.eq.f32.partialorder %v962_v34, 8.507059e+37 }
 0x170   :  { %v936_v12 = vmul.f32 %v2087_v4, %v935_v8 }
 0x171   :  { %v2089_v14 = vpop.eup %2088  ;;  %v918_v15 = vadd.f32 %v2085_v2, %v917_v49 }
 0x172   :  { %v937_v18 = vadd.f32 %v2087_v4, %v936_v12  ;;  %v954_v19 = vmul.f32 %v2089_v14, %v952_v0  ;;  %v2091_v23 = vpop.eup %2090  ;;  %vm959_vm8 = vweird.f32 %v2089_v14 }
 0x173   :  { %v922_v22 = vsel %vm921_vm4, %v2085_v2, %v918_v15  ;;  %vm960_vm10 = vmor %vm958_vm9, %vm959_vm8  ;;  %v2077_v2 = vld [vmem:[%s2975_s18] ss:$0 sm:$0xff] }
 0x174   :  { %v927_v24 = vsel %vm924_vm6, %v926_v17, %v922_v22  ;;  %v941_v25 = vsel %vm940_vm5, %v2087_v4, %v937_v18  ;;  %v955_v26 = vsub.f32 1.0, %v954_v19  ;;  %v1171_v4 = vshrl.u32 %v1097_v1, 7  ;;  %v1020_v17 = vld [vmem:[#allocation10 + $0x38] sm:$0xff] }
 0x175   :  { %v946_v27 = vsel %vm943_vm7, %v945_v20, %v941_v25  ;;  %v969_v28 = vmul.f32 %v2091_v23, %v927_v24 }
 0x176   :  { %v968_v29 = vmul.f32 %v946_v27, %v302_v21  ;;  %v956_v16 = vmul.f32 %v2089_v14, %v955_v26  ;;  %2072 = vset.pattern.permute.xlu2 %v1171_v4  ;;  %2071 = vset.pattern.permute.xlu1 %v1171_v4 }
 0x177   :  { %2070 = vset.pattern.permute.xlu0 %v1171_v4 }
 0x178   :  { %v970_v30 = vadd.f32 %v969_v28, %v968_v29  ;;  %v957_v31 = vadd.f32 %v2089_v14, %v956_v16  ;;  %v1167_v29 = vld [vmem:[#allocation12] sm:$0xff] }
 0x179   :  { %v1183_v16 = vperm.slane %v1167_v29, 2  ;;  %v1169_v33 = vperm.slane %v1167_v29, 0  ;;  %v1197_v34 = vperm.slane %v1167_v29, 4 }
 0x17a   :  { %2092 = vtanh.f32 %v970_v30  ;;  %1980 = vst [vmem:[#allocation31] sm:$0xff] %v970_v30  ;;  %v961_v35 = vsel %vm960_vm10, %v2089_v14, %v957_v31  ;;  %v1190_v30 = vperm.slane %v1167_v29, 3  ;;  %v1176_v31 = vperm.slane %v1167_v29, 1 }
 0x17b   :  { %v966_v38 = vsel %vm963_vm11, %v965_v36, %v961_v35  ;;  %v1218_v35 = vperm.slane %v1167_v29, 7 }
 0x180   :  { %v2093_v37 = vpop.eup %2092 }
 0x181   :  { %v972_v39 = vmul.f32 %v2093_v37, %v966_v38  ;;  %v1211_v37 = vperm.slane %v1167_v29, 6 }
 0x183   :  { %1009 = vmatmul.f32.vlgmr.msra.gmra.mxu0 %v972_v39  ;;  %1976 = vst [vmem:[#allocation29] sm:$0xff] %v972_v39  ;;  %1579 = vmatmul.f32.vlgmr.msra.gmra.mxu1 %v972_v39 }
 0x184   :  { %1599 = vmatmul.f32.vlgmr.msra.gmra.mxu2 %v972_v39  ;;  %1619 = vmatmul.f32.vlgmr.msra.gmra.mxu3 %v972_v39 }
 0x18b   :  { %1639 = vmatmul.f32.vlgmr.msrb.gmra.mxu0 %v972_v39 }
 0x200   :  { %v1010_v41 = vpop.f32.mrf.mxu0 }
 0x201   :  { %v1011_v42 = vadd.f32 %v2076_v40, %v1010_v41  ;;  %v2850_v40 = vand.u32 127, %v1097_v1 }
 0x203   :  { %v1029_v44 = vperm.slane %v1011_v42, 0  ;;  %v1025_v45 = vrot.slane %v1011_v42, 4  ;;  %v1023_v46 = vrot.slane %v1011_v42, 2  ;;  %v1022_v47 = vrot.slane %v1011_v42, 1 }
 0x204   :  { %v1026_v51 = vrot.slane %v1011_v42, 5  ;;  %v1024_v52 = vrot.slane %v1011_v42, 3  ;;  %v1027_v0 = vrot.slane %v1011_v42, 6  ;;  %v1028_v6 = vrot.slane %v1011_v42, 7 }
 0x205   :  { %v1045_v53 = vadd.f32 %v1029_v44, %v1013_v43  ;;  %v1033_v54 = vperm.slane %v1025_v45, 0  ;;  %v1031_v55 = vperm.slane %v1023_v46, 0  ;;  %v1030_v56 = vperm.slane %v1022_v47, 0 }
 0x206   :  { %v1034_v61 = vperm.slane %v1026_v51, 0  ;;  %v1032_v63 = vperm.slane %v1024_v52, 0  ;;  %v1035_v8 = vperm.slane %v1027_v0, 0  ;;  %v1036_v13 = vperm.slane %v1028_v6, 0 }
 0x207   :  { %2094 = vtanh.f32 %v1045_v53  ;;  %v1049_v58 = vadd.f32 %v1033_v54, %v1017_v48  ;;  %v1047_v60 = vadd.f32 %v1031_v55, %v1015_v50  ;;  %v1046_v32 = vadd.f32 %v1030_v56, %v1014_v57 }
 0x208   :  { %v1050_v3 = vadd.f32 %v1034_v61, %v1018_v62  ;;  %v1048_v5 = vadd.f32 %v1032_v63, %v1016_v59  ;;  %v1051_v15 = vadd.f32 %v1035_v8, %v1019_v10  ;;  %v1052_v19 = vadd.f32 %v1036_v13, %v1020_v17 }
 0x209   :  { %2096 = vtanh.f32 %v1049_v58  ;;  %v2616_v0 = vmov 0  }
 0x20a   :  { %2098 = vtanh.f32 %v1047_v60 }
 0x20b   :  { %2100 = vtanh.f32 %v1046_v32  ;;  %v1204_v32 = vperm.slane %v1167_v29, 5 }
 0x20c   :  { %2102 = vtanh.f32 %v1050_v3 }
 0x20d   :  { %v2095_v7 = vpop.eup %2094  ;;  %2104 = vtanh.f32 %v1048_v5 }
 0x20e   :  { %v1065_v9 = vmul.f32 %v2095_v7, %v2077_v2  ;;  %2106 = vtanh.f32 %v1051_v15 }
 0x20f   :  { %v2097_v49 = vpop.eup %2096  ;;  %2108 = vtanh.f32 %v1052_v19 }
 0x210   :  { %v2099_v11 = vpop.eup %2098  ;;  %1073 = vadd.xlane.f32.xlu0 %v1065_v9  ;;  %v1069_v12 = vmul.f32 %v2097_v49, %v2077_v2 }
 0x211   :  { %v1067_v14 = vmul.f32 %v2099_v11, %v2077_v2  ;;  %v2101_v18 = vpop.eup %2100 }
 0x212   :  { %1081 = vadd.xlane.f32.xlu2 %v1069_v12  ;;  %v2103_v20 = vpop.eup %2102  ;;  %v1066_v22 = vmul.f32 %v2101_v18, %v2077_v2 }
 0x213   :  { %1077 = vadd.xlane.f32.xlu1 %v1067_v14  ;;  %v2105_v21 = vpop.eup %2104  ;;  %v1070_v23 = vmul.f32 %v2103_v20, %v2077_v2 }
 0x214   :  { %v1068_v24 = vmul.f32 %v2105_v21, %v2077_v2  ;;  %v2107_v25 = vpop.eup %2106 }
 0x215   :  { %v2109_v26 = vpop.eup %2108  ;;  %v1071_v27 = vmul.f32 %v2107_v25, %v2077_v2 }
 0x216   :  { %v1072_v28 = vmul.f32 %v2109_v26, %v2077_v2 }
 0x218   :  { %1075 = vadd.xlane.f32.xlu0 %v1066_v22 }
 0x21a   :  { %1083 = vadd.xlane.f32.xlu2 %v1070_v23 }
 0x21b   :  { %1079 = vadd.xlane.f32.xlu1 %v1068_v24 }
 0x220   :  { %1085 = vadd.xlane.f32.xlu0 %v1071_v27 }
 0x223   :  { %1087 = vadd.xlane.f32.xlu1 %v1072_v28 }
 0x232   :  { %1188 = vperm.xlu2 %2072, %v1183_v16  }
 0x234   :  { %1174 = vperm.xlu0 %2070, %v1169_v33  }
 0x23a   :  { %1195 = vperm.xlu2 %2072, %v1190_v30  }
 0x23c   :  { %1181 = vperm.xlu1 %2071, %v1176_v31   ;;  %1223 = vperm.xlu0 %2070, %v1218_v35  }
 0x244   :  { %1202 = vperm.xlu1 %2071, %v1197_v34   ;;  %2075 = vset.pattern.permute.xlu0 %v2616_v0 }
 0x24c   :  { %1216 = vperm.xlu1 %2071, %v1211_v37  }
 0x254   :  { %2074 = vset.pattern.permute.xlu1 %v2616_v0 }
 0x283   :  { %v1074_v36 = vpop.xlane.xlu0 %1073 }
 0x284   :  { %v1099_v42 = vperm.slane %v1074_v36, %v2850_v40 }
 0x285   :  { %v1082_v38 = vpop.xlane.xlu2 %1081 }
 0x286   :  { %v1078_v39 = vpop.xlane.xlu1 %1077  ;;  %v1103_v50 = vperm.slane %v1082_v38, %v2850_v40 }
 0x287   :  { %v1101_v44 = vperm.slane %v1078_v39, %v2850_v40 }
 0x28b   :  { %v1076_v41 = vpop.xlane.xlu0 %1075 }
 0x28c   :  { %v1100_v43 = vperm.slane %v1076_v41, %v2850_v40 }
 0x28d   :  { %v1084_v51 = vpop.xlane.xlu2 %1083 }
 0x28e   :  { %v1108_v45 = vsel %vm1107_vm12, %v1100_v43, %v1099_v42  ;;  %v1080_v46 = vpop.xlane.xlu1 %1079  ;;  %v1104_v54 = vperm.slane %v1084_v51, %v2850_v40 }
 0x28f   :  { %v1102_v47 = vperm.slane %v1080_v46, %v2850_v40  ;;  %v1110_v48 = vsel %vm1109_vm13, %v1101_v44, %v1108_v45 }
 0x291   :  { %v1112_v52 = vsel %vm1111_vm14, %v1102_v47, %v1110_v48 }
 0x292   :  { %v1114_v53 = vsel %vm1113_vm15, %v1103_v50, %v1112_v52 }
 0x293   :  { %v1086_v55 = vpop.xlane.xlu0 %1085  ;;  %v1116_v57 = vsel %vm1115_vm0, %v1104_v54, %v1114_v53 }
 0x294   :  { %v1105_v56 = vperm.slane %v1086_v55, %v2850_v40 }
 0x295   :  { %v1189_v59 = vpop.permute.xlu2 %1188 }
 0x296   :  { %v1088_v58 = vpop.xlane.xlu1 %1087  ;;  %v1118_v60 = vsel %vm1117_vm1, %v1105_v56, %v1116_v57 }
 0x297   :  { %v1106_v61 = vperm.slane %v1088_v58, %v2850_v40 }
 0x299   :  { %v1120_v62 = vsel %vm1119_vm2, %v1106_v61, %v1118_v60 }
 0x29a   :  { %v1123_v63 = vsel %vm1122_vm3, %v1120_v62, -inf }
 0x29b   :  { %1124 = vmax.xlane.f32.xlu2 %v1123_v63 }
 0x29d   :  { %v1196_v1 = vpop.permute.xlu2 %1195 }
 0x2a6   :  { %v1175_v22 = vpop.permute.xlu0 %1174 }
 0x2ae   :  { %v1182_v20 = vpop.permute.xlu1 %1181 }
 0x2b3   :  { %1209 = vperm.xlu2 %2072, %v1204_v32  }
 0x2b6   :  { %v1203_v35 = vpop.permute.xlu1 %1202 }
 0x2bb   :  { %2073 = vset.pattern.permute.xlu2 %v2616_v0 }
 0x2be   :  { %v1217_v48 = vpop.permute.xlu1 %1216 }
 0x30e   :  { %v1125_v2 = vpop.xlane.xlu2 %1124 }
 0x30f   :  { %v1127_v3 = vperm.slane %v1125_v2, 0  ;;  %v1129_v4 = vperm.slane %v1125_v2, 2  ;;  %v1128_v5 = vperm.slane %v1125_v2, 1  ;;  %v1130_v6 = vperm.slane %v1125_v2, 3 }
 0x310   :  { %v1134_v49 = vperm.slane %v1125_v2, 7  ;;  %v1131_v12 = vperm.slane %v1125_v2, 4  ;;  %v1132_v15 = vperm.slane %v1125_v2, 5  ;;  %v1133_v27 = vperm.slane %v1125_v2, 6 }
 0x311   :  { %v1143_v7 = vsub.f32 %v1074_v36, %v1127_v3  ;;  %v1145_v8 = vsub.f32 %v1078_v39, %v1129_v4  ;;  %v1144_v10 = vsub.f32 %v1076_v41, %v1128_v5  ;;  %v1146_v11 = vsub.f32 %v1080_v46, %v1130_v6  ;;  %v1224_v39 = vpop.permute.xlu0 %1223 }
 0x312   :  { %v1150_v17 = vsub.f32 %v1088_v58, %v1134_v49  ;;  %v1147_v19 = vsub.f32 %v1082_v38, %v1131_v12  ;;  %v1148_v23 = vsub.f32 %v1084_v51, %v1132_v15  ;;  %v1149_v30 = vsub.f32 %v1086_v55, %v1133_v27  ;;  %v1493_v27 = vld [vmem:[#allocation22 + $0x1d0] sm:$0xff] }
 0x313   :  { %v1151_v9 = vmul.f32 1.442695, %v1143_v7  ;;  %v1155_v13 = vmul.f32 1.442695, %v1145_v8  ;;  %v1153_v14 = vmul.f32 1.442695, %v1144_v10 }
 0x314   :  { %v1157_v18 = vmul.f32 1.442695, %v1146_v11  ;;  %v1165_v24 = vmul.f32 1.442695, %v1150_v17  ;;  %v1159_v25 = vmul.f32 1.442695, %v1147_v19 }
 0x315   :  { %2110 = vpow2.f32 %v1151_v9  ;;  %v1161_v29 = vmul.f32 1.442695, %v1148_v23  ;;  %v1163_v36 = vmul.f32 1.442695, %v1149_v30  ;;  %v1496_v19 = vld [vmem:[#allocation22 + $0x1e8] sm:$0xff]  ;;  %v1491_v23 = vld [vmem:[#allocation22 + $0x1c0] sm:$0xff] }
 0x316   :  { %2112 = vpow2.f32 %v1155_v13  ;;  %v1210_v45 = vpop.permute.xlu2 %1209  ;;  %1679 = vmatpush.msrb.mxu2 %v1496_v19  ;;  %v1488_v30 = vld [vmem:[#allocation22 + $0x1a8] sm:$0xff]  ;;  %v1453_v19 = vld [vmem:[#allocation22 + $0x90] sm:$0xff] }
 0x317   :  { %2114 = vpow2.f32 %v1153_v14 }
 0x318   :  { %2116 = vpow2.f32 %v1157_v18  ;;  %v1495_v18 = vld [vmem:[#allocation22 + $0x1e0] sm:$0xff] }
 0x319   :  { %2118 = vpow2.f32 %v1165_v24  ;;  %1659 = vmatpush.msrb.mxu1 %v1495_v18  ;;  %v1492_v24 = vld [vmem:[#allocation22 + $0x1c8] sm:$0xff] }
 0x31a   :  { %2120 = vpow2.f32 %v1159_v25  ;;  %1680 = vmatpush.msrb.mxu2 %v1492_v24  ;;  %v1452_v18 = vld [vmem:[#allocation22 + $0x88] sm:$0xff]  ;;  %v1450_v24 = vld [vmem:[#allocation22 + $0x78] sm:$0xff] }
 0x31b   :  { %v2111_v21 = vpop.eup %2110  ;;  %2122 = vpow2.f32 %v1161_v29  ;;  %v1487_v29 = vld [vmem:[#allocation22 + $0x1a0] sm:$0xff]  ;;  %1660 = vmatpush.msrb.mxu1 %v1491_v23  ;;  %v1449_v23 = vld [vmem:[#allocation22 + $0x70] sm:$0xff] }
 0x31c   :  { %v2868_v26 = vmul.f32 %v2111_v21, %v1175_v22  ;;  %v2113_v28 = vpop.eup %2112  ;;  %2124 = vpow2.f32 %v1163_v36  ;;  %v1498_v22 = vld [vmem:[#allocation22 + $0x1f8] sm:$0xff]  ;;  %1681 = vmatpush.msrb.mxu2 %v1488_v30  ;;  %v1440_v30 = vld [vmem:[#allocation22 + $0x28] sm:$0xff] }
 0x31d   :  { %v2115_v16 = vpop.eup %2114  ;;  %v2871_v31 = vmul.f32 %v2113_v28, %v1189_v59  ;;  %1719 = vmatpush.msra.mxu0 %v1498_v22  ;;  %v1494_v28 = vld [vmem:[#allocation22 + $0x1d8] sm:$0xff]  ;;  %1661 = vmatpush.msrb.mxu1 %v1487_v29  ;;  %v1448_v22 = vld [vmem:[#allocation22 + $0x68] sm:$0xff] }
 0x31e   :  { %1250 = vperm.xlu2 %2073, %v2868_v26   ;;  %v2117_v33 = vpop.eup %2116  ;;  %v2873_v34 = vmul.f32 %v2115_v16, %v1182_v20  ;;  %v1497_v20 = vld [vmem:[#allocation22 + $0x1f0] sm:$0xff]  ;;  %v1446_v29 = vld [vmem:[#allocation22 + $0x58] sm:$0xff] }
 0x31f   :  { %1256 = vperm.xlu0 %2075, %v2871_v31   ;;  %v2877_v37 = vmul.f32 %v2117_v33, %v1196_v1  ;;  %v2119_v38 = vpop.eup %2118  ;;  %1699 = vmatpush.msrb.mxu3 %v1497_v20  ;;  %v1489_v33 = vld [vmem:[#allocation22 + $0x1b0] sm:$0xff]  ;;  %v1454_v20 = vld [vmem:[#allocation22 + $0x98] sm:$0xff] }
 0x320   :  { %1253 = vperm.xlu1 %2074, %v2873_v34   ;;  %v2121_v41 = vpop.eup %2120  ;;  %v2880_v42 = vmul.f32 %v2119_v38, %v1224_v39  ;;  %1720 = vmatpush.msra.mxu0 %v1494_v28  ;;  %v1490_v38 = vld [vmem:[#allocation22 + $0x1b8] sm:$0xff]  ;;  %v1445_v28 = vld [vmem:[#allocation22 + $0x50] sm:$0xff] }
 0x321   :  { %v2123_v43 = vpop.eup %2122  ;;  %v2882_v44 = vmul.f32 %v2121_v41, %v1203_v35  ;;  %1700 = vmatpush.msrb.mxu3 %v1493_v27  ;;  %v1444_v27 = vld [vmem:[#allocation22 + $0x48] sm:$0xff] }
 0x322   :  { %v2886_v46 = vmul.f32 %v2123_v43, %v1210_v45  ;;  %v2125_v47 = vpop.eup %2124  ;;  %v1483_v43 = vld [vmem:[#allocation22 + $0x180] sm:$0xff]  ;;  %v1484_v45 = vld [vmem:[#allocation22 + $0x188] sm:$0xff]  ;;  %1721 = vmatpush.msra.mxu0 %v1490_v38 }
 0x323   :  { %v2889_v50 = vmul.f32 %v2125_v47, %v1217_v48  ;;  %1701 = vmatpush.msrb.mxu3 %v1489_v33  ;;  %v1485_v47 = vld [vmem:[#allocation22 + $0x190] sm:$0xff]  ;;  %v1486_v48 = vld [vmem:[#allocation22 + $0x198] sm:$0xff]  ;;  %1662 = vmatpush.msrb.mxu1 %v1483_v43  ;;  %v1436_v38 = vld [vmem:[#allocation22 + $0x8] sm:$0xff] }
 0x324   :  { %1682 = vmatpush.msrb.mxu2 %v1484_v45  ;;  %1722 = vmatpush.msra.mxu0 %v1486_v48  ;;  %v1441_v33 = vld [vmem:[#allocation22 + $0x30] sm:$0xff]  ;;  %v1799_v43 = vld [vmem:[#allocation25 + $0x1e0] sm:$0xff]  ;;  %v1800_v45 = vld [vmem:[#allocation25 + $0x1e8] sm:$0xff] }
 0x325   :  { %1702 = vmatpush.msrb.mxu3 %v1485_v47  ;;  %v1801_v47 = vld [vmem:[#allocation25 + $0x1f0] sm:$0xff]  ;;  %v1802_v48 = vld [vmem:[#allocation25 + $0x1f8] sm:$0xff] }
 0x326   :  { %1259 = vperm.xlu2 %2073, %v2877_v37  }
 0x327   :  { %1271 = vperm.xlu0 %2075, %v2880_v42  }
 0x328   :  { %1262 = vperm.xlu1 %2074, %v2882_v44  }
 0x32e   :  { %1265 = vperm.xlu2 %2073, %v2886_v46  }
 0x330   :  { %1268 = vperm.xlu1 %2074, %v2889_v50  }
 0x378   :  { %v1251_v51 = vpop.permute.xlu2 %1250 }
 0x379   :  { %v1273_v56 = vperm.slane %v1251_v51, %v2850_v40  ;;  %v1479_v51 = vld [vmem:[#allocation22 + $0x160] sm:$0xff] }
 0x37a   :  { %1663 = vmatpush.msrb.mxu1 %v1479_v51  ;;  %v1795_v51 = vld [vmem:[#allocation25 + $0x1c0] sm:$0xff] }
 0x380   :  { %v1260_v53 = vpop.permute.xlu2 %1259 }
 0x381   :  { %v1276_v63 = vperm.slane %v1260_v53, %v2850_v40  ;;  %v1481_v53 = vld [vmem:[#allocation22 + $0x170] sm:$0xff] }
 0x382   :  { %1703 = vmatpush.msrb.mxu3 %v1481_v53  ;;  %v1797_v53 = vld [vmem:[#allocation25 + $0x1d0] sm:$0xff] }
 0x388   :  { %v1266_v32 = vpop.permute.xlu2 %1265 }
 0x389   :  { %v1278_v2 = vperm.slane %v1266_v32, %v2850_v40  ;;  %v1473_v32 = vld [vmem:[#allocation22 + $0x130] sm:$0xff] }
 0x391   :  { %v1257_v55 = vpop.permute.xlu0 %1256 }
 0x392   :  { %v1254_v52 = vpop.permute.xlu1 %1253  ;;  %v1275_v57 = vperm.slane %v1257_v55, %v2850_v40 }
 0x393   :  { %v1274_v54 = vperm.slane %v1254_v52, %v2850_v40  ;;  %v1480_v52 = vld [vmem:[#allocation22 + $0x168] sm:$0xff] }
 0x394   :  { %1683 = vmatpush.msrb.mxu2 %v1480_v52  ;;  %v1796_v52 = vld [vmem:[#allocation25 + $0x1c8] sm:$0xff] }
 0x395   :  { %v1281_v58 = vsel %vm1107_vm12, %v1274_v54, %v1273_v56  ;;  %v1482_v54 = vld [vmem:[#allocation22 + $0x178] sm:$0xff]  ;;  %v1476_v56 = vld [vmem:[#allocation22 + $0x148] sm:$0xff] }
 0x396   :  { %v1282_v61 = vsel %vm1109_vm13, %v1275_v57, %v1281_v58  ;;  %v1477_v57 = vld [vmem:[#allocation22 + $0x150] sm:$0xff]  ;;  %v1478_v58 = vld [vmem:[#allocation22 + $0x158] sm:$0xff]  ;;  %1723 = vmatpush.msra.mxu0 %v1482_v54  ;;  %1684 = vmatpush.msrb.mxu2 %v1476_v56 }
 0x397   :  { %v1283_v59 = vsel %vm1111_vm14, %v1276_v63, %v1282_v61  ;;  %v1472_v61 = vld [vmem:[#allocation22 + $0x128] sm:$0xff]  ;;  %1704 = vmatpush.msrb.mxu3 %v1477_v57  ;;  %v1798_v54 = vld [vmem:[#allocation25 + $0x1d8] sm:$0xff]  ;;  %v1787_v57 = vld [vmem:[#allocation25 + $0x180] sm:$0xff] }
 0x398   :  { %1724 = vmatpush.msra.mxu0 %v1478_v58  ;;  %1685 = vmatpush.msrb.mxu2 %v1472_v61  ;;  %v1794_v56 = vld [vmem:[#allocation25 + $0x1b8] sm:$0xff]  ;;  %v1788_v58 = vld [vmem:[#allocation25 + $0x188] sm:$0xff] }
 0x399   :  { %v1272_v1 = vpop.permute.xlu0 %1271  ;;  %1705 = vmatpush.msrb.mxu3 %v1473_v32  ;;  %v1790_v61 = vld [vmem:[#allocation25 + $0x198] sm:$0xff]  ;;  %v1785_v32 = vld [vmem:[#allocation25 + $0x170] sm:$0xff] }
 0x39a   :  { %v1263_v60 = vpop.permute.xlu1 %1262  ;;  %v1280_v5 = vperm.slane %v1272_v1, %v2850_v40 }
 0x39b   :  { %v1277_v62 = vperm.slane %v1263_v60, %v2850_v40  ;;  %v1471_v60 = vld [vmem:[#allocation22 + $0x120] sm:$0xff] }
 0x39d   :  { %v1284_v0 = vsel %vm1113_vm15, %v1277_v62, %v1283_v59  ;;  %v1474_v59 = vld [vmem:[#allocation22 + $0x138] sm:$0xff] }
 0x39e   :  { %v1285_v6 = vsel %vm1115_vm0, %v1278_v2, %v1284_v0  ;;  %1725 = vmatpush.msra.mxu0 %v1474_v59  ;;  %v1786_v59 = vld [vmem:[#allocation25 + $0x178] sm:$0xff] }
 0x3a2   :  { %v1269_v3 = vpop.permute.xlu1 %1268 }
 0x3a3   :  { %v1279_v4 = vperm.slane %v1269_v3, %v2850_v40  ;;  %v1458_v40 = vld [vmem:[#allocation22 + $0xb8] sm:$0xff] }
 0x3a5   :  { %v1286_v7 = vsel %vm1117_vm1, %v1279_v4, %v1285_v6  ;;  %v1467_v6 = vld [vmem:[#allocation22 + $0x100] sm:$0xff] }
 0x3a6   :  { %v1287_v8 = vsel %vm1119_vm2, %v1280_v5, %v1286_v7  ;;  %v1468_v7 = vld [vmem:[#allocation22 + $0x108] sm:$0xff] }
 0x3a7   :  { %v1289_v9 = vsel %vm1122_vm3, %v1287_v8, 0.0  ;;  %1686 = vmatpush.msrb.mxu2 %v1468_v7  ;;  %v1469_v8 = vld [vmem:[#allocation22 + $0x110] sm:$0xff]  ;;  %v1778_v7 = vld [vmem:[#allocation25 + $0x138] sm:$0xff] }
 0x3a8   :  { %1290 = vadd.xlane.f32.xlu2 %v1289_v9  ;;  %1706 = vmatpush.msrb.mxu3 %v1469_v8  ;;  %v1464_v9 = vld [vmem:[#allocation22 + $0xe8] sm:$0xff] }
 0x3a9   :  { %1687 = vmatpush.msrb.mxu2 %v1464_v9  ;;  %v1772_v9 = vld [vmem:[#allocation25 + $0x108] sm:$0xff] }
 0x41b   :  { %v1291_v10 = vpop.xlane.xlu2 %1290 }
 0x41c   :  { %2126 = vrcp.f32 %v1291_v10  ;;  %v1303_v13 = vand.u32 2147483648, %v1291_v10  ;;  %vm1297_vm5 = vweird.f32 %v1291_v10  ;;  %v1301_v15 = vand.u32 2147483647, %v1291_v10 }
 0x41e   :  { %v1304_v21 = vor.u32 1.1754944e-38, %v1303_v13  ;;  %vm1302_vm7 = vcmp.eq.f32.partialorder %v1301_v15, 8.507059e+37  ;;  %v1455_v13 = vld [vmem:[#allocation22 + $0xa0] sm:$0xff]  ;;  %v1457_v15 = vld [vmem:[#allocation22 + $0xb0] sm:$0xff] }
 0x422   :  { %v2127_v49 = vpop.eup %2126 }
 0x423   :  { %v1293_v11 = vmul.f32 %v2127_v49, %v1291_v10  ;;  %vm1298_vm4 = vweird.f32 %v2127_v49  ;;  %v1465_v10 = vld [vmem:[#allocation22 + $0xf0] sm:$0xff] }
 0x424   :  { %vm2908_vm6 = vmor %vm1297_vm5, %vm1298_vm4  ;;  %1707 = vmatpush.msrb.mxu3 %v1465_v10  ;;  %v1773_v10 = vld [vmem:[#allocation25 + $0x110] sm:$0xff] }
 0x425   :  { %v1294_v12 = vsub.f32 1.0, %v1293_v11  ;;  %v1461_v11 = vld [vmem:[#allocation22 + $0xd0] sm:$0xff] }
 0x426   :  { %1708 = vmatpush.msrb.mxu3 %v1461_v11  ;;  %v1767_v11 = vld [vmem:[#allocation25 + $0xe0] sm:$0xff] }
 0x427   :  { %v1295_v14 = vmul.f32 %v2127_v49, %v1294_v12  ;;  %v1462_v12 = vld [vmem:[#allocation22 + $0xd8] sm:$0xff] }
 0x428   :  { %1709 = vmatpush.msrb.mxu3 %v1457_v15  ;;  %v1763_v15 = vld [vmem:[#allocation25 + $0xc0] sm:$0xff] }
 0x429   :  { %v1296_v17 = vadd.f32 %v2127_v49, %v1295_v14  ;;  %v1456_v14 = vld [vmem:[#allocation22 + $0xa8] sm:$0xff] }
 0x42a   :  { %1710 = vmatpush.msrb.mxu3 %v1453_v19  ;;  %v1759_v19 = vld [vmem:[#allocation25 + $0xa0] sm:$0xff] }
 0x42b   :  { %v1300_v25 = vsel %vm2908_vm6, %v2127_v49, %v1296_v17  ;;  %v1466_v49 = vld [vmem:[#allocation22 + $0xf8] sm:$0xff]  ;;  %v1451_v17 = vld [vmem:[#allocation22 + $0x80] sm:$0xff] }
 0x42c   :  { %v2914_v16 = vsel %vm1302_vm7, %v1304_v21, %v1300_v25  ;;  %v1447_v21 = vld [vmem:[#allocation22 + $0x60] sm:$0xff]  ;;  %1711 = vmatpush.msrb.mxu3 %v1449_v23  ;;  %v1333_v23 = vld [vmem:[#allocation9 + $0x10] sm:$0xff] }
 0x42d   :  { %v1308_v35 = vperm.slane %v2914_v16, 1  ;;  %v1307_v36 = vperm.slane %v2914_v16, 0  ;;  %v1310_v55 = vperm.slane %v2914_v16, 3  ;;  %v1312_v0 = vperm.slane %v2914_v16, 5  ;;  %v1443_v25 = vld [vmem:[#allocation22 + $0x40] sm:$0xff] }
 0x42e   :  { %v1311_v1 = vperm.slane %v2914_v16, 4  ;;  %v1313_v3 = vperm.slane %v2914_v16, 6  ;;  %1712 = vmatpush.msrb.mxu3 %v1445_v28 }
 0x42f   :  { %v1324_v39 = vmul.f32 %v1308_v35, %v2873_v34  ;;  %v1323_v41 = vmul.f32 %v1307_v36, %v2868_v26  ;;  %v1309_v34 = vperm.slane %v2914_v16, 2  ;;  %v1475_v26 = vld [vmem:[#allocation22 + $0x140] sm:$0xff]  ;;  %v1326_v62 = vmul.f32 %v1310_v55, %v2877_v37  ;;  %v1442_v35 = vld [vmem:[#allocation22 + $0x38] sm:$0xff] }
 0x430   :  { %1664 = vmatpush.msrb.mxu1 %v1475_v26  ;;  %v1328_v2 = vmul.f32 %v1312_v0, %v2886_v46  ;;  %v1327_v37 = vmul.f32 %v1311_v1, %v2882_v44  ;;  %v1329_v5 = vmul.f32 %v1313_v3, %v2889_v50  ;;  %v1470_v46 = vld [vmem:[#allocation22 + $0x118] sm:$0xff]  ;;  %v1463_v44 = vld [vmem:[#allocation22 + $0xe0] sm:$0xff]  ;;  %v1460_v50 = vld [vmem:[#allocation22 + $0xc8] sm:$0xff]  ;;  %1713 = vmatpush.msrb.mxu3 %v1441_v33 }
 0x431   :  { %1346 = vperm.xlu0 %2075, %v1324_v39   ;;  %1341 = vperm.xlu1 %2074, %v1323_v41   ;;  %v1325_v63 = vmul.f32 %v1309_v34, %v2871_v31  ;;  %v1314_v31 = vperm.slane %v2914_v16, 7  ;;  %v1439_v16 = vld [vmem:[#allocation22 + $0x20] sm:$0xff]  ;;  %v1437_v39 = vld [vmem:[#allocation22 + $0x10] sm:$0xff]  ;;  %v1438_v41 = vld [vmem:[#allocation22 + $0x18] sm:$0xff] }
 0x432   :  { %1665 = vmatpush.msrb.mxu1 %v1471_v60  ;;  %1726 = vmatpush.msra.mxu0 %v1470_v46  ;;  %v1435_v36 = vld [vmem:[#allocation22] sm:$0xff]  ;;  %v1792_v34 = vld [vmem:[#allocation25 + $0x1a8] sm:$0xff]  ;;  %v1793_v26 = vld [vmem:[#allocation25 + $0x1b0] sm:$0xff] }
 0x433   :  { %v1330_v4 = vmul.f32 %v1314_v31, %v2880_v42  ;;  %v1459_v42 = vld [vmem:[#allocation22 + $0xc0] sm:$0xff]  ;;  %1688 = vmatpush.msrb.mxu2 %v1460_v50  ;;  %1714 = vmatpush.msrb.mxu3 %v1437_v39  ;;  %v1789_v60 = vld [vmem:[#allocation25 + $0x190] sm:$0xff]  ;;  %v1780_v1 = vld [vmem:[#allocation25 + $0x148] sm:$0xff] }
 0x434   :  { %1666 = vmatpush.msrb.mxu1 %v1467_v6  ;;  %1727 = vmatpush.msra.mxu0 %v1466_v49  ;;  %v1791_v55 = vld [vmem:[#allocation25 + $0x1a0] sm:$0xff]  ;;  %v1776_v3 = vld [vmem:[#allocation25 + $0x128] sm:$0xff]  ;;  %v1331_v6 = vld [vmem:[#allocation9] sm:$0xff] }
 0x435   :  { %1689 = vmatpush.msrb.mxu2 %v1456_v14  ;;  %1843 = vmatpush.msra.mxu3 %v1801_v47  ;;  %v1779_v0 = vld [vmem:[#allocation25 + $0x140] sm:$0xff]  ;;  %v1774_v49 = vld [vmem:[#allocation25 + $0x118] sm:$0xff] }
 0x436   :  { %1667 = vmatpush.msrb.mxu1 %v1463_v44  ;;  %1728 = vmatpush.msra.mxu0 %v1462_v12  ;;  %v1775_v31 = vld [vmem:[#allocation25 + $0x120] sm:$0xff]  ;;  %v1768_v12 = vld [vmem:[#allocation25 + $0xe8] sm:$0xff]  ;;  %v1770_v14 = vld [vmem:[#allocation25 + $0xf8] sm:$0xff] }
 0x437   :  { %1690 = vmatpush.msrb.mxu2 %v1452_v18  ;;  %1844 = vmatpush.msra.mxu3 %v1797_v53  ;;  %v1771_v44 = vld [vmem:[#allocation25 + $0x100] sm:$0xff]  ;;  %v1766_v18 = vld [vmem:[#allocation25 + $0xd8] sm:$0xff] }
 0x438   :  { %1668 = vmatpush.msrb.mxu1 %v1459_v42  ;;  %1729 = vmatpush.msra.mxu0 %v1458_v40  ;;  %v1764_v40 = vld [vmem:[#allocation25 + $0xc8] sm:$0xff]  ;;  %v1747_v53 = vld [vmem:[#allocation25 + $0x40] sm:$0xff] }
 0x439   :  { %1356 = vperm.xlu0 %2075, %v1326_v62   ;;  %1351 = vperm.xlu1 %2074, %v1325_v63   ;;  %v1783_v62 = vld [vmem:[#allocation25 + $0x160] sm:$0xff]  ;;  %v1784_v63 = vld [vmem:[#allocation25 + $0x168] sm:$0xff] }
 0x43a   :  { %1669 = vmatpush.msrb.mxu1 %v1455_v13  ;;  %1730 = vmatpush.msra.mxu0 %v1454_v20  ;;  %v1769_v13 = vld [vmem:[#allocation25 + $0xf0] sm:$0xff] }
 0x43b   :  { %1691 = vmatpush.msrb.mxu2 %v1448_v22  ;;  %1845 = vmatpush.msra.mxu3 %v1793_v26  ;;  %v1334_v22 = vld [vmem:[#allocation9 + $0x18] sm:$0xff] }
 0x43c   :  { %1670 = vmatpush.msrb.mxu1 %v1451_v17  ;;  %1731 = vmatpush.msra.mxu0 %v1450_v24  ;;  %v1765_v17 = vld [vmem:[#allocation25 + $0xd0] sm:$0xff]  ;;  %v1760_v24 = vld [vmem:[#allocation25 + $0xa8] sm:$0xff] }
 0x43d   :  { %1692 = vmatpush.msrb.mxu2 %v1444_v27  ;;  %1846 = vmatpush.msra.mxu3 %v1789_v60  ;;  %v1762_v27 = vld [vmem:[#allocation25 + $0xb8] sm:$0xff] }
 0x43e   :  { %1671 = vmatpush.msrb.mxu1 %v1447_v21  ;;  %1732 = vmatpush.msra.mxu0 %v1446_v29  ;;  %v1335_v60 = vld [vmem:[#allocation9 + $0x20] sm:$0xff] }
 0x43f   :  { %1693 = vmatpush.msrb.mxu2 %v1440_v30  ;;  %1847 = vmatpush.msra.mxu3 %v1785_v32  ;;  %v1756_v30 = vld [vmem:[#allocation25 + $0x88] sm:$0xff] }
 0x440   :  { %1672 = vmatpush.msrb.mxu1 %v1443_v25  ;;  %1733 = vmatpush.msra.mxu0 %v1442_v35  ;;  %v1761_v25 = vld [vmem:[#allocation25 + $0xb0] sm:$0xff]  ;;  %v1744_v32 = vld [vmem:[#allocation25 + $0x28] sm:$0xff] }
 0x441   :  { %1366 = vperm.xlu0 %2075, %v1328_v2   ;;  %1361 = vperm.xlu1 %2074, %v1327_v37   ;;  %v1781_v2 = vld [vmem:[#allocation25 + $0x150] sm:$0xff]  ;;  %v1782_v37 = vld [vmem:[#allocation25 + $0x158] sm:$0xff] }
 0x442   :  { %1673 = vmatpush.msrb.mxu1 %v1439_v16  ;;  %1694 = vmatpush.msrb.mxu2 %v1436_v38  ;;  %v1755_v16 = vld [vmem:[#allocation25 + $0x80] sm:$0xff]  ;;  %v1758_v38 = vld [vmem:[#allocation25 + $0x98] sm:$0xff] }
 0x443   :  { %1734 = vmatpush.msra.mxu0 %v1438_v41  ;;  %1848 = vmatpush.msra.mxu3 %v1781_v2  ;;  %v1746_v2 = vld [vmem:[#allocation25 + $0x38] sm:$0xff] }
 0x444   :  { %1674 = vmatpush.msrb.mxu1 %v1435_v36  ;;  %1823 = vmatpush.msra.mxu2 %v1800_v45  ;;  %v1757_v36 = vld [vmem:[#allocation25 + $0x90] sm:$0xff] }
 0x445   :  { %1863 = vmatpush.msrb.mxu0 %v1802_v48  ;;  %v1752_v48 = vld [vmem:[#allocation25 + $0x68] sm:$0xff] }
 0x446   :  { %1803 = vmatpush.msra.mxu1 %v1799_v43  ;;  %1824 = vmatpush.msra.mxu2 %v1796_v52  ;;  %v1751_v43 = vld [vmem:[#allocation25 + $0x60] sm:$0xff]  ;;  %v1754_v52 = vld [vmem:[#allocation25 + $0x78] sm:$0xff] }
 0x447   :  { %1864 = vmatpush.msrb.mxu0 %v1798_v54 }
 0x448   :  { %1804 = vmatpush.msra.mxu1 %v1795_v51  ;;  %1825 = vmatpush.msra.mxu2 %v1792_v34  ;;  %v1753_v51 = vld [vmem:[#allocation25 + $0x70] sm:$0xff] }
 0x449   :  { %1376 = vperm.xlu0 %2075, %v1330_v4   ;;  %1371 = vperm.xlu1 %2074, %v1329_v5   ;;  %v1777_v4 = vld [vmem:[#allocation25 + $0x130] sm:$0xff]  ;;  %v1332_v5 = vld [vmem:[#allocation9 + $0x8] sm:$0xff] }
 0x44a   :  { %1805 = vmatpush.msra.mxu1 %v1791_v55  ;;  %1865 = vmatpush.msrb.mxu0 %v1794_v56  ;;  %v1748_v55 = vld [vmem:[#allocation25 + $0x48] sm:$0xff]  ;;  %v1749_v34 = vld [vmem:[#allocation25 + $0x50] sm:$0xff] }
 0x44b   :  { %1826 = vmatpush.msra.mxu2 %v1788_v58  ;;  %1849 = vmatpush.msra.mxu3 %v1777_v4  ;;  %v1336_v58 = vld [vmem:[#allocation9 + $0x28] sm:$0xff]  ;;  %v1740_v4 = vld [vmem:[#allocation25 + $0x8] sm:$0xff] }
 0x44c   :  { %1806 = vmatpush.msra.mxu1 %v1787_v57  ;;  %1866 = vmatpush.msrb.mxu0 %v1790_v61  ;;  %v1750_v61 = vld [vmem:[#allocation25 + $0x58] sm:$0xff] }
 0x44d   :  { %1827 = vmatpush.msra.mxu2 %v1784_v63  ;;  %1850 = vmatpush.msra.mxu3 %v1773_v10  ;;  %v1743_v63 = vld [vmem:[#allocation25 + $0x20] sm:$0xff]  ;;  %v1742_v10 = vld [vmem:[#allocation25 + $0x18] sm:$0xff] }
 0x44e   :  { %1807 = vmatpush.msra.mxu1 %v1783_v62  ;;  %1867 = vmatpush.msrb.mxu0 %v1786_v59 }
 0x44f   :  { %1828 = vmatpush.msra.mxu2 %v1780_v1  ;;  %1851 = vmatpush.msra.mxu3 %v1769_v13  ;;  %v1745_v1 = vld [vmem:[#allocation25 + $0x30] sm:$0xff] }
 0x450   :  { %1808 = vmatpush.msra.mxu1 %v1779_v0  ;;  %1868 = vmatpush.msrb.mxu0 %v1782_v37  ;;  %v1338_v13 = vld [vmem:[#allocation9 + $0x38] sm:$0xff] }
 0x451   :  { %1829 = vmatpush.msra.mxu2 %v1776_v3  ;;  %1852 = vmatpush.msra.mxu3 %v1765_v17  ;;  %v1739_v3 = vld [vmem:[#allocation25] sm:$0xff] }
 0x452   :  { %1809 = vmatpush.msra.mxu1 %v1775_v31  ;;  %1869 = vmatpush.msrb.mxu0 %v1778_v7 }
 0x453   :  { %1830 = vmatpush.msra.mxu2 %v1772_v9  ;;  %1853 = vmatpush.msra.mxu3 %v1761_v25 }
 0x454   :  { %1810 = vmatpush.msra.mxu1 %v1771_v44  ;;  %1870 = vmatpush.msrb.mxu0 %v1774_v49 }
 0x455   :  { %1831 = vmatpush.msra.mxu2 %v1768_v12  ;;  %1854 = vmatpush.msra.mxu3 %v1757_v36 }
 0x456   :  { %1811 = vmatpush.msra.mxu1 %v1767_v11  ;;  %1871 = vmatpush.msrb.mxu0 %v1770_v14  ;;  %v1337_v14 = vld [vmem:[#allocation9 + $0x30] sm:$0xff] }
 0x457   :  { %1832 = vmatpush.msra.mxu2 %v1764_v40  ;;  %1855 = vmatpush.msra.mxu3 %v1753_v51 }
 0x458   :  { %1812 = vmatpush.msra.mxu1 %v1763_v15  ;;  %1872 = vmatpush.msrb.mxu0 %v1766_v18 }
 0x459   :  { %1833 = vmatpush.msra.mxu2 %v1760_v24  ;;  %1856 = vmatpush.msra.mxu3 %v1749_v34 }
 0x45a   :  { %1813 = vmatpush.msra.mxu1 %v1759_v19  ;;  %1873 = vmatpush.msrb.mxu0 %v1762_v27 }
 0x45b   :  { %1834 = vmatpush.msra.mxu2 %v1756_v30  ;;  %1857 = vmatpush.msra.mxu3 %v1745_v1  ;;  %v1887_v1 = vld [vmem:[%s2972_s15] sm:$0xf]  ;;  %s2617_s15 = smov [#allocation29]  }
 0x45c   :  { %1814 = vmatpush.msra.mxu1 %v1755_v16  ;;  %1874 = vmatpush.msrb.mxu0 %v1758_v38  ;;  %s1997_s21 = sshll.u32 %s2617_s15, 4  ;;  %s1998_s21 = int_to_ptr.vmem [resolvable:$true] %s1997_s21 }
 0x45d   :  { %1835 = vmatpush.msra.mxu2 %v1752_v48 }
 0x45e   :  { %1815 = vmatpush.msra.mxu1 %v1751_v43  ;;  %1875 = vmatpush.msrb.mxu0 %v1754_v52 }
 0x45f   :  { %1836 = vmatpush.msra.mxu2 %v1748_v55 }
 0x460   :  { %1816 = vmatpush.msra.mxu1 %v1747_v53  ;;  %1876 = vmatpush.msrb.mxu0 %v1750_v61  ;;  %v2144_v61 = vld [vmem:[#allocation13 + $0x8] sm:$0xff] }
 0x461   :  { %1837 = vmatpush.msra.mxu2 %v1744_v32  ;;  %v1600_v32 = vpop.f32.mrf.mxu2 }
 0x462   :  { %1817 = vmatpush.msra.mxu1 %v1743_v63  ;;  %1877 = vmatpush.msrb.mxu0 %v1746_v2  ;;  %v1640_v63 = vpop.f32.mrf.mxu0 }
 0x463   :  { %1838 = vmatpush.msra.mxu2 %v1740_v4 }
 0x464   :  { %1818 = vmatpush.msra.mxu1 %v1739_v3  ;;  %1878 = vmatpush.msrb.mxu0 %v1742_v10 }
 0x4a3   :  { %v1347_v8 = vpop.permute.xlu0 %1346  ;;  %v1342_v46 = vpop.permute.xlu1 %1341 }
 0x4a4   :  { %v1380_v42 = vmul.f32 %v1347_v8, %v1332_v5  ;;  %v1379_v50 = vmul.f32 %v1342_v46, %v1331_v6  ;;  %v1741_v8 = vld [vmem:[#allocation25 + $0x10] sm:$0xff] }
 0x4a5   :  { %1858 = vmatpush.msra.mxu3 %v1741_v8 }
 0x4a6   :  { %v1393_v20 = vrot.slane %v1380_v42, 4  ;;  %v1387_v21 = vrot.slane %v1379_v50, 4 }
 0x4a8   :  { %v1394_v39 = vadd.f32 %v1393_v20, %v1380_v42  ;;  %v1388_v41 = vadd.f32 %v1387_v21, %v1379_v50 }
 0x4aa   :  { %v1395_v26 = vrot.slane %v1394_v39, 2  ;;  %v1389_v56 = vrot.slane %v1388_v41, 2 }
 0x4ab   :  { %v1357_v28 = vpop.permute.xlu0 %1356  ;;  %v1352_v29 = vpop.permute.xlu1 %1351 }
 0x4ac   :  { %v1382_v33 = vmul.f32 %v1357_v28, %v1334_v22  ;;  %v1381_v35 = vmul.f32 %v1352_v29, %v1333_v23  ;;  %v1396_v5 = vadd.f32 %v1395_v26, %v1394_v39  ;;  %v1390_v6 = vadd.f32 %v1389_v56, %v1388_v41 }
 0x4ae   :  { %v1405_v45 = vrot.slane %v1382_v33, 4  ;;  %v1399_v47 = vrot.slane %v1381_v35, 4  ;;  %v1397_v50 = vrot.slane %v1396_v5, 1  ;;  %v1391_v11 = vrot.slane %v1390_v6, 1 }
 0x4b0   :  { %v1400_v54 = vadd.f32 %v1399_v47, %v1381_v35  ;;  %v1406_v57 = vadd.f32 %v1405_v45, %v1382_v33  ;;  %v1398_v23 = vadd.f32 %v1397_v50, %v1396_v5  ;;  %v1392_v24 = vadd.f32 %v1391_v11, %v1390_v6 }
 0x4b1   :  { %v1892_v5 = vperm.slane %v1887_v1, 3 }
 0x4b2   :  { %v1401_v62 = vrot.slane %v1400_v54, 2  ;;  %v1407_v7 = vrot.slane %v1406_v57, 2  ;;  %v1651_v36 = vsel %vm1107_vm12, %v1398_v23, %v1392_v24 }
 0x4b3   :  { %v1367_v59 = vpop.permute.xlu0 %1366  ;;  %v1362_v0 = vpop.permute.xlu1 %1361 }
 0x4b4   :  { %v1384_v37 = vmul.f32 %v1367_v59, %v1336_v58  ;;  %v1383_v31 = vmul.f32 %v1362_v0, %v1335_v60  ;;  %v1402_v46 = vadd.f32 %v1401_v62, %v1400_v54  ;;  %v1408_v12 = vadd.f32 %v1407_v7, %v1406_v57  ;;  %v1580_v62 = vpop.f32.mrf.mxu1 }
 0x4b6   :  { %v1417_v44 = vrot.slane %v1384_v37, 4  ;;  %v1411_v9 = vrot.slane %v1383_v31, 4  ;;  %v1403_v15 = vrot.slane %v1402_v46, 1  ;;  %v1409_v25 = vrot.slane %v1408_v12, 1 }
 0x4b8   :  { %v1418_v49 = vadd.f32 %v1417_v44, %v1384_v37  ;;  %v1412_v42 = vadd.f32 %v1411_v9, %v1383_v31  ;;  %v1404_v28 = vadd.f32 %v1403_v15, %v1402_v46  ;;  %v1410_v38 = vadd.f32 %v1409_v25, %v1408_v12  ;;  %v1620_v46 = vpop.f32.mrf.mxu3 }
 0x4b9   :  { %v1889_v31 = vperm.slane %v1887_v1, 0 }
 0x4ba   :  { %v1419_v40 = vrot.slane %v1418_v49, 2  ;;  %v1413_v17 = vrot.slane %v1412_v42, 2  ;;  %v1652_v41 = vsel %vm1109_vm13, %v1404_v28, %v1651_v36  ;;  %v1891_v28 = vperm.slane %v1887_v1, 2 }
 0x4bb   :  { %v1377_v18 = vpop.permute.xlu0 %1376  ;;  %v1372_v19 = vpop.permute.xlu1 %1371  ;;  %v1653_v53 = vsel %vm1111_vm14, %v1410_v38, %v1652_v41 }
 0x4bc   :  { %v1414_v20 = vadd.f32 %v1413_v17, %v1412_v42  ;;  %v1386_v21 = vmul.f32 %v1377_v18, %v1338_v13  ;;  %v1385_v22 = vmul.f32 %v1372_v19, %v1337_v14  ;;  %v1420_v27 = vadd.f32 %v1419_v40, %v1418_v49 }
 0x4bd   :  { %v1890_v42 = vperm.slane %v1887_v1, 1 }
 0x4be   :  { %v1415_v29 = vrot.slane %v1414_v20, 1  ;;  %v1429_v16 = vrot.slane %v1386_v21, 4  ;;  %v1423_v30 = vrot.slane %v1385_v22, 4  ;;  %v1421_v39 = vrot.slane %v1420_v27, 1 }
 0x4c0   :  { %v1430_v33 = vadd.f32 %v1429_v16, %v1386_v21  ;;  %v1424_v35 = vadd.f32 %v1423_v30, %v1385_v22  ;;  %v1416_v43 = vadd.f32 %v1415_v29, %v1414_v20  ;;  %v1422_v52 = vadd.f32 %v1421_v39, %v1420_v27 }
 0x4c2   :  { %v1431_v45 = vrot.slane %v1430_v33, 2  ;;  %v1425_v47 = vrot.slane %v1424_v35, 2  ;;  %v1654_v34 = vsel %vm1113_vm15, %v1416_v43, %v1653_v53 }
 0x4c3   :  { %v1655_v57 = vsel %vm1115_vm0, %v1422_v52, %v1654_v34 }
 0x4c4   :  { %v1432_v48 = vadd.f32 %v1431_v45, %v1430_v33  ;;  %v1426_v51 = vadd.f32 %v1425_v47, %v1424_v35 }
 0x4c6   :  { %v1433_v54 = vrot.slane %v1432_v48, 1  ;;  %v1427_v55 = vrot.slane %v1426_v51, 1 }
 0x4c8   :  { %v1434_v26 = vadd.f32 %v1433_v54, %v1432_v48  ;;  %v1428_v56 = vadd.f32 %v1427_v55, %v1426_v51 }
 0x4ca   :  { %v1656_v58 = vsel %vm1117_vm1, %v1428_v56, %v1655_v57 }
 0x4cb   :  { %v1657_v60 = vsel %vm1119_vm2, %v1434_v26, %v1656_v58  ;;  %v303_v26 = vld [vmem:[#allocation15 + $0x8] sm:$0xff] }
 0x4cc   :  { %1675 = vmatmul.f32.vlgmr.msrb.gmra.mxu1 %v1657_v60  ;;  %1695 = vmatmul.f32.vlgmr.msrb.gmra.mxu2 %v1657_v60 }
 0x4cd   :  { %1715 = vmatmul.f32.vlgmr.msrb.gmra.mxu3 %v1657_v60  ;;  %1735 = vmatmul.f32.vlgmr.msra.gmra.mxu0 %v1657_v60 }
 0x4d4   :  { %1819 = vmatmul.f32.vlgmr.msra.gmra.mxu1 %v2144_v61  ;;  %1839 = vmatmul.f32.vlgmr.msra.gmra.mxu2 %v2144_v61 }
 0x4d5   :  { %1859 = vmatmul.f32.vlgmr.msra.gmra.mxu3 %v2144_v61  ;;  %1879 = vmatmul.f32.vlgmr.msrb.gmra.mxu0 %v2144_v61 }
 0x549   :  { %v1676_v59 = vpop.f32.mrf.mxu1 }
 0x54a   :  { %v1736_v0 = vpop.f32.mrf.mxu0  ;;  %v1677_v37 = vadd.f32 %v1676_v59, %v1580_v62 }
 0x54b   :  { %v1737_v3 = vadd.f32 %v1736_v0, %v1640_v63 }
 0x54f   :  { %v1696_v2 = vpop.f32.mrf.mxu2 }
 0x550   :  { %v1697_v10 = vadd.f32 %v1696_v2, %v1600_v32  ;;  %v1716_v14 = vpop.f32.mrf.mxu3 }
 0x551   :  { %v1820_v4 = vpop.f32.mrf.mxu1  ;;  %v1717_v24 = vadd.f32 %v1716_v14, %v1620_v46 }
 0x552   :  { %v1883_v6 = vadd.f32 %v1820_v4, %v1677_v37  ;;  %v1880_v7 = vpop.f32.mrf.mxu0 }
 0x553   :  { %v1886_v8 = vadd.f32 %v1880_v7, %v1737_v3 }
 0x554   :  { %v1897_v44 = vadd.f32 %v1889_v31, %v1883_v6 }
 0x555   :  { %v1900_v9 = vadd.f32 %v1892_v5, %v1886_v8 }
 0x556   :  { %v2044_v49 = vmul.f32 -1.442695, %v1897_v44 }
 0x557   :  { %v2046_v50 = vmul.f32 -1.442695, %v1900_v9  ;;  %v1840_v11 = vpop.f32.mrf.mxu2 }
 0x558   :  { %2128 = vpow2.f32 %v2044_v49  ;;  %v1884_v12 = vadd.f32 %v1840_v11, %v1697_v10  ;;  %v1860_v22 = vpop.f32.mrf.mxu3 }
 0x559   :  { %2130 = vpow2.f32 %v2046_v50  ;;  %v1885_v27 = vadd.f32 %v1860_v22, %v1717_v24 }
 0x55a   :  { %v1898_v13 = vadd.f32 %v1890_v42, %v1884_v12 }
 0x55b   :  { %v1899_v35 = vadd.f32 %v1891_v28, %v1885_v27 }
 0x55c   :  { %v2045_v15 = vmul.f32 -1.442695, %v1898_v13 }
 0x55e   :  { %v2129_v40 = vpop.eup %2128  ;;  %2132 = vpow2.f32 %v2045_v15 }
 0x55f   :  { %v2131_v17 = vpop.eup %2130  ;;  %v1906_v18 = vadd.f32 1.0, %v2129_v40 }
 0x560   :  { %v1945_v19 = vadd.f32 1.0, %v2131_v17 }
 0x561   :  { %2134 = vrcp.f32 %v1906_v18  ;;  %v1918_v41 = vand.u32 2147483648, %v1906_v18  ;;  %vm1912_vm9 = vweird.f32 %v1906_v18  ;;  %v1916_v45 = vand.u32 2147483647, %v1906_v18 }
 0x562   :  { %2136 = vrcp.f32 %v1945_v19  ;;  %v1957_v0 = vand.u32 2147483648, %v1945_v19  ;;  %vm1951_vm1 = vweird.f32 %v1945_v19  ;;  %v1955_v1 = vand.u32 2147483647, %v1945_v19 }
 0x563   :  { %v1919_v54 = vor.u32 1.1754944e-38, %v1918_v41  ;;  %vm1917_vm13 = vcmp.eq.f32.partialorder %v1916_v45, 8.507059e+37 }
 0x564   :  { %v2133_v20 = vpop.eup %2132  ;;  %v1958_v37 = vor.u32 1.1754944e-38, %v1957_v0  ;;  %vm1956_vm3 = vcmp.eq.f32.partialorder %v1955_v1, 8.507059e+37 }
 0x565   :  { %v1925_v21 = vadd.f32 1.0, %v2133_v20 }
 0x567   :  { %v2135_v23 = vpop.eup %2134  ;;  %2138 = vrcp.f32 %v1925_v21  ;;  %v1937_v47 = vand.u32 2147483648, %v1925_v21  ;;  %v1935_v52 = vand.u32 2147483647, %v1925_v21  ;;  %vm1931_vm12 = vweird.f32 %v1925_v21 }
 0x568   :  { %v1908_v25 = vmul.f32 %v2135_v23, %v1906_v18  ;;  %v2137_v16 = vpop.eup %2136  ;;  %vm1913_vm8 = vweird.f32 %v2135_v23  ;;  %2140 = vtanh.f32 %v1899_v35 }
 0x569   :  { %v1947_v39 = vmul.f32 %v2137_v16, %v1945_v19  ;;  %vm1914_vm10 = vmor %vm1912_vm9, %vm1913_vm8  ;;  %v1938_v34 = vor.u32 1.1754944e-38, %v1937_v47  ;;  %vm1936_vm15 = vcmp.eq.f32.partialorder %v1935_v52, 8.507059e+37  ;;  %vm1952_vm0 = vweird.f32 %v2137_v16 }
 0x56a   :  { %v1909_v29 = vsub.f32 1.0, %v1908_v25  ;;  %vm1953_vm2 = vmor %vm1951_vm1, %vm1952_vm0 }
 0x56b   :  { %v1948_v53 = vsub.f32 1.0, %v1947_v39 }
 0x56c   :  { %v1910_v30 = vmul.f32 %v2135_v23, %v1909_v29 }
 0x56d   :  { %v2139_v33 = vpop.eup %2138  ;;  %v1949_v61 = vmul.f32 %v2137_v16, %v1948_v53 }
 0x56e   :  { %v1927_v36 = vmul.f32 %v2139_v33, %v1925_v21  ;;  %v1911_v38 = vadd.f32 %v2135_v23, %v1910_v30  ;;  %vm1932_vm11 = vweird.f32 %v2139_v33  ;;  %v2141_v58 = vpop.eup %2140 }
 0x56f   :  { %vm1933_vm14 = vmor %vm1931_vm12, %vm1932_vm11  ;;  %v1950_v59 = vadd.f32 %v2137_v16, %v1949_v61 }
 0x570   :  { %v1928_v43 = vsub.f32 1.0, %v1927_v36  ;;  %v1915_v51 = vsel %vm1914_vm10, %v2135_v23, %v1911_v38 }
 0x571   :  { %v1920_v56 = vsel %vm1917_vm13, %v1919_v54, %v1915_v51  ;;  %v1954_v2 = vsel %vm1953_vm2, %v2137_v16, %v1950_v59 }
 0x572   :  { %v1929_v48 = vmul.f32 %v2139_v33, %v1928_v43  ;;  %v1962_v63 = vmul.f32 %v2141_v58, %v1920_v56  ;;  %v1959_v3 = vsel %vm1956_vm3, %v1958_v37, %v1954_v2 }
 0x574   :  { %v1930_v55 = vadd.f32 %v2139_v33, %v1929_v48 }
 0x576   :  { %v1934_v57 = vsel %vm1933_vm14, %v2139_v33, %v1930_v55 }
 0x577   :  { %v1939_v60 = vsel %vm1936_vm15, %v1938_v34, %v1934_v57 }
 0x578   :  { %v1961_v62 = vmul.f32 %v1939_v60, %v303_v26 }
 0x57a   :  { %v1963_v32 = vadd.f32 %v1962_v63, %v1961_v62 }
 0x57c   :  { %2142 = vtanh.f32 %v1963_v32  ;;  %1981 = vst [vmem:[#allocation31 + $0x8] sm:$0xff] %v1963_v32 }
 0x582   :  { %v2143_v31 = vpop.eup %2142 }
 0x583   :  { %v1965_v4 = vmul.f32 %v2143_v31, %v1959_v3 }
 0x585   :  { %1977 = vst [vmem:[#allocation29 + $0x8] sm:$0xff] %v1965_v4 }
 0x586   :  { %2005 = dma.vmem_to_hbm [thread:$0]  %s1998_s21, 256, %s2000_s0, [#allocation30], %s2599_s2, %s2599_s2, %s2600_s25   ;;  %1970 = vst [vmem:[#allocation28] sm:$0xff] %v1965_v4 }
 0x587   :  { %1992 = dma.vmem_to_hbm [thread:$0]  %s1988_s6, 128, %s1990_s12, [#allocation6]  }
 0x588   :  { %2018 = dma.vmem_to_hbm [thread:$0]  %s2011_s1, 256, %s2013_s24, [#allocation30], %s2599_s2, %s2599_s2, %s2600_s25  }
 0x589   :  { %2593 = dma.done.wait [#allocation6], 128  }
 0x58a   :  { %2594 = vsyncadd [#allocation6], 4294967168 }
 0x58b   :  { %2595 = dma.done.wait [#allocation30], 512  }
 0x58c   :  { %2596 = vsyncadd [#allocation30], 4294966784 }
 0x58d   :  { %2031 = vsyncpa [#allocation5], 1 }
 0x58e   :  { %2032 = vsyncpa [#allocation8], 1 }
 0x58f   :  { %2033 = vsyncpa [#allocation11], 1 }
 0x590   :  { %2034 = vsyncpa [#allocation14], 1 }
 0x591   :  { %2035 = vsyncpa [#allocation17], 1 }
 0x592   :  { %2036 = vsyncpa [#allocation20], 1 }
 0x593   :  { %2037 = vsyncpa [#allocation23], 1 }
 0x594   :  { %2038 = vsyncpa [#allocation26], 1 }
 0x595   :  { %2039 = vsyncpa [#allocation6], 1 }
 0x596   :  { %2040 = vsyncpa [#allocation30], 1 }

</bundles_post_ra>
